<compile_context>
chip_gen: v7x
topology: tpu7x:2x2x1
jax: 0.10.0
libtpu: 0.0.40
codegen_flags: <defaults>
</compile_context>

<pallas_src>
import functools
import math

import jax
import jax.numpy as jnp
from jax.experimental import pallas as pl
from jax.experimental.pallas import tpu as pltpu

# Finite "-inf": keeps fully-masked (isolated-node) rows NaN-free.
# TODO(synk): PyTorch's masked_fill(-inf) makes isolated-node rows NaN; here
# they silently become a uniform average over all nodes instead.
_NEG_BIG = -1e30


def gat_attn_kernel(dst_ref, srcT_ref, g_ref, adj_ref, out_ref,
                    acc_ref, m_ref, l_ref, *,
                    n_heads, n_hidden, adj_heads, slope, compute_dtype):
    """One (row-tile, key-tile) step: scores -> leaky_relu -> mask -> online
    softmax update -> MXU aggregation into the f32 scratch accumulator."""
    F = n_hidden
    k = pl.program_id(1)

    @pl.when(k == 0)
    def _init():
        m_ref[...] = jnp.full(m_ref.shape, _NEG_BIG, jnp.float32)
        l_ref[...] = jnp.zeros_like(l_ref)
        acc_ref[...] = jnp.zeros_like(acc_ref)

    dst = dst_ref[...].astype(compute_dtype)          # [ti, H]  query-side scores
    srcT = srcT_ref[...].astype(compute_dtype)        # [H, tk]  key-side scores (pre-T)
    g_tile = g_ref[...]                                # [tk, HF] bf16 values
    adj_shared = adj_ref[0] if adj_heads == 1 else None   # int8 [ti, tk]

    for hd in range(n_heads):                          # small static head count
        # e[i, j] = leaky_relu(dst[i, hd] + src[j, hd])
        e = dst[:, hd:hd + 1] + srcT[hd:hd + 1, :]     # [ti, tk]
        e = jnp.where(e >= 0, e, slope * e)
        adj_h = adj_shared if adj_heads == 1 else adj_ref[hd]
        e = jnp.where(adj_h != 0, e, _NEG_BIG)         # masked_fill(adj == 0)

        # --- online softmax (running stats kept in f32 scratch) ---
        m_old = m_ref[:, hd:hd + 1]                    # [ti, 1]
        m_tile = jnp.max(e, axis=-1, keepdims=True).astype(jnp.float32)
        m_new = jnp.maximum(m_old, m_tile)
        alpha = jnp.exp(m_old - m_new)                 # rescale of old partials, <= 1
        p = jnp.exp(e - m_new.astype(compute_dtype))   # [ti, tk] unnormalized probs
        # TODO(synk): nn.Dropout(0.6) on the attention weights is treated as
        # eval-mode identity (no in-kernel RNG dropout applied).
        l_ref[:, hd:hd + 1] = (alpha * l_ref[:, hd:hd + 1]
                               + jnp.sum(p.astype(jnp.float32), axis=-1,
                                         keepdims=True))
        acc_ref[:, hd * F:(hd + 1) * F] = (
            alpha * acc_ref[:, hd * F:(hd + 1) * F]
            + jnp.dot(p.astype(jnp.bfloat16), g_tile[:, hd * F:(hd + 1) * F],
                      preferred_element_type=jnp.float32))
        m_ref[:, hd:hd + 1] = m_new

    @pl.when(k == pl.num_programs(1) - 1)
    def _finalize():
        # normalize the [ti, F] side (cheap) instead of the [ti, tk] matrices.
        inv = pl.reciprocal(l_ref[...], approx=True)   # [ti, H]
        for hd in range(n_heads):
            out_ref[:, hd * F:(hd + 1) * F] = (
                acc_ref[:, hd * F:(hd + 1) * F] * inv[:, hd:hd + 1]
            ).astype(out_ref.dtype)
        # NOTE: these are VMEM slice stores; the HBM writeback of the output
        # block happens once, full-width, when the row tile changes.


def _make_uv(attn_w, n_heads, n_hidden):
    """Fold the repeat / cat(dim=1) / view construction into two [H*F, H] mats.

    e[i, j, h] = attn_w . flat[i, j][2F*h : 2F*(h+1)]
    where flat[i, j] = concat(g[j].flatten(), g[i].flatten())  (length 2*H*F).
    """
    H, F = n_heads, n_hidden
    HF = H * F
    k = jnp.arange(HF)[:, None]          # feature index into g.flatten()
    h = jnp.arange(H)[None, :]           # head index
    idx_u = k - 2 * F * h                # position inside attn_w for the g[j] half
    U = jnp.where((idx_u >= 0) & (idx_u < 2 * F),
                  attn_w[jnp.clip(idx_u, 0, 2 * F - 1)], 0.0)
    idx_v = k + HF - 2 * F * h           # position inside attn_w for the g[i] half
    V = jnp.where((idx_v >= 0) & (idx_v < 2 * F),
                  attn_w[jnp.clip(idx_v, 0, 2 * F - 1)], 0.0)
    return U.astype(jnp.float32), V.astype(jnp.float32)


def _pick_tile(n, pref, quanta):
    """Largest tile <= pref that divides n and is a multiple of one of `quanta`
    (tried in order); falls back to the full extent n."""
    if n <= pref:
        return n
    for q in quanta:
        t = (min(pref, n) // q) * q
        while t >= q:
            if n % t == 0:
                return t
            t -= q
    return n


def _elementwise_dtype():
    """bf16 element-wise/exp only on chips with native bf16 VPU/EUP."""
    try:
        kind = jax.devices()[0].device_kind.lower()
    except Exception:
        return jnp.float32
    if "v6" in kind or "v7" in kind or "7x" in kind:
        return jnp.bfloat16
    return jnp.float32


def _vmem_limit_bytes(step_bytes):
    """Generation-aware VMEM budget: never request the whole per-TC VMEM."""
    try:
        cap = int(pltpu.get_tpu_info().vmem_capacity_bytes)
    except Exception:
        cap = 64 * 2 ** 20               # assume the tightest (v7x per-TC) size
    headroom = 8 * 2 ** 20               # Mosaic internal scratch / safety
    return int(min(cap - headroom, max(32 * 2 ** 20, 2 * step_bytes)))


def gat_forward(h, adj, W, attn_w, *, n_heads, n_hidden, is_concat=True,
                negative_slope=0.2, row_tile=None, key_tile=None,
                compute_dtype=None):
    n = h.shape[0]
    H, F = n_heads, n_hidden
    HF = H * F

    if compute_dtype is None:
        compute_dtype = _elementwise_dtype()

    # ---- cheap O(n*d) projections as plain XLA GEMMs (fused U|V) -----------
    U, V = _make_uv(attn_w.astype(jnp.float32), H, F)
    UV = jnp.concatenate([U, V], axis=1)                    # [HF, 2H]
    g = h.astype(jnp.float32) @ W.astype(jnp.float32).T     # [n, HF]
    scores = g @ UV                                         # [n, 2H] = src | dst
    srcT = scores[:, :H].T                                  # [H, n] key-side, pre-T
    dst = scores[:, H:]                                     # [n, H] query-side
    g_vals = g.astype(jnp.bfloat16)                         # aggregation values

    # ---- adjacency: int8 {0,1}, head-major [Ha, n, n] -----------------------
    if adj.ndim == 2:
        adj = adj[:, :, None]
    Ha = adj.shape[-1]                                      # 1 (shared) or H
    adj_b = jnp.broadcast_to(adj != 0, (n, n, Ha))
    # TODO(synk): for Ha == n_heads this transpose copies the n^2 mask once in
    # HBM; it could be avoided by head-indexing through the BlockSpec instead.
    adj_i8 = jnp.transpose(adj_b, (2, 0, 1)).astype(jnp.int8)   # [Ha, n, n]

    # ---- tiling: MXU-friendly row tiles, lane-legal key tiles ---------------
    ti = _pick_tile(n, row_tile or 256, (256, 128, 8))      # second-minor dims
    tk = _pick_tile(n, key_tile or 512, (256, 128))         # last dim: 128k or full
    grid = (n // ti, n // tk)

    cdt_bytes = jnp.dtype(compute_dtype).itemsize
    step_bytes = (2 * Ha * ti * tk * 1                      # adj tile (int8, dbl-buf)
                  + 2 * (H * tk * 4 + tk * HF * 2)          # srcT + g tiles
                  + 2 * (ti * H * 4 + ti * HF * 4)          # dst + out tiles
                  + ti * HF * 4 + 2 * ti * H * 4            # scratch acc + m + l
                  + (2 * H + 2) * ti * tk * cdt_bytes)      # head-loop temporaries
    vmem_limit = _vmem_limit_bytes(step_bytes)

    n_row_tiles = grid[0]
    cost = pl.CostEstimate(
        flops=int(2 * H * n * n * F + 8 * H * n * n),
        transcendentals=int(H * n * n),
        bytes_accessed=int(Ha * n * n                               # adj (int8)
                           + n_row_tiles * (n * HF * 2 + H * n * 4)  # g + srcT streams
                           + n * H * 4 + n * HF * 4),
    )

    kernel = functools.partial(gat_attn_kernel, n_heads=H, n_hidden=F,
                               adj_heads=Ha, slope=negative_slope,
                               compute_dtype=compute_dtype)
    out = pl.pallas_call(
        kernel,
        out_shape=jax.ShapeDtypeStruct((n, HF), jnp.float32),
        grid=grid,
        in_specs=[
            pl.BlockSpec((ti, H), lambda i, k: (i, 0)),        # dst  (row tiles)
            pl.BlockSpec((H, tk), lambda i, k: (0, k)),        # srcT (key tiles)
            pl.BlockSpec((tk, HF), lambda i, k: (k, 0)),       # g    (key tiles)
            pl.BlockSpec((Ha, ti, tk), lambda i, k: (0, i, k)),  # adj (int8)
        ],
        out_specs=pl.BlockSpec((ti, HF), lambda i, k: (i, 0)),  # resident over k
        scratch_shapes=[pltpu.VMEM((ti, HF), jnp.float32),      # acc
                        pltpu.VMEM((ti, H), jnp.float32),       # running max m
                        pltpu.VMEM((ti, H), jnp.float32)],      # running sum l
        compiler_params=pltpu.CompilerParams(
            dimension_semantics=("parallel", "arbitrary"),
            vmem_limit_bytes=vmem_limit),
        cost_estimate=cost,
    )(dst, srcT, g_vals, adj_i8)

    if is_concat:
        return out
    return out.reshape(n, H, F).mean(axis=1)


def gat_reference(h, adj, W, attn_w, *, n_heads, n_hidden, is_concat=True,
                  negative_slope=0.2):
    """Pure-JAX mirror of the PyTorch forward (incl. the dim=1 cat quirk)."""
    n = h.shape[0]
    H, F = n_heads, n_hidden
    g = (h @ W.T).reshape(n, H, F)
    g_repeat = jnp.tile(g, (n, 1, 1))                  # row i*n+j -> g[j]
    g_rint = jnp.repeat(g, n, axis=0)                  # row i*n+j -> g[i]
    g_cat = jnp.concatenate([g_repeat, g_rint], axis=1).reshape(n, n, H, 2 * F)
    e = g_cat @ attn_w                                 # [n, n, H]
    e = jnp.where(e >= 0.0, e, negative_slope * e)
    adj_b = jnp.broadcast_to(adj, (n, n, H))
    e = jnp.where(adj_b == 0, -jnp.inf, e)
    a = jax.nn.softmax(e, axis=1)
    res = jnp.einsum('ijh,jhf->ihf', a, g)
    return res.reshape(n, H * F) if is_concat else res.mean(axis=1)


if __name__ == "__main__":
    key = jax.random.PRNGKey(0)
    k1, k2, k3, k4 = jax.random.split(key, 4)

    # config 1: tiled path — grid (2, 2), 128-sized MXU-friendly tiles.
    n_nodes, in_features, out_features, n_heads = 256, 16, 32, 2
    n_hidden = out_features // n_heads          # is_concat=True layout

    h = jax.random.normal(k1, (n_nodes, in_features), jnp.float32)
    W = jax.random.normal(k2, (n_heads * n_hidden, in_features),
                          jnp.float32) / math.sqrt(in_features)
    attn_w = jax.random.normal(k3, (2 * n_hidden,),
                               jnp.float32) / math.sqrt(2 * n_hidden)
    # adjacency: [n, n, 1] broadcast over heads; keep the diagonal connected
    # so no row is fully isolated (PyTorch would produce NaN there).
    adj = (jax.random.uniform(k4, (n_nodes, n_nodes, 1)) > 0.4).astype(jnp.float32)
    adj = adj.at[jnp.arange(n_nodes), jnp.arange(n_nodes), 0].set(1.0)

    out = gat_forward(h, adj, W, attn_w, n_heads=n_heads, n_hidden=n_hidden,
                      is_concat=True, row_tile=128, key_tile=128)
    jax.block_until_ready(out)
    ref = gat_reference(h, adj, W, attn_w, n_heads=n_heads, n_hidden=n_hidden,
                        is_concat=True)
    assert out.shape == (n_nodes, n_heads * n_hidden)
    # bf16 MXU operands / bf16 exp on v6e+ (f32 accumulation) -> ~1e-3-level
    # error vs the pure-f32 reference, hence the loosened tolerance.
    assert jnp.allclose(out, ref, atol=5e-2, rtol=5e-2), (
        f"max abs diff {jnp.max(jnp.abs(out - ref))}")

    # is_concat=False (mean over heads) path
    out_m = gat_forward(h, adj, W, attn_w, n_heads=n_heads, n_hidden=n_hidden,
                        is_concat=False, row_tile=128, key_tile=128)
    jax.block_until_ready(out_m)
    ref_m = gat_reference(h, adj, W, attn_w, n_heads=n_heads, n_hidden=n_hidden,
                          is_concat=False)
    assert jnp.allclose(out_m, ref_m, atol=5e-2, rtol=5e-2), (
        f"max abs diff {jnp.max(jnp.abs(out_m - ref_m))}")

    # config 2: small graph -> full-extent (untiled) blocks, grid (1, 1).
    n_small = 40
    h2 = jax.random.normal(k1, (n_small, in_features), jnp.float32)
    adj2 = (jax.random.uniform(k4, (n_small, n_small, 1)) > 0.5).astype(jnp.float32)
    adj2 = adj2.at[jnp.arange(n_small), jnp.arange(n_small), 0].set(1.0)
    out2 = gat_forward(h2, adj2, W, attn_w, n_heads=n_heads, n_hidden=n_hidden,
                       is_concat=True)
    jax.block_until_ready(out2)
    ref2 = gat_reference(h2, adj2, W, attn_w, n_heads=n_heads, n_hidden=n_hidden,
                         is_concat=True)
    assert jnp.allclose(out2, ref2, atol=5e-2, rtol=5e-2), (
        f"max abs diff {jnp.max(jnp.abs(out2 - ref2))}")

    print("KERNEL_OK")
</pallas_src>

<mosaic_0001>
module attributes {stable_mosaic.version = 11 : i64} {
  func.func @gat_attn_kernel(%arg0: i32, %arg1: i32, %arg2: memref<128x2xf32, #tpu.memory_space<vmem>>, %arg3: memref<2x128xf32, #tpu.memory_space<vmem>>, %arg4: memref<128x32xbf16, #tpu.memory_space<vmem>>, %arg5: memref<1x128x128xi8, #tpu.memory_space<vmem>>, %arg6: memref<128x32xf32, #tpu.memory_space<vmem>>, %arg7: memref<128x32xf32, #tpu.memory_space<vmem>>, %arg8: memref<128x2xf32, #tpu.memory_space<vmem>>, %arg9: memref<128x2xf32, #tpu.memory_space<vmem>>) attributes {dimension_semantics = [#tpu.dimension_semantics<parallel>, #tpu.dimension_semantics<arbitrary>], iteration_bounds = array<i64: 2, 2>, scalar_prefetch = 0 : i64, scratch_operands = 3 : i64, tpu.core_type = #tpu.core_type<tc>, window_params = [{transform_indices = @transform_0, window_bounds = array<i64: 128, 2>}, {transform_indices = @transform_1, window_bounds = array<i64: 2, 128>}, {transform_indices = @transform_2, window_bounds = array<i64: 128, 32>}, {transform_indices = @transform_3, window_bounds = array<i64: 1, 128, 128>}, {transform_indices = @transform_4, window_bounds = array<i64: 128, 32>}]} {
    %c0_i32 = arith.constant 0 : i32
    %0 = arith.cmpi eq, %arg1, %c0_i32 : i32
    %1 = arith.extui %0 : i1 to i32
    %c0_i32_0 = arith.constant 0 : i32
    %2 = arith.cmpi ne, %1, %c0_i32_0 : i32
    scf.if %2 {
      %cst_44 = arith.constant -1.000000e+30 : f32
      %87 = vector.broadcast %cst_44 : f32 to vector<128x2xf32>
      %c0_45 = arith.constant 0 : index
      %c0_46 = arith.constant 0 : index
      %88 = vector.load %arg8[%c0_45, %c0_46] : memref<128x2xf32, #tpu.memory_space<vmem>>, vector<128x2xf32>
      tpu.vector_store %arg8[%c0_45, %c0_46], %87 {strides = array<i32>} : memref<128x2xf32, #tpu.memory_space<vmem>>, vector<128x2xf32>,
      %cst_47 = arith.constant 0.000000e+00 : f32
      %89 = vector.broadcast %cst_47 : f32 to vector<128x2xf32>
      %c0_48 = arith.constant 0 : index
      %c0_49 = arith.constant 0 : index
      %90 = vector.load %arg9[%c0_48, %c0_49] : memref<128x2xf32, #tpu.memory_space<vmem>>, vector<128x2xf32>
      tpu.vector_store %arg9[%c0_48, %c0_49], %89 {strides = array<i32>} : memref<128x2xf32, #tpu.memory_space<vmem>>, vector<128x2xf32>,
      %cst_50 = arith.constant 0.000000e+00 : f32
      %91 = vector.broadcast %cst_50 : f32 to vector<128x32xf32>
      %c0_51 = arith.constant 0 : index
      %c0_52 = arith.constant 0 : index
      %92 = vector.load %arg7[%c0_51, %c0_52] : memref<128x32xf32, #tpu.memory_space<vmem>>, vector<128x32xf32>
      tpu.vector_store %arg7[%c0_51, %c0_52], %91 {strides = array<i32>} : memref<128x32xf32, #tpu.memory_space<vmem>>, vector<128x32xf32>,
    } else {
    }
    %c0 = arith.constant 0 : index
    %c0_1 = arith.constant 0 : index
    %3 = vector.load %arg2[%c0, %c0_1] : memref<128x2xf32, #tpu.memory_space<vmem>>, vector<128x2xf32>
    %c0_2 = arith.constant 0 : index
    %c0_3 = arith.constant 0 : index
    %4 = vector.load %arg3[%c0_2, %c0_3] : memref<2x128xf32, #tpu.memory_space<vmem>>, vector<2x128xf32>
    %c0_4 = arith.constant 0 : index
    %c0_5 = arith.constant 0 : index
    %5 = vector.load %arg4[%c0_4, %c0_5] : memref<128x32xbf16, #tpu.memory_space<vmem>>, vector<128x32xbf16>
    %c0_6 = arith.constant 0 : index
    %c0_7 = arith.constant 0 : index
    %c0_8 = arith.constant 0 : index
    %6 = vector.load %arg5[%c0_6, %c0_7, %c0_8] : memref<1x128x128xi8, #tpu.memory_space<vmem>>, vector<1x128x128xi8>
    %7 = vector.shape_cast %6 : vector<1x128x128xi8> to vector<128x128xi8>
    %8 = vector.extract_strided_slice %3 {offsets = [0, 0], sizes = [128, 1], strides = [1, 1]} : vector<128x2xf32> to vector<128x1xf32>
    %9 = vector.extract_strided_slice %4 {offsets = [0, 0], sizes = [1, 128], strides = [1, 1]} : vector<2x128xf32> to vector<1x128xf32>
    %10 = vector.broadcast %8 : vector<128x1xf32> to vector<128x128xf32>
    %11 = vector.broadcast %9 : vector<1x128xf32> to vector<128x128xf32>
    %12 = arith.addf %10, %11 : vector<128x128xf32>
    %cst = arith.constant 0.000000e+00 : f32
    %13 = vector.broadcast %cst : f32 to vector<128x128xf32>
    %14 = arith.cmpf oge, %12, %13 : vector<128x128xf32>
    %cst_9 = arith.constant 2.000000e-01 : f32
    %15 = vector.broadcast %cst_9 : f32 to vector<128x128xf32>
    %16 = arith.mulf %15, %12 : vector<128x128xf32>
    %17 = arith.select %14, %12, %16 : vector<128x128xi1>, vector<128x128xf32>
    %c0_i8 = arith.constant 0 : i8
    %18 = vector.broadcast %c0_i8 : i8 to vector<128x128xi8>
    %19 = arith.cmpi ne, %7, %18 : vector<128x128xi8>
    %cst_10 = arith.constant -1.000000e+30 : f32
    %20 = vector.broadcast %cst_10 : f32 to vector<128x128xf32>
    %21 = arith.select %19, %17, %20 : vector<128x128xi1>, vector<128x128xf32>
    %c0_11 = arith.constant 0 : index
    %c0_12 = arith.constant 0 : index
    %22 = vector.load %arg8[%c0_11, %c0_12] : memref<128x2xf32, #tpu.memory_space<vmem>>, vector<128x1xf32>
    %cst_13 = arith.constant dense<0xFF800000> : vector<128xf32>
    %23 = vector.multi_reduction <maximumf>, %21, %cst_13 [1] : vector<128x128xf32> to vector<128xf32>
    %24 = vector.shape_cast %23 : vector<128xf32> to vector<128x1xf32>
    %25 = arith.maximumf %22, %24 : vector<128x1xf32>
    %26 = arith.subf %22, %25 : vector<128x1xf32>
    %27 = math.exp %26 : vector<128x1xf32>
    %28 = vector.broadcast %25 : vector<128x1xf32> to vector<128x128xf32>
    %29 = arith.subf %21, %28 : vector<128x128xf32>
    %30 = math.exp %29 : vector<128x128xf32>
    %c0_14 = arith.constant 0 : index
    %c0_15 = arith.constant 0 : index
    %31 = vector.load %arg9[%c0_14, %c0_15] : memref<128x2xf32, #tpu.memory_space<vmem>>, vector<128x1xf32>
    %32 = arith.mulf %27, %31 : vector<128x1xf32>
    %cst_16 = arith.constant dense<0.000000e+00> : vector<128xf32>
    %33 = vector.multi_reduction <add>, %30, %cst_16 [1] : vector<128x128xf32> to vector<128xf32>
    %34 = vector.shape_cast %33 : vector<128xf32> to vector<128x1xf32>
    %35 = arith.addf %32, %34 : vector<128x1xf32>
    %c0_17 = arith.constant 0 : index
    %c0_18 = arith.constant 0 : index
    %36 = vector.load %arg9[%c0_17, %c0_18] : memref<128x2xf32, #tpu.memory_space<vmem>>, vector<128x1xf32>
    tpu.vector_store %arg9[%c0_17, %c0_18], %35 {strides = array<i32>} : memref<128x2xf32, #tpu.memory_space<vmem>>, vector<128x1xf32>,
    %c0_19 = arith.constant 0 : index
    %c0_20 = arith.constant 0 : index
    %37 = vector.load %arg7[%c0_19, %c0_20] : memref<128x32xf32, #tpu.memory_space<vmem>>, vector<128x16xf32>
    %38 = vector.broadcast %27 : vector<128x1xf32> to vector<128x16xf32>
    %39 = arith.mulf %38, %37 : vector<128x16xf32>
    %40 = arith.truncf %30 : vector<128x128xf32> to vector<128x128xbf16>
    %41 = vector.extract_strided_slice %5 {offsets = [0, 0], sizes = [128, 16], strides = [1, 1]} : vector<128x32xbf16> to vector<128x16xbf16>
    %cst_21 = arith.constant dense<0.000000e+00> : vector<128x16xf32>
    %42 = tpu.matmul %40, %41, %cst_21 {dimension_numbers = #tpu.dot_dimension_numbers<[1], [0], [0], [1], [0, 0, 1, 1], [], []>} : vector<128x128xbf16>, vector<128x16xbf16>, vector<128x16xf32> -> vector<128x16xf32>
    %43 = arith.addf %39, %42 : vector<128x16xf32>
    %c0_22 = arith.constant 0 : index
    %c0_23 = arith.constant 0 : index
    %44 = vector.load %arg7[%c0_22, %c0_23] : memref<128x32xf32, #tpu.memory_space<vmem>>, vector<128x16xf32>
    tpu.vector_store %arg7[%c0_22, %c0_23], %43 {strides = array<i32>} : memref<128x32xf32, #tpu.memory_space<vmem>>, vector<128x16xf32>,
    %c0_24 = arith.constant 0 : index
    %c0_25 = arith.constant 0 : index
    %45 = vector.load %arg8[%c0_24, %c0_25] : memref<128x2xf32, #tpu.memory_space<vmem>>, vector<128x1xf32>
    tpu.vector_store %arg8[%c0_24, %c0_25], %25 {strides = array<i32>} : memref<128x2xf32, #tpu.memory_space<vmem>>, vector<128x1xf32>,
    %46 = vector.extract_strided_slice %3 {offsets = [0, 1], sizes = [128, 1], strides = [1, 1]} : vector<128x2xf32> to vector<128x1xf32>
    %47 = vector.extract_strided_slice %4 {offsets = [1, 0], sizes = [1, 128], strides = [1, 1]} : vector<2x128xf32> to vector<1x128xf32>
    %48 = vector.broadcast %46 : vector<128x1xf32> to vector<128x128xf32>
    %49 = vector.broadcast %47 : vector<1x128xf32> to vector<128x128xf32>
    %50 = arith.addf %48, %49 : vector<128x128xf32>
    %cst_26 = arith.constant 0.000000e+00 : f32
    %51 = vector.broadcast %cst_26 : f32 to vector<128x128xf32>
    %52 = arith.cmpf oge, %50, %51 : vector<128x128xf32>
    %cst_27 = arith.constant 2.000000e-01 : f32
    %53 = vector.broadcast %cst_27 : f32 to vector<128x128xf32>
    %54 = arith.mulf %53, %50 : vector<128x128xf32>
    %55 = arith.select %52, %50, %54 : vector<128x128xi1>, vector<128x128xf32>
    %c0_i8_28 = arith.constant 0 : i8
    %56 = vector.broadcast %c0_i8_28 : i8 to vector<128x128xi8>
    %57 = arith.cmpi ne, %7, %56 : vector<128x128xi8>
    %cst_29 = arith.constant -1.000000e+30 : f32
    %58 = vector.broadcast %cst_29 : f32 to vector<128x128xf32>
    %59 = arith.select %57, %55, %58 : vector<128x128xi1>, vector<128x128xf32>
    %c0_30 = arith.constant 0 : index
    %c1 = arith.constant 1 : index
    %60 = vector.load %arg8[%c0_30, %c1] : memref<128x2xf32, #tpu.memory_space<vmem>>, vector<128x1xf32>
    %cst_31 = arith.constant dense<0xFF800000> : vector<128xf32>
    %61 = vector.multi_reduction <maximumf>, %59, %cst_31 [1] : vector<128x128xf32> to vector<128xf32>
    %62 = vector.shape_cast %61 : vector<128xf32> to vector<128x1xf32>
    %63 = arith.maximumf %60, %62 : vector<128x1xf32>
    %64 = arith.subf %60, %63 : vector<128x1xf32>
    %65 = math.exp %64 : vector<128x1xf32>
    %66 = vector.broadcast %63 : vector<128x1xf32> to vector<128x128xf32>
    %67 = arith.subf %59, %66 : vector<128x128xf32>
    %68 = math.exp %67 : vector<128x128xf32>
    %c0_32 = arith.constant 0 : index
    %c1_33 = arith.constant 1 : index
    %69 = vector.load %arg9[%c0_32, %c1_33] : memref<128x2xf32, #tpu.memory_space<vmem>>, vector<128x1xf32>
    %70 = arith.mulf %65, %69 : vector<128x1xf32>
    %cst_34 = arith.constant dense<0.000000e+00> : vector<128xf32>
    %71 = vector.multi_reduction <add>, %68, %cst_34 [1] : vector<128x128xf32> to vector<128xf32>
    %72 = vector.shape_cast %71 : vector<128xf32> to vector<128x1xf32>
    %73 = arith.addf %70, %72 : vector<128x1xf32>
    %c0_35 = arith.constant 0 : index
    %c1_36 = arith.constant 1 : index
    %74 = vector.load %arg9[%c0_35, %c1_36] : memref<128x2xf32, #tpu.memory_space<vmem>>, vector<128x1xf32>
    tpu.vector_store %arg9[%c0_35, %c1_36], %73 {strides = array<i32>} : memref<128x2xf32, #tpu.memory_space<vmem>>, vector<128x1xf32>,
    %c0_37 = arith.constant 0 : index
    %c16 = arith.constant 16 : index
    %75 = vector.load %arg7[%c0_37, %c16] : memref<128x32xf32, #tpu.memory_space<vmem>>, vector<128x16xf32>
    %76 = vector.broadcast %65 : vector<128x1xf32> to vector<128x16xf32>
    %77 = arith.mulf %76, %75 : vector<128x16xf32>
    %78 = arith.truncf %68 : vector<128x128xf32> to vector<128x128xbf16>
    %79 = vector.extract_strided_slice %5 {offsets = [0, 16], sizes = [128, 16], strides = [1, 1]} : vector<128x32xbf16> to vector<128x16xbf16>
    %cst_38 = arith.constant dense<0.000000e+00> : vector<128x16xf32>
    %80 = tpu.matmul %78, %79, %cst_38 {dimension_numbers = #tpu.dot_dimension_numbers<[1], [0], [0], [1], [0, 0, 1, 1], [], []>} : vector<128x128xbf16>, vector<128x16xbf16>, vector<128x16xf32> -> vector<128x16xf32>
    %81 = arith.addf %77, %80 : vector<128x16xf32>
    %c0_39 = arith.constant 0 : index
    %c16_40 = arith.constant 16 : index
    %82 = vector.load %arg7[%c0_39, %c16_40] : memref<128x32xf32, #tpu.memory_space<vmem>>, vector<128x16xf32>
    tpu.vector_store %arg7[%c0_39, %c16_40], %81 {strides = array<i32>} : memref<128x32xf32, #tpu.memory_space<vmem>>, vector<128x16xf32>,
    %c0_41 = arith.constant 0 : index
    %c1_42 = arith.constant 1 : index
    %83 = vector.load %arg8[%c0_41, %c1_42] : memref<128x2xf32, #tpu.memory_space<vmem>>, vector<128x1xf32>
    tpu.vector_store %arg8[%c0_41, %c1_42], %63 {strides = array<i32>} : memref<128x2xf32, #tpu.memory_space<vmem>>, vector<128x1xf32>,
    %c1_i32 = arith.constant 1 : i32
    %84 = arith.cmpi eq, %arg1, %c1_i32 : i32
    %85 = arith.extui %84 : i1 to i32
    %c0_i32_43 = arith.constant 0 : i32
    %86 = arith.cmpi ne, %85, %c0_i32_43 : i32
    scf.if %86 {
      %c0_44 = arith.constant 0 : index
      %c0_45 = arith.constant 0 : index
      %87 = vector.load %arg9[%c0_44, %c0_45] : memref<128x2xf32, #tpu.memory_space<vmem>>, vector<128x2xf32>
      %88 = tpu.reciprocal %87 {approx = true} : vector<128x2xf32> -> vector<128x2xf32>
      %c0_46 = arith.constant 0 : index
      %c0_47 = arith.constant 0 : index
      %89 = vector.load %arg7[%c0_46, %c0_47] : memref<128x32xf32, #tpu.memory_space<vmem>>, vector<128x16xf32>
      %90 = vector.extract_strided_slice %88 {offsets = [0, 0], sizes = [128, 1], strides = [1, 1]} : vector<128x2xf32> to vector<128x1xf32>
      %91 = vector.broadcast %90 : vector<128x1xf32> to vector<128x16xf32>
      %92 = arith.mulf %89, %91 : vector<128x16xf32>
      %c0_48 = arith.constant 0 : index
      %c0_49 = arith.constant 0 : index
      %93 = vector.load %arg6[%c0_48, %c0_49] : memref<128x32xf32, #tpu.memory_space<vmem>>, vector<128x16xf32>
      tpu.vector_store %arg6[%c0_48, %c0_49], %92 {strides = array<i32>} : memref<128x32xf32, #tpu.memory_space<vmem>>, vector<128x16xf32>,
      %c0_50 = arith.constant 0 : index
      %c16_51 = arith.constant 16 : index
      %94 = vector.load %arg7[%c0_50, %c16_51] : memref<128x32xf32, #tpu.memory_space<vmem>>, vector<128x16xf32>
      %95 = vector.extract_strided_slice %88 {offsets = [0, 1], sizes = [128, 1], strides = [1, 1]} : vector<128x2xf32> to vector<128x1xf32>
      %96 = vector.broadcast %95 : vector<128x1xf32> to vector<128x16xf32>
      %97 = arith.mulf %94, %96 : vector<128x16xf32>
      %c0_52 = arith.constant 0 : index
      %c16_53 = arith.constant 16 : index
      %98 = vector.load %arg6[%c0_52, %c16_53] : memref<128x32xf32, #tpu.memory_space<vmem>>, vector<128x16xf32>
      tpu.vector_store %arg6[%c0_52, %c16_53], %97 {strides = array<i32>} : memref<128x32xf32, #tpu.memory_space<vmem>>, vector<128x16xf32>,
    } else {
    }
    return
  }
  func.func @transform_0(%arg0: i32, %arg1: i32) -> (i32, i32) {
    %c0_i32 = arith.constant 0 : i32
    %c0_i32_0 = arith.constant 0 : i32
    return %arg0, %c0_i32 : i32, i32
  }
  func.func @transform_1(%arg0: i32, %arg1: i32) -> (i32, i32) {
    %c0_i32 = arith.constant 0 : i32
    %c0_i32_0 = arith.constant 0 : i32
    return %c0_i32, %arg1 : i32, i32
  }
  func.func @transform_2(%arg0: i32, %arg1: i32) -> (i32, i32) {
    %c0_i32 = arith.constant 0 : i32
    %c0_i32_0 = arith.constant 0 : i32
    return %arg1, %c0_i32 : i32, i32
  }
  func.func @transform_3(%arg0: i32, %arg1: i32) -> (i32, i32, i32) {
    %c0_i32 = arith.constant 0 : i32
    %c0_i32_0 = arith.constant 0 : i32
    return %c0_i32, %arg0, %arg1 : i32, i32, i32
  }
  func.func @transform_4(%arg0: i32, %arg1: i32) -> (i32, i32) {
    %c0_i32 = arith.constant 0 : i32
    %c0_i32_0 = arith.constant 0 : i32
    return %arg0, %c0_i32 : i32, i32
  }
}

</mosaic_0001>

<bundles_post_ra>
// kernel: tpu_custom_call.1
= control target key start
LH: loop header
LB: loop body
LE: loop exit
PB: predicated region body
PF: predicated region fallthrough
CT: control target
= control target key end

     0   :  { %s3042_s15 = smov 0   ;;  %s3044_s16 = smov 0   ;;  %s4506_s0 = inlined_call_operand.vmem [shape: f32[256,2], index: 0, kind: input, shape index: {}]   ;;  %s4507_s1 = inlined_call_operand.vmem [shape: f32[2,256], index: 1, kind: input, shape index: {}]   ;;  %s4508_s2 = inlined_call_operand.vmem [shape: bf16[256,32], index: 2, kind: input, shape index: {}]   ;;  %s4509_s3 = inlined_call_operand.vmem [shape: s8[1,256,256], index: 3, kind: input, shape index: {}]   ;;  %s4510_s4 = inlined_call_operand.vmem [shape: f32[256,32], index: 4, kind: output, shape index: {}]  }
   0x1   :  { %s3046_s17 = smov 0   ;;  %s3048_s18 = smov 0  }
   0x2   :  { %s3050_s19 = smov 0   ;;  %s3052_s20 = smov 0  }
   0x3   :  { %s3054_s21 = smov 0  }
   0x4 LB: > { %s23_s22 = sadd.s32 1, %s2999_s19  ;;  %s26_s23 = sadd.s32 1, %s3003_s20  ;;  %s3007_s21 = sphi %s3054_s21, %s14_s21   ;;  %s3003_s20 = sphi %s3052_s20, %s4717_s20   ;;  %s2999_s19 = sphi %s3050_s19, %s4716_s19   ;;  %s2995_s18 = sphi %s3048_s18, %s4715_s18   ;;  %s2991_s17 = sphi %s3046_s17, %s4714_s17   ;;  %s2987_s16 = sphi %s3044_s16, %s4713_s16   ;;  %s2983_s15 = sphi %s3042_s15, %s4712_s15  }
   0x5   : > { %p24_p0 = scmp.ge.s32.totalorder %s23_s22, 2  ;;  %p120_p1 = scmp.ne.s32.totalorder %s2987_s16, %s2983_s15 }
   0x6   : > { %p121_p2 = scmp.eq.s32.totalorder %s3007_s21, 0  ;;  %s113_s27 = sadd.s32 1, %s2987_s16 }
   0x7   : > { %s4719_s22 = smov (%p24_p0, %s23_s22), 0  ;;  %s4721_s23 = smov (!%p24_p0, %s26_s23), %s3003_s20 }
   0x8   : > { %p122_p3 = por %p121_p2, %p120_p1  ;;  %p28_p4 = scmp.ge.s32.totalorder %s4721_s23, 2 }
   0x9   : > { %s109_s24 = ssub.s32 %s2999_s19, %s4719_s22  ;;  %p2583_p6 = scmp.ge.s32.totalorder %s3007_s21, 4 }
   0xa   : > { %s4723_s23 = smov (%p28_p4, %s4721_s23), 0 }
   0xb   : > { %s108_s25 = ssub.s32 %s3003_s20, %s4723_s23  ;;  %172 = sbr.rel (%p2583_p6) target bundleno = 26 (0x1a), region = 16 }
   0xc   : > { %s110_s26 = sor.u32 %s109_s24, %s108_s25 }
   0xd   : > { %p111_p5 = scmp.eq.s32.totalorder %s110_s26, 0 }
   0xf   : > { %s3093_s28 = scalar_select %p111_p5, %s2987_s16, %s113_s27  }
  0x12   : > { %200 = sbr.rel (!%p122_p3) target bundleno = 26 (0x1a), region = 32  ;;  %s202_s29 = sand.u32 (%p122_p3), 1, %s2987_s16  }
  0x13   : > { %s2609_s30 = sshll.u32 (%p122_p3), %s3003_s20, 3  ;;  %s2584_s5 = sshll.u32 (%p122_p3), %s202_s29, 5 }
  0x14   : > { %s207_s6 = sadd.s32 (%p122_p3), %s2999_s19, %s2609_s30  ;;  %s204_s11 = scalar_lea.vmem (%p122_p3), [#allocation5], %s2584_s5 }
  0x15   : > { %s2587_s7 = sshll.u32 (%p122_p3), %s207_s6, 3 }
  0x16   : > { %s209_s10 = scalar_lea.vmem (%p122_p3), %s4509_s3, %s2587_s7 }
  0x17   : > { %v243_v0 = vld [vmem:[%s209_s10] sm:$0xff] (%p122_p3)  ;;  %v245_v1 = vld [vmem:[%s209_s10 + $0x10] sm:$0xff] (%p122_p3) }
  0x18   : > { %v247_v2 = vld [vmem:[%s209_s10 + $0x20] sm:$0xff] (%p122_p3)  ;;  %244 = vst [vmem:[%s204_s11] sm:$0xff] (%p122_p3), %v243_v0  ;;  %246 = vst [vmem:[%s204_s11 + $0x8] sm:$0xff] (%p122_p3), %v245_v1  ;;  %v249_v3 = vld [vmem:[%s209_s10 + $0x30] sm:$0xff] (%p122_p3) }
  0x19   : > { %248 = vst [vmem:[%s204_s11 + $0x10] sm:$0xff] %v247_v2  ;;  %250 = vst [vmem:[%s204_s11 + $0x18] sm:$0xff] %v249_v3 }
  0x1a PF: > { %p2588_p7 = scmp.ge.s32.totalorder %s3007_s21, 1  ;;  %p255_p8 = scmp.lt.s32.totalorder %s3007_s21, 5 }
  0x1c   : > { %p256_p9 = pnand %p2588_p7, %p255_p8 }
  0x1e   : > { %259 = sbr.rel (%p256_p9) target bundleno = 1098 (0x44a), region = 70 }
  0x25   : > { %s262_s12 = sand.u32 1, %s2983_s15   ;;  %s2590_s13 = sshll.u32 %s2995_s18, 4 }
  0x26   : > { %s2589_s14 = sshll.u32 %s262_s12, 5  ;;  %p302_p10 = scmp.lt.s32.totalorder %s2590_s13, 31 }
  0x27   : > { %p307_p11 = scmp.lt.s32.totalorder %s2991_s17, 1  ;;  %s2593_s26 = sshll.u32 %s2991_s17, 4 }
  0x28   : > { %s4725_s13 = smov (!%p302_p10, %s2590_s13), 31  ;;  %p312_p12 = scmp.lt.s32.totalorder %s2593_s26, 31 }
  0x29   : > { %s308_s24 = scalar_select %p307_p11, %s2991_s17, 1 }
  0x2a   : > { %s2591_s25 = sshll.u32 %s4725_s13, 3  ;;  %s4727_s26 = smov (!%p312_p12, %s2593_s26), 31 }
  0x2b   : > { %s3112_s30 = scalar_lea.vmem %s4506_s0, %s2591_s25  ;;  %s2592_s5 = sshll.u32 %s308_s24, 1 }
  0x2c   : > { %s3117_s8 = scalar_lea.vmem %s4507_s1, %s2592_s5  ;;  %s3122_s9 = scalar_lea.vmem %s4510_s4, %s2591_s25 }
  0x2d   : > { %s2594_s10 = sshll.u32 %s4727_s26, 2  ;;  %s3129_s27 = scalar_lea.vmem [#allocation5], %s2589_s14 }
  0x2e   : > { %s3127_s13 = scalar_lea.vmem %s4508_s2, %s2594_s10  ;;  %p2597_p13 = scmp.ne.s32.totalorder %s2991_s17, 0 }
  0x2f   : > { %vm331_vm0 = vcmask (!%p2597_p13), 15360   ;;  %vm364_vm1 = vcmask (!%p2597_p13), 261120   ;;  %v3009_v4 = vmov (!%p2597_p13), -1e+30   ;;  %v3010_v5 = vmov (!%p2597_p13), 0.0  }
  0x30   : > { %330 = sbr.rel (%p2597_p13) target bundleno = 72 (0x48), region = 78  ;;  %332 = vst.msk [vmem:[#allocation3] sm:$0xff] (!%p2597_p13), %vm331_vm0, %v3009_v4  ;;  %333 = vst.msk [vmem:[#allocation3 + $0x8] sm:$0xff] (!%p2597_p13), %vm331_vm0, %v3009_v4 }
  0x31   : > { %334 = vst.msk [vmem:[#allocation3 + $0x10] sm:$0xff] (!%p2597_p13), %vm331_vm0, %v3009_v4  ;;  %335 = vst.msk [vmem:[#allocation3 + $0x18] sm:$0xff] (!%p2597_p13), %vm331_vm0, %v3009_v4 }
  0x32   : > { %336 = vst.msk [vmem:[#allocation3 + $0x20] sm:$0xff] (!%p2597_p13), %vm331_vm0, %v3009_v4  ;;  %337 = vst.msk [vmem:[#allocation3 + $0x28] sm:$0xff] (!%p2597_p13), %vm331_vm0, %v3009_v4 }
  0x33   : > { %338 = vst.msk [vmem:[#allocation3 + $0x30] sm:$0xff] (!%p2597_p13), %vm331_vm0, %v3009_v4  ;;  %339 = vst.msk [vmem:[#allocation3 + $0x38] sm:$0xff] (!%p2597_p13), %vm331_vm0, %v3009_v4 }
  0x34   : > { %340 = vst.msk [vmem:[#allocation3 + $0x40] sm:$0xff] (!%p2597_p13), %vm331_vm0, %v3009_v4  ;;  %341 = vst.msk [vmem:[#allocation3 + $0x48] sm:$0xff] (!%p2597_p13), %vm331_vm0, %v3009_v4 }
  0x35   : > { %342 = vst.msk [vmem:[#allocation3 + $0x50] sm:$0xff] (!%p2597_p13), %vm331_vm0, %v3009_v4  ;;  %343 = vst.msk [vmem:[#allocation3 + $0x58] sm:$0xff] (!%p2597_p13), %vm331_vm0, %v3009_v4 }
  0x36   : > { %344 = vst.msk [vmem:[#allocation3 + $0x60] sm:$0xff] (!%p2597_p13), %vm331_vm0, %v3009_v4  ;;  %345 = vst.msk [vmem:[#allocation3 + $0x68] sm:$0xff] (!%p2597_p13), %vm331_vm0, %v3009_v4 }
  0x37   : > { %346 = vst.msk [vmem:[#allocation3 + $0x70] sm:$0xff] %vm331_vm0, %v3009_v4  ;;  %347 = vst.msk [vmem:[#allocation3 + $0x78] sm:$0xff] %vm331_vm0, %v3009_v4 }
  0x38   : > { %348 = vst.msk [vmem:[#allocation4] sm:$0xff] %vm331_vm0, %v3010_v5  ;;  %349 = vst.msk [vmem:[#allocation4 + $0x8] sm:$0xff] %vm331_vm0, %v3010_v5 }
  0x39   : > { %350 = vst.msk [vmem:[#allocation4 + $0x10] sm:$0xff] %vm331_vm0, %v3010_v5  ;;  %351 = vst.msk [vmem:[#allocation4 + $0x18] sm:$0xff] %vm331_vm0, %v3010_v5 }
  0x3a   : > { %352 = vst.msk [vmem:[#allocation4 + $0x20] sm:$0xff] %vm331_vm0, %v3010_v5  ;;  %353 = vst.msk [vmem:[#allocation4 + $0x28] sm:$0xff] %vm331_vm0, %v3010_v5 }
  0x3b   : > { %354 = vst.msk [vmem:[#allocation4 + $0x30] sm:$0xff] %vm331_vm0, %v3010_v5  ;;  %355 = vst.msk [vmem:[#allocation4 + $0x38] sm:$0xff] %vm331_vm0, %v3010_v5 }
  0x3c   : > { %356 = vst.msk [vmem:[#allocation4 + $0x40] sm:$0xff] %vm331_vm0, %v3010_v5  ;;  %357 = vst.msk [vmem:[#allocation4 + $0x48] sm:$0xff] %vm331_vm0, %v3010_v5 }
  0x3d   : > { %358 = vst.msk [vmem:[#allocation4 + $0x50] sm:$0xff] %vm331_vm0, %v3010_v5  ;;  %359 = vst.msk [vmem:[#allocation4 + $0x58] sm:$0xff] %vm331_vm0, %v3010_v5 }
  0x3e   : > { %360 = vst.msk [vmem:[#allocation4 + $0x60] sm:$0xff] %vm331_vm0, %v3010_v5  ;;  %361 = vst.msk [vmem:[#allocation4 + $0x68] sm:$0xff] %vm331_vm0, %v3010_v5 }
  0x3f   : > { %362 = vst.msk [vmem:[#allocation4 + $0x70] sm:$0xff] %vm331_vm0, %v3010_v5  ;;  %363 = vst.msk [vmem:[#allocation4 + $0x78] sm:$0xff] %vm331_vm0, %v3010_v5 }
  0x40   : > { %365 = vst.msk [vmem:[#allocation2] sm:$0xff] %vm364_vm1, %v3010_v5  ;;  %366 = vst.msk [vmem:[#allocation2 + $0x8] sm:$0xff] %vm364_vm1, %v3010_v5 }
  0x41   : > { %367 = vst.msk [vmem:[#allocation2 + $0x10] sm:$0xff] %vm364_vm1, %v3010_v5  ;;  %368 = vst.msk [vmem:[#allocation2 + $0x18] sm:$0xff] %vm364_vm1, %v3010_v5 }
  0x42   : > { %369 = vst.msk [vmem:[#allocation2 + $0x20] sm:$0xff] %vm364_vm1, %v3010_v5  ;;  %370 = vst.msk [vmem:[#allocation2 + $0x28] sm:$0xff] %vm364_vm1, %v3010_v5 }
  0x43   : > { %371 = vst.msk [vmem:[#allocation2 + $0x30] sm:$0xff] %vm364_vm1, %v3010_v5  ;;  %372 = vst.msk [vmem:[#allocation2 + $0x38] sm:$0xff] %vm364_vm1, %v3010_v5 }
  0x44   : > { %373 = vst.msk [vmem:[#allocation2 + $0x40] sm:$0xff] %vm364_vm1, %v3010_v5  ;;  %374 = vst.msk [vmem:[#allocation2 + $0x48] sm:$0xff] %vm364_vm1, %v3010_v5 }
  0x45   : > { %375 = vst.msk [vmem:[#allocation2 + $0x50] sm:$0xff] %vm364_vm1, %v3010_v5  ;;  %376 = vst.msk [vmem:[#allocation2 + $0x58] sm:$0xff] %vm364_vm1, %v3010_v5 }
  0x46   : > { %377 = vst.msk [vmem:[#allocation2 + $0x60] sm:$0xff] %vm364_vm1, %v3010_v5  ;;  %378 = vst.msk [vmem:[#allocation2 + $0x68] sm:$0xff] %vm364_vm1, %v3010_v5 }
  0x47   : > { %379 = vst.msk [vmem:[#allocation2 + $0x70] sm:$0xff] %vm364_vm1, %v3010_v5  ;;  %380 = vst.msk [vmem:[#allocation2 + $0x78] sm:$0xff] %vm364_vm1, %v3010_v5 }
  0x48 PF: > { %v383_v6 = vld [vmem:[%s3112_s30 + $0x10] sm:$0xff]  ;;  %v382_v7 = vld [vmem:[%s3112_s30 + $0x8] sm:$0xff]  ;;  %v4514_v8 = vmov 1   ;;  %v4512_v9 = vmov 0   ;;  %v384_v10 = vld [vmem:[%s3112_s30 + $0x18] sm:$0xff]  ;;  %v498_v46 = vlaneseq  ;;  %s3013_s14 = smov 112  }
  0x49   : > { %2772 = vset.pattern.permute.xlu0 %v4514_v8  ;;  %2770 = vset.pattern.permute.xlu1 %v4512_v9  ;;  %v385_v11 = vld [vmem:[%s3112_s30 + $0x20] sm:$0xff]  ;;  %v386_v12 = vld [vmem:[%s3112_s30 + $0x28] sm:$0xff]  ;;  %v387_v13 = vld [vmem:[%s3112_s30 + $0x30] sm:$0xff]  ;;  %s3014_s24 = smov 16   ;;  %p2606_p0 = scmp.ne.s32.totalorder %s2991_s17, 1 }
  0x4a   : > { %430 = vperm.xlu1 %2770, %v383_v6   ;;  %1358 = vperm.xlu0 %2772, %v382_v7   ;;  %v388_v14 = vld [vmem:[%s3112_s30 + $0x38] sm:$0xff]  ;;  %v389_v15 = vld [vmem:[%s3112_s30 + $0x40] sm:$0xff]  ;;  %v390_v16 = vld [vmem:[%s3112_s30 + $0x48] sm:$0xff]  ;;  %v499_v58 = vshrl.u32 %v498_v46, 7 }
  0x4b   : > { %v391_v17 = vld [vmem:[%s3112_s30 + $0x50] sm:$0xff]  ;;  %v392_v18 = vld [vmem:[%s3112_s30 + $0x58] sm:$0xff]  ;;  %v393_v19 = vld [vmem:[%s3112_s30 + $0x60] sm:$0xff] }
  0x4c   : > { %v394_v20 = vld [vmem:[%s3112_s30 + $0x68] sm:$0xff]  ;;  %v395_v21 = vld [vmem:[%s3112_s30 + $0x70] sm:$0xff]  ;;  %v396_v22 = vld [vmem:[%s3112_s30 + $0x78] sm:$0xff] }
  0x4d   : > { %v381_v23 = vld [vmem:[%s3112_s30] sm:$0xff]  ;;  %v3207_v25 = vld [vmem:[%s3127_s13 + $0x8] sm:$0xff]   ;;  %v3210_v26 = vld [vmem:[%s3127_s13 + $0x10] sm:$0xff]  }
  0x4e   : > { %435 = vperm.xlu1 %2770, %v384_v10   ;;  %1370 = vperm.xlu0 %2772, %v385_v11   ;;  %v3202_v24 = vld [vmem:[%s3127_s13] sm:$0xff]   ;;  %v415_v28 = vld [vmem:[%s3129_s27 + $0x8] sm:$0xff]  ;;  %v416_v31 = vld [vmem:[%s3129_s27 + $0x10] sm:$0xff] }
  0x4f   : > { %2642 = vmatprep.subr.bf16.mxu0 %v3202_v24  ;;  %v414_v27 = vld [vmem:[%s3129_s27] sm:$0xff]  ;;  %v3223_v32 = vld [vmem:[%s3127_s13 + $0x18] sm:$0xff]   ;;  %vm567_vm3 = vnez %v415_v28  ;;  %vm568_vm4 = vnez %v416_v31  ;;  %v3249_v43 = vld [vmem:[%s3127_s13 + $0x28] sm:$0xff]  }
  0x50   : > { %2643 = vmatpush3.bf16.msra.mxu0 %v3202_v24  ;;  %vm566_vm2 = vnez %v414_v27  ;;  %v3233_v36 = vld [vmem:[%s3127_s13 + $0x20] sm:$0xff]   ;;  %v3236_v37 = vsel %vm567_vm3, 16843009, %v4512_v9  ;;  %v3240_v38 = vsel %vm568_vm4, 16843009, %v4512_v9  ;;  %v3261_v54 = vld [vmem:[%s3127_s13 + $0x30] sm:$0xff]  }
  0x51   : > { %2644 = vmatprep.subr.bf16.mxu0 %v3207_v25  ;;  %v570_v35 = vsel %vm566_vm2, 16843009, %v4512_v9  ;;  %v578_v42 = vunpack.c.0.s8 %v3236_v37  ;;  %v580_v44 = vunpack.c.2.s8 %v3236_v37  ;;  %v582_v45 = vunpack.c.0.s8 %v3240_v38  ;;  %v417_v57 = vld [vmem:[%s3129_s27 + $0x18] sm:$0xff] }
  0x52   : > { %445 = vperm.xlu1 %2770, %v386_v12   ;;  %1378 = vperm.xlu0 %2772, %v387_v13   ;;  %v575_v39 = vunpack.c.1.s8 %v570_v35  ;;  %v574_v47 = vunpack.c.0.s8 %v570_v35  ;;  %v584_v49 = vunpack.c.2.s8 %v3240_v38  ;;  %v576_v52 = vunpack.c.2.s8 %v570_v35 }
  0x53   : > { %v598_v53 = vpack.c.b16 %v578_v42, %v578_v42  ;;  %v602_v55 = vpack.c.b16 %v580_v44, %v580_v44  ;;  %v606_v56 = vpack.c.b16 %v582_v45, %v582_v45  ;;  %v577_v61 = vunpack.c.3.s8 %v570_v35 }
  0x54   : > { %2645 = vmatpush3.bf16.msra.mxu0 %v3207_v25  ;;  %v592_v48 = vpack.c.b16 %v575_v39, %v575_v39  ;;  %v590_v59 = vpack.c.b16 %v574_v47, %v574_v47  ;;  %v610_v62 = vpack.c.b16 %v584_v49, %v584_v49  ;;  %v594_v1 = vpack.c.b16 %v576_v52, %v576_v52 }
  0x55   : > { %2646 = vmatprep.subr.bf16.mxu0 %v3210_v26  ;;  %v599_v2 = vpack.c.b8 %v598_v53, %v598_v53  ;;  %v579_v3 = vunpack.c.1.s8 %v3236_v37  ;;  %vm569_vm5 = vnez %v417_v57  ;;  %v603_v4 = vpack.c.b8 %v602_v55, %v602_v55 }
  0x56   : > { %455 = vperm.xlu1 %2770, %v388_v14   ;;  %1386 = vperm.xlu0 %2772, %v389_v15   ;;  %v593_v60 = vpack.c.b8 %v592_v48, %v592_v48  ;;  %v607_v5 = vpack.c.b8 %v606_v56, %v606_v56  ;;  %v583_v46 = vunpack.c.1.s8 %v3240_v38  ;;  %v585_v47 = vunpack.c.3.s8 %v3240_v38 }
  0x57   : > { %vm626_vm7 = vnez %v599_v2  ;;  %vm628_vm8 = vnez %v603_v4 }
  0x58   : > { %2647 = vmatpush3.bf16.msra.mxu0 %v3210_v26  ;;  %vm623_vm6 = vnez %v593_v60  ;;  %vm630_vm9 = vnez %v607_v5  ;;  %v642_v28 = vsel %vm626_vm7, 16843009, %v4512_v9 }
  0x59   : > { %2648 = vmatprep.subr.bf16.mxu0 %v3223_v32  ;;  %v3294_v39 = vsel %vm630_vm9, 16843009, %v4512_v9  ;;  %v658_v49 = vunpack.c.0.s8 %v642_v28 }
  0x5a   : > { %465 = vperm.xlu1 %2770, %v390_v16   ;;  %1394 = vperm.xlu0 %2772, %v391_v17   ;;  %v662_v38 = vunpack.c.0.s8 %v3294_v39 }
  0x5c   : > { %2649 = vmatpush3.bf16.msra.mxu0 %v3223_v32 }
  0x5d   : > { %2650 = vmatprep.subr.bf16.mxu0 %v3233_v36 }
  0x5e   : > { %475 = vperm.xlu1 %2770, %v392_v18   ;;  %1402 = vperm.xlu0 %2772, %v393_v19  }
  0x60   : > { %2651 = vmatpush3.bf16.msra.mxu0 %v3233_v36 }
  0x61   : > { %2652 = vmatprep.subr.bf16.mxu0 %v3249_v43 }
  0x62   : > { %485 = vperm.xlu1 %2770, %v394_v20   ;;  %1410 = vperm.xlu0 %2772, %v395_v21  }
  0x64   : > { %2653 = vmatpush3.bf16.msra.mxu0 %v3249_v43 }
  0x65   : > { %2654 = vmatprep.subr.bf16.mxu0 %v3261_v54 }
  0x66   : > { %495 = vperm.xlu1 %2770, %v396_v22   ;;  %2773 = vset.pattern.permute.xlu0 %v4512_v9 }
  0x67   : > { %420 = vperm.xlu0 %2773, %v381_v23  }
  0x68   : > { %2655 = vmatpush3.bf16.msra.mxu0 %v3261_v54 }
  0x6a   : > { %2771 = vset.pattern.permute.xlu1 %v4514_v8 }
  0x6b   : > { %425 = vperm.xlu0 %2773, %v382_v7   ;;  %1354 = vperm.xlu1 %2771, %v381_v23   ;;  %v1419_v7 = vsub.s32 1, %v499_v58  ;;  %v639_v23 = vsel %vm623_vm6, 16843009, %v4512_v9 }
  0x6c   : > { %v655_v48 = vunpack.c.0.s8 %v639_v23 }
  0x6e   : > { %vm3316_vm15 = vcmp.ne.s32.totalorder %v655_v48, 0 }
  0x6f   : > { %440 = vperm.xlu0 %2773, %v385_v11   ;;  %1362 = vperm.xlu1 %2771, %v383_v6   ;;  %v500_v6 = vsub.s32 0, %v499_v58  ;;  %v397_v11 = vld [vmem:[%s3117_s8] sm:$0x3] }
  0x73   : > { %450 = vperm.xlu0 %2773, %v387_v13   ;;  %1366 = vperm.xlu1 %2771, %v384_v10   ;;  %v591_v10 = vpack.c.b8 %v590_v59, %v590_v59  ;;  %v611_v13 = vpack.c.b8 %v610_v62, %v610_v62 }
  0x75   : > { %vm622_vm10 = vnez %v591_v10  ;;  %vm632_vm11 = vnez %v611_v13 }
  0x76   : > { %v638_v44 = vsel %vm622_vm10, 16843009, %v4512_v9  ;;  %v3302_v52 = vsel %vm632_vm11, 16843009, %v4512_v9 }
  0x77   : > { %460 = vperm.xlu0 %2773, %v389_v15   ;;  %1374 = vperm.xlu1 %2771, %v386_v12   ;;  %v596_v12 = vpack.c.b16 %v577_v61, %v577_v61  ;;  %v654_v58 = vunpack.c.0.s8 %v638_v44  ;;  %v664_v2 = vunpack.c.0.s8 %v3302_v52 }
  0x79   : > { %v597_v27 = vpack.c.b8 %v596_v12, %v596_v12  ;;  %vm3329_vm1 = vcmp.ne.s32.totalorder %v654_v58, 0 }
  0x7b   : > { %470 = vperm.xlu0 %2773, %v391_v17   ;;  %1382 = vperm.xlu1 %2771, %v388_v14   ;;  %v3274_v14 = vsel %vm569_vm5, 16843009, %v4512_v9  ;;  %v595_v17 = vpack.c.b8 %v594_v1, %v594_v1  ;;  %vm625_vm13 = vnez %v597_v27  ;;  %v608_v1 = vpack.c.b16 %v583_v46, %v583_v46 }
  0x7c   : > { %v588_v60 = vunpack.c.2.s8 %v3274_v14  ;;  %vm3342_vm5 = vcmp.ne.s32.totalorder %v658_v49, 0 }
  0x7d   : > { %vm624_vm12 = vnez %v595_v17  ;;  %v587_v17 = vunpack.c.1.s8 %v3274_v14  ;;  %v609_v27 = vpack.c.b8 %v608_v1, %v608_v1 }
  0x7e   : > { %v640_v56 = vsel %vm624_vm12, 16843009, %v4512_v9 }
  0x7f   : > { %480 = vperm.xlu0 %2773, %v393_v19   ;;  %1390 = vperm.xlu1 %2771, %v390_v16   ;;  %v581_v19 = vunpack.c.3.s8 %v3236_v37  ;;  %v3291_v37 = vsel %vm628_vm8, 16843009, %v4512_v9  ;;  %v656_v4 = vunpack.c.0.s8 %v640_v56  ;;  %vm3362_vm9 = vnez %v609_v27 }
  0x80   : > { %v660_v57 = vunpack.c.0.s8 %v3291_v37  ;;  %v616_v1 = vpack.c.b16 %v587_v17, %v587_v17  ;;  %v647_v27 = vsel %vm3362_vm9, 16843009, %v4512_v9 }
  0x81   : > { %v604_v45 = vpack.c.b16 %v581_v19, %v581_v19  ;;  %vm3338_vm4 = vcmp.ne.s32.totalorder %v656_v4, 0 }
  0x82   : > { %vm3375_vm11 = vcmp.ne.s32.totalorder %v660_v57, 0 }
  0x83   : > { %490 = vperm.xlu0 %2773, %v395_v21   ;;  %1398 = vperm.xlu1 %2771, %v392_v18   ;;  %v600_v18 = vpack.c.b16 %v579_v3, %v579_v3  ;;  %v3283_v21 = vrot.slane %v397_v11, %v1419_v7  ;;  %v605_v62 = vpack.c.b8 %v604_v45, %v604_v45 }
  0x85   : > { %v601_v35 = vpack.c.b8 %v600_v18, %v600_v18  ;;  %vm3333_vm3 = vnez %v605_v62  ;;  %v4583_v62 = vmov 0 }
  0x86   : > { %v645_v49 = vsel %vm3333_vm3, 16843009, %v4512_v9 }
  0x87   : > { %1406 = vperm.xlu1 %2771, %v394_v20   ;;  %v3281_v20 = vrot.slane %v397_v11, %v500_v6  ;;  %vm3308_vm14 = vnez %v601_v35  ;;  %v641_v6 = vsel %vm625_vm13, 16843009, %v4512_v9 }
  0x88   : > { %v643_v13 = vsel %vm3308_vm14, 16843009, %v4512_v9  ;;  %v657_v23 = vunpack.c.0.s8 %v641_v6 }
  0x89   : > { %v659_v46 = vunpack.c.0.s8 %v643_v13  ;;  %v589_v13 = vunpack.c.3.s8 %v3274_v14 }
  0x8a   : > { %vm3358_vm8 = vcmp.ne.s32.totalorder %v657_v23, 0 }
  0x8b   : > { %1414 = vperm.xlu1 %2771, %v396_v22   ;;  %v586_v22 = vunpack.c.0.s8 %v3274_v14 }
  0x8d   : > { %v614_v53 = vpack.c.b16 %v586_v22, %v586_v22 }
  0x8f   : > { %2774 = vset.pattern.permute.xlu1 %v4512_v9  ;;  %v615_v7 = vpack.c.b8 %v614_v53, %v614_v53 }
  0x91   : > { %vm3379_vm12 = vnez %v615_v7 }
  0xc9   : > { %v3217_v29 = vpop.permute.xlu1 %430  ;;  %v3219_v30 = vpop.permute.xlu0 %1358 }
  0xca   : > { %v504_v55 = vadd.f32 %v3281_v20, %v3217_v29  ;;  %v612_v29 = vpack.c.b16 %v585_v47, %v585_v47 }
  0xcc   : > { %v536_v12 = vmul.f32 0.2, %v504_v55  ;;  %vm520_vm2 = vcmp.ge.f32.partialorder %v504_v55, 0.0  ;;  %v613_v28 = vpack.c.b8 %v612_v29, %v612_v29 }
  0xcd   : > { %v3227_v33 = vpop.permute.xlu1 %435  ;;  %v3229_v34 = vpop.permute.xlu0 %1370 }
  0xce   : > { %v505_v10 = vadd.f32 %v3281_v20, %v3227_v33  ;;  %v552_v53 = vsel %vm520_vm2, %v504_v55, %v536_v12  ;;  %vm3366_vm10 = vnez %v613_v28  ;;  %v617_v28 = vpack.c.b8 %v616_v1, %v616_v1 }
  0xcf   : > { %vm3410_vm2 = vcmp.ne.s32.totalorder %v662_v38, 0  ;;  %v649_v38 = vsel %vm3366_vm10, 16843009, %v4512_v9  ;;  %v663_v1 = vunpack.c.0.s8 %v647_v27 }
  0xd0   : > { %v537_v56 = vmul.f32 0.2, %v505_v10  ;;  %vm521_vm7 = vcmp.ge.f32.partialorder %v505_v10, 0.0  ;;  %vm3431_vm9 = vnez %v617_v28  ;;  %v665_v28 = vunpack.c.0.s8 %v649_v38 }
  0xd1   : > { %v3243_v40 = vpop.permute.xlu1 %445  ;;  %v3245_v41 = vpop.permute.xlu0 %1378 }
  0xd2   : > { %v507_v47 = vadd.f32 %v3281_v20, %v3243_v40 }
  0xd4   : > { %v539_v23 = vmul.f32 0.2, %v507_v47  ;;  %vm523_vm14 = vcmp.ge.f32.partialorder %v507_v47, 0.0 }
  0xd5   : > { %v3256_v50 = vpop.permute.xlu1 %455  ;;  %v3258_v51 = vpop.permute.xlu0 %1386 }
  0xd6   : > { %v509_v17 = vadd.f32 %v3281_v20, %v3256_v50  ;;  %v661_v50 = vunpack.c.0.s8 %v645_v49  ;;  %v555_v49 = vsel %vm523_vm14, %v507_v47, %v539_v23  ;;  %vm3450_vm14 = vcmp.ne.s32.totalorder %v663_v1, 0 }
  0xd7   : > { %v1429_v19 = vadd.f32 %v3283_v21, %v3258_v51 }
  0xd9   : > { %v3266_v63 = vpop.permute.xlu1 %465  ;;  %v3268_v0 = vpop.permute.xlu0 %1394 }
  0xda   : > { %v1431_v44 = vadd.f32 %v3283_v21, %v3268_v0 }
  0xdd   : > { %v3276_v15 = vpop.permute.xlu1 %475  ;;  %v3278_v16 = vpop.permute.xlu0 %1402 }
  0xde   : > { %v513_v23 = vadd.f32 %v3281_v20, %v3276_v15  ;;  %v4587_v15 = vmov 0  ;;  %v1433_v0 = vadd.f32 %v3283_v21, %v3278_v16 }
  0xdf   : > { %v4588_v15 = vsel %vm3450_vm14, 4294967295, %v4587_v15 }
  0xe0   : > { %v545_v47 = vmul.f32 0.2, %v513_v23 }
  0xe1   : > { %v3288_v31 = vpop.permute.xlu0 %1410  ;;  %v3296_v42 = vpop.permute.xlu1 %485 }
  0xe2   : > { %v515_v12 = vadd.f32 %v3281_v20, %v3296_v42 }
  0xe5   : > { %v3323_v11 = vpop.permute.xlu1 %495 }
  0xe6   : > { %v421_v61 = vpop.permute.xlu0 %420 }
  0xe7   : > { %v502_v3 = vadd.f32 %v3281_v20, %v421_v61 }
  0xe9   : > { %vm518_vm0 = vcmp.ge.f32.partialorder %v502_v3, 0.0  ;;  %v534_v18 = vmul.f32 0.2, %v502_v3 }
  0xea   : > { %v426_v22 = vpop.permute.xlu0 %425  ;;  %v3356_v59 = vpop.permute.xlu1 %1354 }
  0xeb   : > { %v503_v35 = vadd.f32 %v3281_v20, %v426_v22  ;;  %v550_v37 = vsel %vm518_vm0, %v502_v3, %v534_v18  ;;  %v3373_v3 = vsel %vm3338_vm4, %v552_v53, -1e+30  ;;  %v553_v22 = vsel %vm521_vm7, %v505_v10, %v537_v56 }
  0xec   : > { %v3350_v48 = vsel %vm3329_vm1, %v550_v37, -1e+30  ;;  %vm3393_vm0 = vcmp.ne.s32.totalorder %v659_v46, 0  ;;  %v618_v10 = vpack.c.b16 %v588_v60, %v588_v60  ;;  %v3406_v37 = vsel %vm3358_vm8, %v553_v22, -1e+30 }
  0xed   : > { %718 = vmax.xlane.f32.xlu0 %v3350_v48  ;;  %vm519_vm6 = vcmp.ge.f32.partialorder %v503_v35, 0.0  ;;  %v535_v58 = vmul.f32 0.2, %v503_v35  ;;  %v620_v56 = vpack.c.b16 %v589_v13, %v589_v13  ;;  %vm3427_vm7 = vcmp.ne.s32.totalorder %v661_v50, 0 }
  0xee   : > { %v441_v61 = vpop.permute.xlu0 %440  ;;  %v3416_v14 = vpop.permute.xlu1 %1362  ;;  %v4584_v62 = vsel %vm3427_vm7, 4294967295, %v4583_v62  ;;  %v3438_v13 = vsel %vm3393_vm0, %v555_v49, -1e+30 }
  0xef   : > { %v506_v29 = vadd.f32 %v3281_v20, %v441_v61  ;;  %v551_v4 = vsel %vm519_vm6, %v503_v35, %v535_v58  ;;  %v511_v58 = vadd.f32 %v3281_v20, %v3266_v63  ;;  %v541_v61 = vmul.f32 0.2, %v509_v17 }
  0xf0   : > { %v3388_v18 = vsel %vm3316_vm15, %v551_v4, -1e+30  ;;  %vm525_vm6 = vcmp.ge.f32.partialorder %v509_v17, 0.0  ;;  %v621_v55 = vpack.c.b8 %v620_v56, %v620_v56 }
  0xf1   : > { %722 = vmax.xlane.f32.xlu0 %v3373_v3  ;;  %720 = vmax.xlane.f32.xlu1 %v3388_v18  ;;  %vm522_vm13 = vcmp.ge.f32.partialorder %v506_v29, 0.0  ;;  %v538_v57 = vmul.f32 0.2, %v506_v29  ;;  %v543_v50 = vmul.f32 0.2, %v511_v58 }
  0xf2   : > { %v451_v33 = vpop.permute.xlu0 %450 }
  0xf3   : > { %v508_v35 = vadd.f32 %v3281_v20, %v451_v33  ;;  %v554_v46 = vsel %vm522_vm13, %v506_v29, %v538_v57  ;;  %v619_v29 = vpack.c.b8 %v618_v10, %v618_v10  ;;  %v557_v33 = vsel %vm525_vm6, %v509_v17, %v541_v61  ;;  %v3448_v10 = vpop.permute.xlu1 %1366 }
  0xf4   : > { %v3420_v60 = vsel %vm3342_vm5, %v554_v46, -1e+30  ;;  %vm527_vm13 = vcmp.ge.f32.partialorder %v511_v58, 0.0  ;;  %v650_v17 = vsel %vm3379_vm12, 16843009, %v4512_v9  ;;  %vm3469_vm6 = vnez %v621_v55 }
  0xf5   : > { %724 = vmax.xlane.f32.xlu0 %v3406_v37  ;;  %726 = vmax.xlane.f32.xlu1 %v3420_v60  ;;  %vm524_vm3 = vcmp.ge.f32.partialorder %v508_v35, 0.0  ;;  %v540_v39 = vmul.f32 0.2, %v508_v35  ;;  %v651_v46 = vsel %vm3431_vm9, 16843009, %v4512_v9  ;;  %v559_v1 = vsel %vm527_vm13, %v511_v58, %v543_v50 }
  0xf6   : > { %v461_v63 = vpop.permute.xlu0 %460  ;;  %v3467_v61 = vsel %vm3427_vm7, %v557_v33, -1e+30  ;;  %vm3486_vm9 = vcmp.ne.s32.totalorder %v664_v2, 0  ;;  %vm3490_vm7 = vcmp.ne.s32.totalorder %v665_v28, 0  ;;  %v4595_v55 = vmov 0 }
  0xf7   : > { %v510_v4 = vadd.f32 %v3281_v20, %v461_v63  ;;  %v556_v22 = vsel %vm524_vm3, %v508_v35, %v540_v39  ;;  %vm3460_vm3 = vnez %v619_v29  ;;  %v3480_v29 = vld [vmem:[%s3127_s13 + $0x38] sm:$0xff]   ;;  %v4596_v55 = vsel %vm3490_vm7, 4294967295, %v4595_v55 }
  0xf8   : > { %v3444_v57 = vsel %vm3375_vm11, %v556_v22, -1e+30  ;;  %v666_v58 = vunpack.c.0.s8 %v650_v17  ;;  %v667_v33 = vunpack.c.0.s8 %v651_v46  ;;  %v652_v50 = vsel %vm3460_vm3, 16843009, %v4512_v9  ;;  %2656 = vmatprep.subr.bf16.mxu0 %v3480_v29  ;;  %v1375_v17 = vpop.permute.xlu1 %1374 }
  0xf9   : > { %728 = vmax.xlane.f32.xlu0 %v3438_v13  ;;  %730 = vmax.xlane.f32.xlu1 %v3444_v57  ;;  %vm526_vm10 = vcmp.ge.f32.partialorder %v510_v4, 0.0  ;;  %v542_v27 = vmul.f32 0.2, %v510_v4  ;;  %v3501_v2 = vsel %vm3450_vm14, %v559_v1, -1e+30  ;;  %v1421_v1 = vadd.f32 %v3283_v21, %v3356_v59 }
  0xfa   : > { %v471_v35 = vpop.permute.xlu0 %470  ;;  %v653_v28 = vsel %vm3469_vm6, 16843009, %v4512_v9  ;;  %2657 = vmatpush3.bf16.msra.mxu0 %v3480_v29  ;;  %vm531_vm3 = vcmp.ge.f32.partialorder %v515_v12, 0.0  ;;  %vm3517_vm6 = vcmp.ne.s32.totalorder %v666_v58, 0  ;;  %v1422_v59 = vadd.f32 %v3283_v21, %v3219_v30 }
  0xfb   : > { %v512_v49 = vadd.f32 %v3281_v20, %v471_v35  ;;  %v558_v39 = vsel %vm526_vm10, %v510_v4, %v542_v27  ;;  %vm529_vm10 = vcmp.ge.f32.partialorder %v513_v23, 0.0  ;;  %v517_v35 = vadd.f32 %v3281_v20, %v3323_v11 }
  0xfc   : > { %v3477_v63 = vsel %vm3410_vm2, %v558_v39, -1e+30  ;;  %v561_v56 = vsel %vm529_vm10, %v513_v23, %v545_v47  ;;  %v547_v39 = vmul.f32 0.2, %v515_v12  ;;  %v4597_v11 = vmov 0 }
  0xfd   : > { %732 = vmax.xlane.f32.xlu0 %v3467_v61  ;;  %734 = vmax.xlane.f32.xlu1 %v3477_v63  ;;  %vm528_vm12 = vcmp.ge.f32.partialorder %v512_v49, 0.0  ;;  %v544_v4 = vmul.f32 0.2, %v512_v49  ;;  %v4598_v11 = vsel %vm3517_vm6, 4294967295, %v4597_v11  ;;  %v668_v23 = vunpack.c.0.s8 %v652_v50 }
  0xfe   : > { %v481_v42 = vpop.permute.xlu0 %480  ;;  %v3530_v9 = vsel %vm3490_vm7, %v561_v56, -1e+30  ;;  %v549_v8 = vmul.f32 0.2, %v517_v35  ;;  %v1423_v50 = vadd.f32 %v3283_v21, %v3416_v14  ;;  %vm1437_vm7 = vcmp.ge.f32.partialorder %v1421_v1, 0.0 }
  0xff   : > { %v514_v52 = vadd.f32 %v3281_v20, %v481_v42  ;;  %v560_v27 = vsel %vm528_vm12, %v512_v49, %v544_v4  ;;  %vm3521_vm12 = vcmp.ne.s32.totalorder %v667_v33, 0  ;;  %v563_v33 = vsel %vm531_vm3, %v515_v12, %v547_v39  ;;  %v3671_v4 = vld [vmem:[#allocation3] sm:$0xff]  ;;  %v3691_v12 = vld [vmem:[#allocation3 + $0x18] sm:$0xff] }
 0x100   : > { %v3511_v46 = vsel %vm3486_vm9, %v560_v27, -1e+30  ;;  %v669_v27 = vunpack.c.0.s8 %v653_v28  ;;  %vm3540_vm14 = vcmp.ne.s32.totalorder %v668_v23, 0  ;;  %v1454_v14 = vmul.f32 0.2, %v1422_v59 }
 0x101   : > { %736 = vmax.xlane.f32.xlu0 %v3501_v2  ;;  %738 = vmax.xlane.f32.xlu1 %v3511_v46  ;;  %vm530_vm13 = vcmp.ge.f32.partialorder %v514_v52, 0.0  ;;  %v546_v49 = vmul.f32 0.2, %v514_v52  ;;  %v1425_v39 = vadd.f32 %v3283_v21, %v3229_v34  ;;  %v1424_v23 = vadd.f32 %v3283_v21, %v3448_v10 }
 0x102   : > { %v491_v38 = vpop.permute.xlu0 %490  ;;  %vm3544_vm3 = vcmp.ne.s32.totalorder %v669_v27, 0  ;;  %v1455_v27 = vmul.f32 0.2, %v1423_v50 }
 0x103   : > { %v516_v47 = vadd.f32 %v3281_v20, %v491_v38  ;;  %v562_v42 = vsel %vm530_vm13, %v514_v52, %v546_v49  ;;  %v1453_v20 = vmul.f32 0.2, %v1421_v1  ;;  %v1383_v52 = vpop.permute.xlu1 %1382  ;;  %vm533_vm13 = vcmp.ge.f32.partialorder %v517_v35, 0.0 }
 0x104   : > { %v3534_v58 = vsel %vm3517_vm6, %v562_v42, -1e+30  ;;  %v3552_v49 = vsel %vm3521_vm12, %v563_v33, -1e+30  ;;  %vm1439_vm6 = vcmp.ge.f32.partialorder %v1423_v50, 0.0  ;;  %v1427_v33 = vadd.f32 %v3283_v21, %v3245_v41 }
 0x105   : > { %4601 = vst [vmem:[#allocation6_spill] sm:$0xff] %v3534_v58  ;;  %740 = vmax.xlane.f32.xlu0 %v3530_v9  ;;  %742 = vmax.xlane.f32.xlu1 %v3534_v58  ;;  %vm532_vm10 = vcmp.ge.f32.partialorder %v516_v47, 0.0  ;;  %v548_v30 = vmul.f32 0.2, %v516_v47  ;;  %4606 = vst [vmem:[#allocation7_spill] sm:$0xff] %v3552_v49  ;;  %v1469_v42 = vsel %vm1437_vm7, %v1421_v1, %v1453_v20  ;;  %vm1441_vm7 = vcmp.ge.f32.partialorder %v1425_v39, 0.0 }
 0x106   : > { %v3570_v10 = vsel %vm3329_vm1, %v1469_v42, -1e+30  ;;  %v1457_v58 = vmul.f32 0.2, %v1425_v39  ;;  %v1428_v20 = vadd.f32 %v3283_v21, %v1383_v52  ;;  %vm1443_vm1 = vcmp.ge.f32.partialorder %v1427_v33, 0.0 }
 0x107   : > { %v564_v28 = vsel %vm532_vm10, %v516_v47, %v548_v30  ;;  %vm1438_vm10 = vcmp.ge.f32.partialorder %v1422_v59, 0.0  ;;  %v565_v47 = vsel %vm533_vm13, %v517_v35, %v549_v8  ;;  %v1391_v30 = vpop.permute.xlu1 %1390  ;;  %v1471_v8 = vsel %vm1439_vm6, %v1423_v50, %v1455_v27 }
 0x108   : > { %v3556_v38 = vsel %vm3540_vm14, %v564_v28, -1e+30  ;;  %v1470_v34 = vsel %vm1438_vm10, %v1422_v59, %v1454_v14  ;;  %v3566_v28 = vsel %vm3544_vm3, %v565_v47, -1e+30  ;;  %v1456_v35 = vmul.f32 0.2, %v1424_v23 }
 0x109   : > { %4607 = vst [vmem:[#allocation8_spill] sm:$0xff] %v3556_v38  ;;  %744 = vmax.xlane.f32.xlu0 %v3552_v49  ;;  %746 = vmax.xlane.f32.xlu1 %v3556_v38  ;;  %4608 = vst [vmem:[#allocation9_spill] sm:$0xff] %v3566_v28  ;;  %v1426_v38 = vadd.f32 %v3283_v21, %v1375_v17  ;;  %vm1440_vm13 = vcmp.ge.f32.partialorder %v1424_v23, 0.0  ;;  %v3577_v41 = vsel %vm3316_vm15, %v1470_v34, -1e+30  ;;  %vm4610_vm6 = vnez %v4584_v62 }
 0x10a   : > { %v3583_v1 = vsel %vm3338_vm4, %v1471_v8, -1e+30  ;;  %v1473_v17 = vsel %vm1441_vm7, %v1425_v39, %v1457_v58  ;;  %v1459_v59 = vmul.f32 0.2, %v1427_v33  ;;  %v1472_v50 = vsel %vm1440_vm13, %v1424_v23, %v1456_v35 }
 0x10b   : > { %v1458_v5 = vmul.f32 0.2, %v1426_v38  ;;  %v1399_v14 = vpop.permute.xlu1 %1398  ;;  %vm1442_vm15 = vcmp.ge.f32.partialorder %v1426_v38, 0.0  ;;  %v3590_v51 = vsel %vm3342_vm5, %v1473_v17, -1e+30  ;;  %v1430_v47 = vadd.f32 %v3283_v21, %v1391_v30 }
 0x10c   : > { %v3596_v58 = vsel %vm3358_vm8, %v1472_v50, -1e+30  ;;  %v1475_v52 = vsel %vm1443_vm1, %v1427_v33, %v1459_v59  ;;  %v1461_v39 = vmul.f32 0.2, %v1429_v19  ;;  %vm1445_vm4 = vcmp.ge.f32.partialorder %v1429_v19, 0.0 }
 0x10d   : > { %748 = vmax.xlane.f32.xlu0 %v3566_v28  ;;  %1517 = vmax.xlane.f32.xlu1 %v3570_v10  ;;  %v1474_v23 = vsel %vm1442_vm15, %v1426_v38, %v1458_v5  ;;  %v1460_v45 = vmul.f32 0.2, %v1428_v20  ;;  %vm1444_vm5 = vcmp.ge.f32.partialorder %v1428_v20, 0.0  ;;  %v3603_v42 = vsel %vm3375_vm11, %v1475_v52, -1e+30  ;;  %v3799_v28 = vld [vmem:[#allocation3 + $0x78] sm:$0xff] }
 0x10e   : > { %v3609_v27 = vsel %vm3393_vm0, %v1474_v23, -1e+30  ;;  %v1477_v34 = vsel %vm1445_vm4, %v1429_v19, %v1461_v39  ;;  %v1463_v33 = vmul.f32 0.2, %v1431_v44  ;;  %v1432_v30 = vadd.f32 %v3283_v21, %v1399_v14 }
 0x10f   : > { %v1407_v40 = vpop.permute.xlu1 %1406  ;;  %v1476_v38 = vsel %vm1444_vm5, %v1428_v20, %v1460_v45  ;;  %vm1447_vm8 = vcmp.ge.f32.partialorder %v1431_v44, 0.0  ;;  %v1462_v6 = vmul.f32 0.2, %v1430_v47  ;;  %vm1446_vm11 = vcmp.ge.f32.partialorder %v1430_v47, 0.0 }
 0x110   : > { %v3616_v16 = vsel %vm3410_vm2, %v1477_v34, -1e+30  ;;  %v3620_v7 = vsel %vm4610_vm6, %v1476_v38, -1e+30  ;;  %v1479_v8 = vsel %vm1447_vm8, %v1431_v44, %v1463_v33  ;;  %vm1449_vm0 = vcmp.ge.f32.partialorder %v1433_v0, 0.0 }
 0x111   : > { %1519 = vmax.xlane.f32.xlu0 %v3577_v41  ;;  %1521 = vmax.xlane.f32.xlu1 %v3583_v1  ;;  %4609 = vst [vmem:[#allocation10_spill] sm:$0xff] %v3616_v16  ;;  %v1465_v35 = vmul.f32 0.2, %v1433_v0  ;;  %v1435_v19 = vadd.f32 %v3283_v21, %v3288_v31  ;;  %v1434_v17 = vadd.f32 %v3283_v21, %v1407_v40  ;;  %v1464_v53 = vmul.f32 0.2, %v1432_v30 }
 0x112   : > { %v1478_v59 = vsel %vm1446_vm11, %v1430_v47, %v1462_v6  ;;  %vm1448_vm2 = vcmp.ge.f32.partialorder %v1432_v30, 0.0  ;;  %v3629_v62 = vsel %vm3486_vm9, %v1479_v8, -1e+30  ;;  %vm4612_vm10 = vnez %v4588_v15  ;;  %v3709_v6 = vld [vmem:[#allocation3 + $0x28] sm:$0xff]  ;;  %v3711_v8 = vld [vmem:[#allocation3 + $0x30] sm:$0xff] }
 0x113   : > { %v1415_v20 = vpop.permute.xlu1 %1414  ;;  %4611 = vst [vmem:[#allocation11_spill] sm:$0xff] %v3629_v62  ;;  %v3633_v50 = vsel %vm4612_vm10, %v1478_v59, -1e+30  ;;  %v1481_v5 = vsel %vm1449_vm0, %v1433_v0, %v1465_v35  ;;  %v1480_v14 = vsel %vm1448_vm2, %v1432_v30, %v1464_v53  ;;  %v1467_v44 = vmul.f32 0.2, %v1435_v19  ;;  %v3693_v0 = vld [vmem:[#allocation3 + $0x20] sm:$0xff] }
 0x114   : > { %4613 = vst [vmem:[#allocation12_spill] sm:$0xff] %v3633_v50  ;;  %v1436_v31 = vadd.f32 %v3283_v21, %v1415_v20  ;;  %v1466_v52 = vmul.f32 0.2, %v1434_v17  ;;  %vm1451_vm7 = vcmp.ge.f32.partialorder %v1435_v19, 0.0  ;;  %vm1450_vm13 = vcmp.ge.f32.partialorder %v1434_v17, 0.0  ;;  %v3727_v20 = vld [vmem:[#allocation3 + $0x38] sm:$0xff] }
 0x115   : > { %1525 = vmax.xlane.f32.xlu1 %v3590_v51  ;;  %1523 = vmax.xlane.f32.xlu0 %v3596_v58  ;;  %vm4614_vm1 = vnez %v4598_v11  ;;  %vm4616_vm9 = vnez %v4596_v55  ;;  %v1483_v21 = vsel %vm1451_vm7, %v1435_v19, %v1467_v44  ;;  %vm2159_vm4 = vcmask 261248  }
 0x116   : > { %v3640_v22 = vsel %vm4614_vm1, %v1481_v5, -1e+30  ;;  %v3644_v15 = vsel %vm4616_vm9, %v1480_v14, -1e+30  ;;  %v1482_v39 = vsel %vm1450_vm13, %v1434_v17, %v1466_v52  ;;  %v1468_v47 = vmul.f32 0.2, %v1436_v31 }
 0x117   : > { %4615 = vst [vmem:[#allocation13_spill] sm:$0xff] %v3640_v22  ;;  %4617 = vst [vmem:[#allocation14_spill] sm:$0xff] %v3644_v15  ;;  %vm1452_vm15 = vcmp.ge.f32.partialorder %v1436_v31, 0.0  ;;  %v3650_v23 = vsel %vm3540_vm14, %v1483_v21, -1e+30  ;;  %vm1022_vm14 = vcmask 7168  }
 0x118   : > { %4618 = vst [vmem:[#allocation15_spill] sm:$0xff] %v3650_v23  ;;  %v3654_v11 = vsel %vm3521_vm12, %v1482_v39, -1e+30  ;;  %v1484_v55 = vsel %vm1452_vm15, %v1436_v31, %v1468_v47  ;;  %v3729_v5 = vld [vmem:[#allocation3 + $0x40] sm:$0xff]  ;;  %v3745_v39 = vld [vmem:[#allocation3 + $0x48] sm:$0xff]  ;;  %v3747_v47 = vld [vmem:[#allocation3 + $0x50] sm:$0xff] }
 0x119   : > { %1529 = vmax.xlane.f32.xlu1 %v3603_v42  ;;  %1527 = vmax.xlane.f32.xlu0 %v3609_v27  ;;  %4619 = vst [vmem:[#allocation16_spill] sm:$0xff] %v3654_v11  ;;  %v3660_v45 = vsel %vm3544_vm3, %v1484_v55, -1e+30  ;;  %v3781_v55 = vld [vmem:[#allocation3 + $0x68] sm:$0xff]  ;;  %vm1821_vm12 = vcmask 15368   ;;  %vm1320_vm3 = vcmask 130048  }
 0x11a   : > { %4620 = vst [vmem:[#allocation17_spill] sm:$0xff] %v3660_v45 }
 0x11d   : > { %1533 = vmax.xlane.f32.xlu1 %v3616_v16  ;;  %1531 = vmax.xlane.f32.xlu0 %v3620_v7 }
 0x121   : > { %1537 = vmax.xlane.f32.xlu1 %v3629_v62  ;;  %1535 = vmax.xlane.f32.xlu0 %v3633_v50 }
 0x125   : > { %1541 = vmax.xlane.f32.xlu1 %v3640_v22  ;;  %1539 = vmax.xlane.f32.xlu0 %v3644_v15 }
 0x129   : > { %1545 = vmax.xlane.f32.xlu1 %v3650_v23  ;;  %1543 = vmax.xlane.f32.xlu0 %v3654_v11 }
 0x12d   : > { %1547 = vmax.xlane.f32.xlu0 %v3660_v45 }
 0x13a   : > { %1960 = vrot.lane.b32.xlu1 %v3207_v25, %s3013_s14 }
 0x13e   : > { %1962 = vrot.lane.b32.xlu1 %v3210_v26, %s3013_s14  ;;  %v3676_v26 = vld [vmem:[#allocation3 + $0x10] sm:$0xff] }
 0x142   : > { %1966 = vrot.lane.b32.xlu1 %v3233_v36, %s3013_s14  ;;  %v3678_v36 = vld [vmem:[#allocation3 + $0x8] sm:$0xff] }
 0x143   : > { %1958 = vrot.lane.b32.xlu0 %v3202_v24, %s3013_s14 }
 0x146   : > { %1970 = vrot.lane.b32.xlu1 %v3261_v54, %s3013_s14 }
 0x147   : > { %1964 = vrot.lane.b32.xlu0 %v3223_v32, %s3013_s14 }
 0x14b   : > { %1968 = vrot.lane.b32.xlu0 %v3249_v43, %s3013_s14 }
 0x14f   : > { %1972 = vrot.lane.b32.xlu0 %v3480_v29, %s3013_s14 }
 0x17a   : > { %v719_v56 = vpop.xlane.xlu0 %718 }
 0x17b   : > { %v3674_v25 = vmax.f32 %v3671_v4, %v719_v56 }
 0x17d   : > { %1337 = vst.msk [vmem:[#allocation3] sm:$0xff] %vm1022_vm14, %v3674_v25  ;;  %816 = vperm.xlu1 %2774, %v3674_v25  }
 0x17e   : > { %v723_v32 = vpop.xlane.xlu0 %722  ;;  %v721_v43 = vpop.xlane.xlu1 %720 }
 0x17f   : > { %v3686_v54 = vmax.f32 %v3676_v26, %v723_v32  ;;  %v3689_v29 = vmax.f32 %v3678_v36, %v721_v43 }
 0x181   : > { %1339 = vst.msk [vmem:[#allocation3 + $0x10] sm:$0xff] %vm1022_vm14, %v3686_v54  ;;  %1338 = vst.msk [vmem:[#allocation3 + $0x8] sm:$0xff] %vm1022_vm14, %v3689_v29  ;;  %826 = vperm.xlu1 %2774, %v3686_v54   ;;  %821 = vperm.xlu0 %2773, %v3689_v29  }
 0x182   : > { %v725_v34 = vpop.xlane.xlu0 %724  ;;  %v727_v33 = vpop.xlane.xlu1 %726 }
 0x183   : > { %v3704_v30 = vmax.f32 %v3691_v12, %v725_v34  ;;  %v3707_v38 = vmax.f32 %v3693_v0, %v727_v33  ;;  %v3763_v33 = vld [vmem:[#allocation3 + $0x58] sm:$0xff] }
 0x184   : > { %v3808_v23 = vld [vmem:[#allocation3] sm:$0xff] }
 0x185   : > { %1340 = vst.msk [vmem:[#allocation3 + $0x18] sm:$0xff] %vm1022_vm14, %v3704_v30  ;;  %1341 = vst.msk [vmem:[#allocation3 + $0x20] sm:$0xff] %vm1022_vm14, %v3707_v38  ;;  %831 = vperm.xlu1 %2774, %v3704_v30   ;;  %836 = vperm.xlu0 %2773, %v3707_v38  }
 0x186   : > { %v729_v19 = vpop.xlane.xlu0 %728  ;;  %v731_v17 = vpop.xlane.xlu1 %730  ;;  %4622 = vst [vmem:[#allocation18_spill] sm:$0xff] %v3808_v23 }
 0x187   : > { %v3722_v59 = vmax.f32 %v3709_v6, %v729_v19  ;;  %v3725_v53 = vmax.f32 %v3711_v8, %v731_v17  ;;  %v3765_v19 = vld [vmem:[#allocation3 + $0x60] sm:$0xff]  ;;  %v3783_v17 = vld [vmem:[#allocation3 + $0x70] sm:$0xff] }
 0x188   : > { %v3827_v62 = vld [vmem:[#allocation3 + $0x10] sm:$0xff] }
 0x189   : > { %1342 = vst.msk [vmem:[#allocation3 + $0x28] sm:$0xff] %vm1022_vm14, %v3722_v59  ;;  %1343 = vst.msk [vmem:[#allocation3 + $0x30] sm:$0xff] %vm1022_vm14, %v3725_v53  ;;  %841 = vperm.xlu1 %2774, %v3722_v59   ;;  %846 = vperm.xlu0 %2773, %v3725_v53  }
 0x18a   : > { %v733_v14 = vpop.xlane.xlu0 %732  ;;  %v735_v44 = vpop.xlane.xlu1 %734  ;;  %4625 = vst [vmem:[#allocation21_spill] sm:$0xff] %v3827_v62 }
 0x18b   : > { %v3740_v52 = vmax.f32 %v3727_v20, %v733_v14  ;;  %v3743_v21 = vmax.f32 %v3729_v5, %v735_v44 }
 0x18c   : > { %v3846_v16 = vld [vmem:[#allocation3 + $0x20] sm:$0xff] }
 0x18d   : > { %1344 = vst.msk [vmem:[#allocation3 + $0x38] sm:$0xff] %vm1022_vm14, %v3740_v52  ;;  %1345 = vst.msk [vmem:[#allocation3 + $0x40] sm:$0xff] %vm1022_vm14, %v3743_v21  ;;  %851 = vperm.xlu1 %2774, %v3740_v52   ;;  %856 = vperm.xlu0 %2773, %v3743_v21  }
 0x18e   : > { %v737_v56 = vpop.xlane.xlu0 %736  ;;  %v739_v32 = vpop.xlane.xlu1 %738  ;;  %4629 = vst [vmem:[#allocation25_spill] sm:$0xff] %v3846_v16 }
 0x18f   : > { %v3758_v43 = vmax.f32 %v3745_v39, %v737_v56  ;;  %v3761_v34 = vmax.f32 %v3747_v47, %v739_v32 }
 0x191   : > { %1346 = vst.msk [vmem:[#allocation3 + $0x48] sm:$0xff] %vm1022_vm14, %v3758_v43  ;;  %1347 = vst.msk [vmem:[#allocation3 + $0x50] sm:$0xff] %vm1022_vm14, %v3761_v34  ;;  %861 = vperm.xlu0 %2773, %v3758_v43   ;;  %866 = vperm.xlu1 %2774, %v3761_v34  }
 0x192   : > { %v741_v14 = vpop.xlane.xlu0 %740  ;;  %v743_v44 = vpop.xlane.xlu1 %742 }
 0x193   : > { %v3776_v56 = vmax.f32 %v3763_v33, %v741_v14  ;;  %v3779_v32 = vmax.f32 %v3765_v19, %v743_v44  ;;  %v4621_v14 = vmov 1  }
 0x195   : > { %1348 = vst.msk [vmem:[#allocation3 + $0x58] sm:$0xff] %vm1022_vm14, %v3776_v56  ;;  %1349 = vst.msk [vmem:[#allocation3 + $0x60] sm:$0xff] %vm1022_vm14, %v3779_v32  ;;  %871 = vperm.xlu1 %2774, %v3776_v56   ;;  %2775 = vset.pattern.permute.xlu0 %v4621_v14 }
 0x196   : > { %v745_v35 = vpop.xlane.xlu0 %744  ;;  %v747_v44 = vpop.xlane.xlu1 %746 }
 0x197   : > { %v3794_v40 = vmax.f32 %v3781_v55, %v745_v35  ;;  %v3797_v24 = vmax.f32 %v3783_v17, %v747_v44 }
 0x199   : > { %1350 = vst.msk [vmem:[#allocation3 + $0x68] sm:$0xff] %vm1022_vm14, %v3794_v40  ;;  %1351 = vst.msk [vmem:[#allocation3 + $0x70] sm:$0xff] %vm1022_vm14, %v3797_v24  ;;  %2776 = vset.pattern.permute.xlu1 %v4621_v14 }
 0x19a   : > { %v749_v49 = vpop.xlane.xlu0 %748  ;;  %v1518_v35 = vpop.xlane.xlu1 %1517 }
 0x19b   : > { %v3811_v44 = vmax.f32 %v3799_v28, %v749_v49  ;;  %v3814_v45 = vmax.f32 %v3808_v23, %v1518_v35  ;;  %v3825_v49 = vld [vmem:[#allocation3 + $0x8] sm:$0xff]  ;;  %v3844_v23 = vld [vmem:[#allocation3 + $0x18] sm:$0xff] }
 0x19c   : > { %4624 = vst [vmem:[#allocation20_spill] sm:$0xff] %v3825_v49  ;;  %4628 = vst [vmem:[#allocation24_spill] sm:$0xff] %v3844_v23 }
 0x19d   : > { %4623 = vst [vmem:[#allocation19_spill] sm:$0xff] %v3814_v45  ;;  %1352 = vst.msk [vmem:[#allocation3 + $0x78] sm:$0xff] %vm1022_vm14, %v3811_v44  ;;  %1615 = vperm.xlu0 %2775, %v3814_v45  }
 0x19e   : > { %2176 = vst.msk [vmem:[#allocation3] sm:$0xff] %vm1821_vm12, %v3814_v45  ;;  %v1520_v11 = vpop.xlane.xlu0 %1519  ;;  %v1522_v35 = vpop.xlane.xlu1 %1521 }
 0x19f   : > { %v3830_v15 = vmax.f32 %v3825_v49, %v1520_v11  ;;  %v3833_v31 = vmax.f32 %v3827_v62, %v1522_v35  ;;  %v3866_v49 = vld [vmem:[#allocation3 + $0x30] sm:$0xff] }
 0x1a0   : > { %4633 = vst [vmem:[#allocation29_spill] sm:$0xff] %v3866_v49 }
 0x1a1   : > { %4626 = vst [vmem:[#allocation22_spill] sm:$0xff] %v3830_v15  ;;  %4627 = vst [vmem:[#allocation23_spill] sm:$0xff] %v3833_v31  ;;  %1620 = vperm.xlu1 %2776, %v3830_v15  }
 0x1a2   : > { %2177 = vst.msk [vmem:[#allocation3 + $0x8] sm:$0xff] %vm1821_vm12, %v3830_v15  ;;  %2178 = vst.msk [vmem:[#allocation3 + $0x10] sm:$0xff] %vm1821_vm12, %v3833_v31  ;;  %v1524_v11 = vpop.xlane.xlu0 %1523  ;;  %v1526_v35 = vpop.xlane.xlu1 %1525 }
 0x1a3   : > { %v3849_v50 = vmax.f32 %v3844_v23, %v1524_v11  ;;  %v3852_v22 = vmax.f32 %v3846_v16, %v1526_v35  ;;  %v3864_v11 = vld [vmem:[#allocation3 + $0x28] sm:$0xff] }
 0x1a4   : > { %4632 = vst [vmem:[#allocation28_spill] sm:$0xff] %v3864_v11 }
 0x1a5   : > { %4630 = vst [vmem:[#allocation26_spill] sm:$0xff] %v3849_v50  ;;  %4631 = vst [vmem:[#allocation27_spill] sm:$0xff] %v3852_v22  ;;  %1630 = vperm.xlu0 %2775, %v3849_v50   ;;  %1625 = vperm.xlu1 %2776, %v3833_v31  }
 0x1a6   : > { %2179 = vst.msk [vmem:[#allocation3 + $0x18] sm:$0xff] %vm1821_vm12, %v3849_v50  ;;  %2180 = vst.msk [vmem:[#allocation3 + $0x20] sm:$0xff] %vm1821_vm12, %v3852_v22  ;;  %v1528_v35 = vpop.xlane.xlu0 %1527  ;;  %v1530_v62 = vpop.xlane.xlu1 %1529  ;;  %v3886_v50 = vld [vmem:[#allocation3 + $0x40] sm:$0xff] }
 0x1a7   : > { %v3869_v45 = vmax.f32 %v3864_v11, %v1528_v35  ;;  %v3872_v23 = vmax.f32 %v3866_v49, %v1530_v62  ;;  %v3884_v35 = vld [vmem:[#allocation3 + $0x38] sm:$0xff]  ;;  %4637 = vst [vmem:[#allocation33_spill] sm:$0xff] %v3886_v50  ;;  %v767_v49 = vsub.f32 %v3678_v36, %v3689_v29  ;;  %v3946_v36 = vld [vmem:[#allocation3 + $0x68] sm:$0xff]  ;;  %v3948_v29 = vld [vmem:[#allocation3 + $0x70] sm:$0xff] }
 0x1a8   : > { %4636 = vst [vmem:[#allocation32_spill] sm:$0xff] %v3884_v35 }
 0x1a9   : > { %4634 = vst [vmem:[#allocation30_spill] sm:$0xff] %v3869_v45  ;;  %4635 = vst [vmem:[#allocation31_spill] sm:$0xff] %v3872_v23  ;;  %1640 = vperm.xlu0 %2775, %v3869_v45   ;;  %1635 = vperm.xlu1 %2776, %v3852_v22  }
 0x1aa   : > { %2181 = vst.msk [vmem:[#allocation3 + $0x28] sm:$0xff] %vm1821_vm12, %v3869_v45  ;;  %2182 = vst.msk [vmem:[#allocation3 + $0x30] sm:$0xff] %vm1821_vm12, %v3872_v23  ;;  %v1532_v62 = vpop.xlane.xlu0 %1531  ;;  %v1534_v31 = vpop.xlane.xlu1 %1533  ;;  %v3906_v45 = vld [vmem:[#allocation3 + $0x50] sm:$0xff] }
 0x1ab   : > { %v3889_v15 = vmax.f32 %v3884_v35, %v1532_v62  ;;  %v3892_v11 = vmax.f32 %v3886_v50, %v1534_v31  ;;  %v3904_v62 = vld [vmem:[#allocation3 + $0x48] sm:$0xff]  ;;  %4641 = vst [vmem:[#allocation37_spill] sm:$0xff] %v3906_v45 }
 0x1ac   : > { %4640 = vst [vmem:[#allocation36_spill] sm:$0xff] %v3904_v62 }
 0x1ad   : > { %4638 = vst [vmem:[#allocation34_spill] sm:$0xff] %v3889_v15  ;;  %4639 = vst [vmem:[#allocation35_spill] sm:$0xff] %v3892_v11  ;;  %1650 = vperm.xlu0 %2775, %v3889_v15   ;;  %1645 = vperm.xlu1 %2776, %v3872_v23  }
 0x1ae   : > { %2183 = vst.msk [vmem:[#allocation3 + $0x38] sm:$0xff] %vm1821_vm12, %v3889_v15  ;;  %2184 = vst.msk [vmem:[#allocation3 + $0x40] sm:$0xff] %vm1821_vm12, %v3892_v11  ;;  %v1536_v31 = vpop.xlane.xlu0 %1535  ;;  %v1538_v22 = vpop.xlane.xlu1 %1537  ;;  %v3926_v15 = vld [vmem:[#allocation3 + $0x60] sm:$0xff] }
 0x1af   : > { %v3909_v16 = vmax.f32 %v3904_v62, %v1536_v31  ;;  %v3912_v35 = vmax.f32 %v3906_v45, %v1538_v22  ;;  %v3924_v31 = vld [vmem:[#allocation3 + $0x58] sm:$0xff]  ;;  %4644 = vst [vmem:[#allocation40_spill] sm:$0xff] %v3926_v15 }
 0x1b0   : > { %4643 = vst [vmem:[#allocation39_spill] sm:$0xff] %v3924_v31 }
 0x1b1   : > { %4642 = vst [vmem:[#allocation38_spill] sm:$0xff] %v3909_v16  ;;  %2185 = vst.msk [vmem:[#allocation3 + $0x48] sm:$0xff] %vm1821_vm12, %v3909_v16  ;;  %1660 = vperm.xlu0 %2775, %v3909_v16   ;;  %1655 = vperm.xlu1 %2776, %v3892_v11   ;;  %v784_v16 = vmul.f32 1.442695, %v767_v49 }
 0x1b2   : > { %2186 = vst.msk [vmem:[#allocation3 + $0x50] sm:$0xff] %vm1821_vm12, %v3912_v35  ;;  %v1540_v22 = vpop.xlane.xlu0 %1539  ;;  %v1542_v23 = vpop.xlane.xlu1 %1541 }
 0x1b3   : > { %v3931_v62 = vmax.f32 %v3924_v31, %v1540_v22  ;;  %v3934_v50 = vmax.f32 %v3926_v15, %v1542_v23  ;;  %v770_v31 = vsub.f32 %v3693_v0, %v3707_v38  ;;  %v3968_v0 = vld [vmem:[#allocation3 + $0x78] sm:$0xff]  ;;  %2789 = vpow2.f32 %v784_v16 }
 0x1b4   : > { %v4648_v16 = vsub.f32 %v3671_v4, %v3674_v25  ;;  %v4650_v15 = vsub.f32 %v3676_v26, %v3686_v54  ;;  %v4651_v26 = vsub.f32 %v3691_v12, %v3704_v30 }
 0x1b5   : > { %4645 = vst [vmem:[#allocation41_spill] sm:$0xff] %v3931_v62  ;;  %2187 = vst.msk [vmem:[#allocation3 + $0x58] sm:$0xff] %vm1821_vm12, %v3931_v62  ;;  %1670 = vperm.xlu0 %2775, %v3931_v62   ;;  %1665 = vperm.xlu1 %2776, %v3912_v35   ;;  %v790_v49 = vmul.f32 1.442695, %v770_v31 }
 0x1b6   : > { %2188 = vst.msk [vmem:[#allocation3 + $0x60] sm:$0xff] %vm1821_vm12, %v3934_v50  ;;  %v1544_v23 = vpop.xlane.xlu0 %1543  ;;  %v1546_v22 = vpop.xlane.xlu1 %1545  ;;  %v782_v31 = vmul.f32 1.442695, %v4648_v16 }
 0x1b7   : > { %v3953_v45 = vmax.f32 %v3946_v36, %v1544_v23  ;;  %v3956_v11 = vmax.f32 %v3948_v29, %v1546_v22  ;;  %v772_v23 = vsub.f32 %v3711_v8, %v3725_v53  ;;  %2791 = vpow2.f32 %v790_v49 }
 0x1b8   : > { %v774_v53 = vsub.f32 %v3729_v5, %v3743_v21  ;;  %2793 = vpow2.f32 %v782_v31  ;;  %v776_v5 = vsub.f32 %v3747_v47, %v3761_v34  ;;  %v778_v47 = vsub.f32 %v3765_v19, %v3779_v32 }
 0x1b9   : > { %4646 = vst [vmem:[#allocation42_spill] sm:$0xff] %v3953_v45  ;;  %2189 = vst.msk [vmem:[#allocation3 + $0x68] sm:$0xff] %vm1821_vm12, %v3953_v45  ;;  %1680 = vperm.xlu0 %2775, %v3953_v45   ;;  %1675 = vperm.xlu1 %2776, %v3934_v50   ;;  %v794_v8 = vmul.f32 1.442695, %v772_v23  ;;  %v780_v23 = vsub.f32 %v3783_v17, %v3797_v24 }
 0x1ba   : > { %2190 = vst.msk [vmem:[#allocation3 + $0x70] sm:$0xff] %vm1821_vm12, %v3956_v11  ;;  %v1548_v38 = vpop.xlane.xlu0 %1547  ;;  %v1961_v62 = vpop.permute.xlu1 %1960  ;;  %v798_v25 = vmul.f32 1.442695, %v774_v53  ;;  %v802_v21 = vmul.f32 1.442695, %v776_v5 }
 0x1bb   : > { %v3973_v22 = vmax.f32 %v3968_v0, %v1548_v38  ;;  %v4649_v38 = vmov 0   ;;  %2795 = vpow2.f32 %v794_v8  ;;  %v806_v49 = vmul.f32 1.442695, %v778_v47 }
 0x1bc   : > { %v810_v16 = vmul.f32 1.442695, %v780_v23 }
 0x1bd   : > { %4647 = vst [vmem:[#allocation43_spill] sm:$0xff] %v3973_v22  ;;  %2191 = vst.msk [vmem:[#allocation3 + $0x78] sm:$0xff] %vm1821_vm12, %v3973_v22  ;;  %1690 = vperm.xlu0 %2775, %v3973_v22   ;;  %1685 = vperm.xlu1 %2776, %v3956_v11   ;;  %v786_v22 = vmul.f32 1.442695, %v4650_v15  ;;  %v788_v15 = vmul.f32 1.442695, %v4651_v26 }
 0x1be   : > { %v1959_v45 = vpop.permute.xlu0 %1958  ;;  %v1963_v4 = vpop.permute.xlu1 %1962 }
 0x1bf   : > { %2674 = vmatprep.subr.bf16.mxu1 %v1959_v45  ;;  %2797 = vpow2.f32 %v786_v22 }
 0x1c0   : > { %2675 = vmatpush3.bf16.msra.mxu1 %v1959_v45  ;;  %v3995_v45 = vpop.eup %2789  ;;  %2799 = vpow2.f32 %v798_v25 }
 0x1c1   : > { %2778 = vset.pattern.permute.xlu0 %v4649_v38  ;;  %2777 = vset.pattern.permute.xlu1 %v4649_v38  ;;  %v4004_v34 = vpop.eup %2791  ;;  %2801 = vpow2.f32 %v788_v15 }
 0x1c2   : > { %881 = vperm.xlu0 %2778, %v3794_v40   ;;  %876 = vperm.xlu1 %2777, %v3779_v32   ;;  %v1965_v54 = vpop.permute.xlu0 %1964  ;;  %v1967_v30 = vpop.permute.xlu1 %1966  ;;  %2803 = vpow2.f32 %v802_v21 }
 0x1c3   : > { %2676 = vmatprep.subr.bf16.mxu1 %v1961_v62  ;;  %v4013_v19 = vpop.eup %2793 }
 0x1c4   : > { %2677 = vmatpush3.bf16.msra.mxu1 %v1961_v62  ;;  %v4652_v62 = vsub.f32 %v3709_v6, %v3722_v59  ;;  %v4653_v6 = vsub.f32 %v3727_v20, %v3740_v52  ;;  %v4654_v52 = vsub.f32 %v3745_v39, %v3758_v43  ;;  %v4656_v43 = vsub.f32 %v3781_v55, %v3794_v40 }
 0x1c5   : > { %2678 = vmatprep.subr.bf16.mxu1 %v1963_v4  ;;  %v4015_v32 = vpop.eup %2795 }
 0x1c6   : > { %1062 = vperm.xlu0 %2778, %v3995_v45   ;;  %886 = vperm.xlu1 %2777, %v3797_v24   ;;  %v792_v12 = vmul.f32 1.442695, %v4652_v62  ;;  %v796_v59 = vmul.f32 1.442695, %v4653_v6  ;;  %v1969_v22 = vpop.permute.xlu0 %1968  ;;  %v1971_v20 = vpop.permute.xlu1 %1970  ;;  %v800_v17 = vmul.f32 1.442695, %v4654_v52 }
 0x1c7   : > { %v808_v26 = vmul.f32 1.442695, %v4656_v43 }
 0x1c8   : > { %2679 = vmatpush3.bf16.msra.mxu1 %v1963_v4  ;;  %2805 = vpow2.f32 %v792_v12  ;;  %v4655_v4 = vsub.f32 %v3763_v33, %v3776_v56  ;;  %v4657_v56 = vsub.f32 %v3799_v28, %v3811_v44 }
 0x1c9   : > { %2680 = vmatprep.subr.bf16.mxu1 %v1965_v54  ;;  %2807 = vpow2.f32 %v806_v49  ;;  %v4022_v31 = vpop.eup %2797 }
 0x1ca   : > { %1077 = vperm.xlu0 %2778, %v4004_v34   ;;  %891 = vperm.xlu1 %2777, %v3811_v44   ;;  %v4024_v24 = vpop.eup %2799  ;;  %2809 = vpow2.f32 %v796_v59  ;;  %v1973_v38 = vpop.permute.xlu0 %1972  ;;  %v804_v25 = vmul.f32 1.442695, %v4655_v4 }
 0x1cb   : > { %2811 = vpow2.f32 %v810_v16  ;;  %v4031_v8 = vpop.eup %2801 }
 0x1cc   : > { %2681 = vmatpush3.bf16.msra.mxu1 %v1965_v54  ;;  %v4033_v53 = vpop.eup %2803  ;;  %2813 = vpow2.f32 %v800_v17  ;;  %v812_v54 = vmul.f32 1.442695, %v4657_v56 }
 0x1cd   : > { %2682 = vmatprep.subr.bf16.mxu1 %v1967_v30  ;;  %2815 = vpow2.f32 %v804_v25 }
 0x1ce   : > { %1087 = vperm.xlu0 %2778, %v4015_v32   ;;  %1057 = vperm.xlu1 %2777, %v4013_v19   ;;  %2817 = vpow2.f32 %v808_v26 }
 0x1cf   : > { %2819 = vpow2.f32 %v812_v54 }
 0x1d0   : > { %2683 = vmatpush3.bf16.msra.mxu1 %v1967_v30 }
 0x1d1   : > { %2684 = vmatprep.subr.bf16.mxu1 %v1969_v22 }
 0x1d2   : > { %1097 = vperm.xlu0 %2778, %v4024_v24   ;;  %1067 = vperm.xlu1 %2777, %v4022_v31   ;;  %v4040_v5 = vpop.eup %2805 }
 0x1d3   : > { %v4042_v39 = vpop.eup %2807 }
 0x1d4   : > { %2685 = vmatpush3.bf16.msra.mxu1 %v1969_v22  ;;  %v4049_v15 = vpop.eup %2809 }
 0x1d5   : > { %2686 = vmatprep.subr.bf16.mxu1 %v1971_v20  ;;  %v4051_v33 = vpop.eup %2811 }
 0x1d6   : > { %1107 = vperm.xlu0 %2778, %v4033_v53   ;;  %1072 = vperm.xlu1 %2777, %v4031_v8   ;;  %v4058_v21 = vpop.eup %2813 }
 0x1d7   : > { %v4062_v40 = vpop.eup %2815 }
 0x1d8   : > { %2687 = vmatpush3.bf16.msra.mxu1 %v1971_v20  ;;  %v4065_v55 = vpop.eup %2817 }
 0x1d9   : > { %2688 = vmatprep.subr.bf16.mxu1 %v1973_v38  ;;  %v4068_v47 = vpop.eup %2819 }
 0x1da   : > { %1117 = vperm.xlu0 %2778, %v4042_v39   ;;  %1082 = vperm.xlu1 %2777, %v4040_v5  }
 0x1dc   : > { %2689 = vmatpush3.bf16.msra.mxu1 %v1973_v38 }
 0x1de   : > { %1127 = vperm.xlu0 %2778, %v4051_v33   ;;  %1092 = vperm.xlu1 %2777, %v4049_v15  }
 0x1e2   : > { %1102 = vperm.xlu1 %2777, %v4058_v21   ;;  %2780 = vset.pattern.permute.xlu0 %v4621_v14 }
 0x1e6   : > { %1112 = vperm.xlu1 %2777, %v4062_v40  }
 0x1ea   : > { %1122 = vperm.xlu1 %2777, %v4065_v55  }
 0x1ee   : > { %1132 = vperm.xlu1 %2777, %v4068_v47  }
 0x1f2   : > { %2779 = vset.pattern.permute.xlu1 %v4621_v14 }
 0x1fc   : > { %v817_v28 = vpop.permute.xlu1 %816 }
 0x1fd   : > { %v894_v44 = vsub.f32 %v3350_v48, %v817_v28 }
 0x1ff   : > { %v910_v62 = vmul.f32 1.442695, %v894_v44 }
 0x200   : > { %v822_v12 = vpop.permute.xlu0 %821  ;;  %v827_v30 = vpop.permute.xlu1 %826 }
 0x201   : > { %2821 = vpow2.f32 %v910_v62  ;;  %v895_v49 = vsub.f32 %v3388_v18, %v822_v12  ;;  %v896_v23 = vsub.f32 %v3373_v3, %v827_v30 }
 0x203   : > { %v912_v6 = vmul.f32 1.442695, %v895_v49  ;;  %v914_v59 = vmul.f32 1.442695, %v896_v23 }
 0x204   : > { %v837_v22 = vpop.permute.xlu0 %836  ;;  %v832_v16 = vpop.permute.xlu1 %831 }
 0x205   : > { %2823 = vpow2.f32 %v912_v6  ;;  %v898_v20 = vsub.f32 %v3420_v60, %v837_v22  ;;  %v897_v14 = vsub.f32 %v3406_v37, %v832_v16 }
 0x206   : > { %2825 = vpow2.f32 %v914_v59 }
 0x207   : > { %v918_v52 = vmul.f32 1.442695, %v898_v20  ;;  %v916_v48 = vmul.f32 1.442695, %v897_v14 }
 0x208   : > { %v847_v17 = vpop.permute.xlu0 %846  ;;  %v842_v38 = vpop.permute.xlu1 %841 }
 0x209   : > { %v900_v4 = vsub.f32 %v3444_v57, %v847_v17  ;;  %v899_v18 = vsub.f32 %v3438_v13, %v842_v38  ;;  %2827 = vpow2.f32 %v916_v48 }
 0x20a   : > { %2829 = vpow2.f32 %v918_v52 }
 0x20b   : > { %v2822_v3 = vpop.eup %2821  ;;  %v922_v25 = vmul.f32 1.442695, %v900_v4  ;;  %v920_v43 = vmul.f32 1.442695, %v899_v18 }
 0x20c   : > { %v857_v26 = vpop.permute.xlu0 %856  ;;  %974 = vadd.xlane.f32.xlu0 %v2822_v3  ;;  %v852_v56 = vpop.permute.xlu1 %851 }
 0x20d   : > { %v902_v60 = vsub.f32 %v3477_v63, %v857_v26  ;;  %v901_v37 = vsub.f32 %v3467_v61, %v852_v56  ;;  %2831 = vpow2.f32 %v920_v43 }
 0x20e   : > { %2833 = vpow2.f32 %v922_v25 }
 0x20f   : > { %v2824_v54 = vpop.eup %2823  ;;  %v926_v28 = vmul.f32 1.442695, %v902_v60  ;;  %v924_v44 = vmul.f32 1.442695, %v901_v37 }
 0x210   : > { %v2826_v57 = vpop.eup %2825  ;;  %v862_v62 = vpop.permute.xlu0 %861  ;;  %v1151_v12 = vpack.c.bf16 %v2824_v54, %v2822_v3 }
 0x211   : > { %v867_v13 = vpop.permute.xlu1 %866  ;;  %v903_v30 = vsub.f32 %v3501_v2, %v862_v62  ;;  %978 = vadd.xlane.f32.xlu0 %v2826_v57  ;;  %2835 = vpow2.f32 %v924_v44 }
 0x212   : > { %v904_v49 = vsub.f32 %v3511_v46, %v867_v13  ;;  %976 = vadd.xlane.f32.xlu1 %v2824_v54  ;;  %2658 = vmatprep.mubr.bf16.mxu0 %v1151_v12  ;;  %2837 = vpow2.f32 %v926_v28 }
 0x213   : > { %v928_v63 = vmul.f32 1.442695, %v903_v30  ;;  %v2828_v23 = vpop.eup %2827 }
 0x214   : > { %v930_v61 = vmul.f32 1.442695, %v904_v49  ;;  %v2830_v59 = vpop.eup %2829  ;;  %v1152_v16 = vpack.c.bf16 %v2828_v23, %v2826_v57 }
 0x215   : > { %v872_v6 = vpop.permute.xlu1 %871  ;;  %2839 = vpow2.f32 %v928_v63  ;;  %980 = vadd.xlane.f32.xlu0 %v2828_v23 }
 0x216   : > { %v905_v22 = vsub.f32 %v3530_v9, %v872_v6  ;;  %982 = vadd.xlane.f32.xlu1 %v2830_v59  ;;  %2841 = vpow2.f32 %v930_v61  ;;  %2659 = vmatmul.mubr.bf16.vlgmr.msra.gmra.mrb[0].mxu0 %v1152_v16 }
 0x217   : > { %v2832_v20 = vpop.eup %2831 }
 0x218   : > { %v932_v2 = vmul.f32 1.442695, %v905_v22  ;;  %v2834_v46 = vpop.eup %2833  ;;  %v1153_v14 = vpack.c.bf16 %v2832_v20, %v2830_v59 }
 0x219   : > { %984 = vadd.xlane.f32.xlu0 %v2832_v20  ;;  %v4658_v20 = vld [vmem:[#allocation12_spill] sm:$0xff] }
 0x21a   : > { %2843 = vpow2.f32 %v932_v2  ;;  %986 = vadd.xlane.f32.xlu1 %v2834_v46  ;;  %2662 = vmatprep.mubr.bf16.mxu0 %v1153_v14  ;;  %v4659_v14 = vld [vmem:[#allocation10_spill] sm:$0xff] }
 0x21b   : > { %v2836_v52 = vpop.eup %2835 }
 0x21c   : > { %v1616_v48 = vpop.permute.xlu0 %1615  ;;  %v2838_v17 = vpop.eup %2837  ;;  %v1154_v4 = vpack.c.bf16 %v2836_v52, %v2834_v46 }
 0x21d   : > { %v1693_v38 = vsub.f32 %v3570_v10, %v1616_v48  ;;  %988 = vadd.xlane.f32.xlu0 %v2836_v52 }
 0x21e   : > { %990 = vadd.xlane.f32.xlu1 %v2838_v17  ;;  %2663 = vmatmul.mubr.bf16.gmra.mrb[4].mxu0 %v1154_v4 }
 0x21f   : > { %v2840_v9 = vpop.eup %2839  ;;  %v1709_v18 = vmul.f32 1.442695, %v1693_v38 }
 0x220   : > { %v1621_v3 = vpop.permute.xlu1 %1620  ;;  %v1155_v25 = vpack.c.bf16 %v2840_v9, %v2838_v17  ;;  %v2842_v43 = vpop.eup %2841 }
 0x221   : > { %992 = vadd.xlane.f32.xlu0 %v2840_v9  ;;  %v1694_v26 = vsub.f32 %v3577_v41, %v1621_v3  ;;  %2845 = vpow2.f32 %v1709_v18  ;;  %v4660_v9 = vld [vmem:[#allocation14_spill] sm:$0xff]  ;;  %v4661_v3 = vld [vmem:[#allocation11_spill] sm:$0xff] }
 0x222   : > { %2666 = vmatprep.mubr.bf16.mxu0 %v1155_v25  ;;  %994 = vadd.xlane.f32.xlu1 %v2842_v43 }
 0x223   : > { %v1711_v60 = vmul.f32 1.442695, %v1694_v26 }
 0x224   : > { %v2844_v56 = vpop.eup %2843  ;;  %v1631_v37 = vpop.permute.xlu0 %1630 }
 0x225   : > { %v1626_v54 = vpop.permute.xlu1 %1625  ;;  %v1156_v10 = vpack.c.bf16 %v2844_v56, %v2842_v43  ;;  %2847 = vpow2.f32 %v1711_v60  ;;  %v1696_v28 = vsub.f32 %v3596_v58, %v1631_v37  ;;  %996 = vadd.xlane.f32.xlu0 %v2844_v56 }
 0x226   : > { %v1695_v44 = vsub.f32 %v3583_v1, %v1626_v54 }
 0x227   : > { %v1715_v57 = vmul.f32 1.442695, %v1696_v28  ;;  %2667 = vmatmul.mubr.bf16.gmra.mrb[8].mxu0 %v1156_v10  ;;  %v4662_v28 = vld [vmem:[#allocation16_spill] sm:$0xff] }
 0x228   : > { %v1713_v62 = vmul.f32 1.442695, %v1695_v44  ;;  %v1641_v13 = vpop.permute.xlu0 %1640 }
 0x229   : > { %v1636_v12 = vpop.permute.xlu1 %1635  ;;  %2849 = vpow2.f32 %v1715_v57  ;;  %v1698_v41 = vsub.f32 %v3609_v27, %v1641_v13  ;;  %v4663_v57 = vld [vmem:[#allocation13_spill] sm:$0xff] }
 0x22a   : > { %v1697_v30 = vsub.f32 %v3590_v51, %v1636_v12  ;;  %2851 = vpow2.f32 %v1713_v62 }
 0x22b   : > { %v1719_v49 = vmul.f32 1.442695, %v1698_v41  ;;  %v4092_v6 = vpop.eup %2845 }
 0x22c   : > { %v1717_v63 = vmul.f32 1.442695, %v1697_v30  ;;  %v1651_v61 = vpop.permute.xlu0 %1650 }
 0x22d   : > { %v1646_v23 = vpop.permute.xlu1 %1645  ;;  %2853 = vpow2.f32 %v1719_v49  ;;  %v1700_v58 = vsub.f32 %v3620_v7, %v1651_v61 }
 0x22e   : > { %v1699_v1 = vsub.f32 %v3603_v42, %v1646_v23  ;;  %2855 = vpow2.f32 %v1717_v63  ;;  %v4664_v23 = vld [vmem:[#allocation17_spill] sm:$0xff] }
 0x22f   : > { %v4094_v59 = vpop.eup %2847  ;;  %v1723_v22 = vmul.f32 1.442695, %v1700_v58 }
 0x230   : > { %v1721_v16 = vmul.f32 1.442695, %v1699_v1  ;;  %v1661_v27 = vpop.permute.xlu0 %1660  ;;  %v1950_v51 = vpack.c.bf16 %v4094_v59, %v4092_v6  ;;  %v4665_v1 = vld [vmem:[#allocation15_spill] sm:$0xff] }
 0x231   : > { %v1656_v2 = vpop.permute.xlu1 %1655  ;;  %2857 = vpow2.f32 %v1723_v22  ;;  %v1702_v46 = vsub.f32 %v4658_v20, %v1661_v27 }
 0x232   : > { %v1701_v52 = vsub.f32 %v4659_v14, %v1656_v2  ;;  %2859 = vpow2.f32 %v1721_v16  ;;  %2690 = vmatprep.mubr.bf16.mxu1 %v1950_v51 }
 0x233   : > { %v4100_v42 = vpop.eup %2849  ;;  %v1727_v7 = vmul.f32 1.442695, %v1702_v46 }
 0x234   : > { %v1725_v48 = vmul.f32 1.442695, %v1701_v52  ;;  %v4102_v17 = vpop.eup %2851  ;;  %v1671_v38 = vpop.permute.xlu0 %1670 }
 0x235   : > { %v1666_v4 = vpop.permute.xlu1 %1665  ;;  %2861 = vpow2.f32 %v1727_v7  ;;  %v1704_v18 = vsub.f32 %v4660_v9, %v1671_v38  ;;  %v1951_v43 = vpack.c.bf16 %v4100_v42, %v4102_v17  ;;  %v4666_v7 = vld [vmem:[#allocation7_spill] sm:$0xff]  ;;  %v4667_v38 = vld [vmem:[#allocation6_spill] sm:$0xff] }
 0x236   : > { %v1703_v25 = vsub.f32 %v4661_v3, %v1666_v4  ;;  %2863 = vpow2.f32 %v1725_v48 }
 0x237   : > { %v4108_v26 = vpop.eup %2853  ;;  %v1731_v56 = vmul.f32 1.442695, %v1704_v18  ;;  %2691 = vmatmul.mubr.bf16.vlgmr.msra.gmra.mrb[0].mxu1 %v1951_v43 }
 0x238   : > { %v1729_v60 = vmul.f32 1.442695, %v1703_v25  ;;  %v4110_v37 = vpop.eup %2855  ;;  %v1681_v54 = vpop.permute.xlu0 %1680 }
 0x239   : > { %v1676_v10 = vpop.permute.xlu1 %1675  ;;  %2865 = vpow2.f32 %v1731_v56  ;;  %v1706_v44 = vsub.f32 %v4662_v28, %v1681_v54  ;;  %v1952_v13 = vpack.c.bf16 %v4108_v26, %v4110_v37 }
 0x23a   : > { %v1705_v62 = vsub.f32 %v4663_v57, %v1676_v10  ;;  %2867 = vpow2.f32 %v1729_v60  ;;  %v4668_v60 = vld [vmem:[#allocation8_spill] sm:$0xff] }
 0x23b   : > { %v4116_v12 = vpop.eup %2857  ;;  %v1735_v41 = vmul.f32 1.442695, %v1706_v44  ;;  %2694 = vmatprep.mubr.bf16.mxu1 %v1952_v13  ;;  %v4669_v13 = vld [vmem:[#allocation9_spill] sm:$0xff] }
 0x23c   : > { %v1733_v30 = vmul.f32 1.442695, %v1705_v62  ;;  %v2860_v49 = vpop.eup %2859  ;;  %v1691_v63 = vpop.permute.xlu0 %1690 }
 0x23d   : > { %v1686_v61 = vpop.permute.xlu1 %1685  ;;  %2869 = vpow2.f32 %v1735_v41  ;;  %v1708_v58 = vsub.f32 %v4664_v23, %v1691_v63  ;;  %v1953_v16 = vpack.c.bf16 %v4116_v12, %v2860_v49 }
 0x23e   : > { %v1707_v22 = vsub.f32 %v4665_v1, %v1686_v61  ;;  %2871 = vpow2.f32 %v1733_v30 }
 0x23f   : > { %v2862_v27 = vpop.eup %2861  ;;  %v1739_v2 = vmul.f32 1.442695, %v1708_v58  ;;  %2695 = vmatmul.mubr.bf16.gmra.mrb[4].mxu1 %v1953_v16 }
 0x240   : > { %v1737_v51 = vmul.f32 1.442695, %v1707_v22  ;;  %v2864_v20 = vpop.eup %2863 }
 0x241   : > { %2873 = vpow2.f32 %v1739_v2  ;;  %v882_v46 = vpop.permute.xlu0 %881  ;;  %v877_v14 = vpop.permute.xlu1 %876  ;;  %v1954_v52 = vpack.c.bf16 %v2862_v27, %v2864_v20 }
 0x242   : > { %2875 = vpow2.f32 %v1737_v51  ;;  %v907_v48 = vsub.f32 %v4666_v7, %v882_v46  ;;  %v906_v4 = vsub.f32 %v4667_v38, %v877_v14  ;;  %v4677_v38 = vld [vmem:[#allocation26_spill] sm:$0xff] }
 0x243   : > { %v2866_v9 = vpop.eup %2865  ;;  %2698 = vmatprep.mubr.bf16.mxu1 %v1954_v52  ;;  %v4674_v52 = vld [vmem:[#allocation23_spill] sm:$0xff] }
 0x244   : > { %v2868_v18 = vpop.eup %2867  ;;  %v936_v3 = vmul.f32 1.442695, %v907_v48  ;;  %v934_v25 = vmul.f32 1.442695, %v906_v4  ;;  %v4676_v48 = vld [vmem:[#allocation24_spill] sm:$0xff] }
 0x245   : > { %v887_v43 = vpop.permute.xlu1 %886  ;;  %v1955_v56 = vpack.c.bf16 %v2866_v9, %v2868_v18 }
 0x246   : > { %2877 = vpow2.f32 %v936_v3  ;;  %v908_v54 = vsub.f32 %v4668_v60, %v887_v43 }
 0x247   : > { %v2870_v10 = vpop.eup %2869  ;;  %2879 = vpow2.f32 %v934_v25  ;;  %2699 = vmatmul.mubr.bf16.gmra.mrb[8].mxu1 %v1955_v56  ;;  %v4680_v25 = vld [vmem:[#allocation27_spill] sm:$0xff] }
 0x248   : > { %v2872_v28 = vpop.eup %2871  ;;  %v938_v44 = vmul.f32 1.442695, %v908_v54  ;;  %v4682_v54 = vld [vmem:[#allocation20_spill] sm:$0xff] }
 0x249   : > { %v892_v57 = vpop.permute.xlu1 %891  ;;  %v1956_v62 = vpack.c.bf16 %v2870_v10, %v2872_v28 }
 0x24a   : > { %2881 = vpow2.f32 %v938_v44  ;;  %v909_v41 = vsub.f32 %v4669_v13, %v892_v57  ;;  %v4685_v13 = vld [vmem:[#allocation28_spill] sm:$0xff] }
 0x24b   : > { %v2874_v30 = vpop.eup %2873  ;;  %2702 = vmatprep.mubr.bf16.mxu1 %v1956_v62 }
 0x24c   : > { %v2876_v63 = vpop.eup %2875  ;;  %v940_v61 = vmul.f32 1.442695, %v909_v41  ;;  %v4686_v41 = vld [vmem:[#allocation30_spill] sm:$0xff] }
 0x24d   : > { %v1957_v23 = vpack.c.bf16 %v2874_v30, %v2876_v63  ;;  %v4131_v46 = vpop.permute.xlu1 %1057 }
 0x24e   : > { %2883 = vpow2.f32 %v940_v61 }
 0x24f   : > { %2703 = vmatmul.mubr.bf16.gmra.mrb[12].mxu1 %v1957_v23  ;;  %v4688_v23 = vld [vmem:[#allocation29_spill] sm:$0xff] }
 0x250   : > { %v2878_v58 = vpop.eup %2877 }
 0x251   : > { %v2880_v1 = vpop.eup %2879  ;;  %1000 = vadd.xlane.f32.xlu0 %v2878_v58  ;;  %v4136_v14 = vpop.permute.xlu1 %1067 }
 0x252   : > { %998 = vadd.xlane.f32.xlu1 %v2880_v1  ;;  %v1157_v22 = vpack.c.bf16 %v2878_v58, %v2880_v1  ;;  %v4689_v58 = vld [vmem:[#allocation31_spill] sm:$0xff] }
 0x253   : > { %v4690_v1 = vsub.f32 %v4688_v23, %v4689_v58 }
 0x254   : > { %v2882_v16 = vpop.eup %2881  ;;  %2670 = vmatprep.mubr.bf16.mxu0 %v1157_v22 }
 0x255   : > { %v1593_v22 = vmul.f32 1.442695, %v4690_v1  ;;  %v4705_v1 = vld [vmem:[#allocation39_spill] sm:$0xff] }
 0x256   : > { %1002 = vadd.xlane.f32.xlu1 %v2882_v16 }
 0x258   : > { %v2884_v2 = vpop.eup %2883 }
 0x259   : > { %1004 = vadd.xlane.f32.xlu0 %v2884_v2  ;;  %v1158_v51 = vpack.c.bf16 %v2884_v2, %v2882_v16  ;;  %v4691_v16 = vld [vmem:[#allocation37_spill] sm:$0xff] }
 0x25a   : > { %1775 = vadd.xlane.f32.xlu1 %v4094_v59  ;;  %v4134_v59 = vpop.permute.xlu0 %1062  ;;  %v4692_v2 = vsub.f32 %v4691_v16, %v3912_v35 }
 0x25b   : > { %2671 = vmatmul.mubr.bf16.gmra.mrb[12].mxu0 %v1158_v51 }
 0x25c   : > { %v1601_v51 = vmul.f32 1.442695, %v4692_v2 }
 0x25d   : > { %1773 = vadd.xlane.f32.xlu0 %v4092_v6  ;;  %v4670_v6 = vld [vmem:[#allocation18_spill] sm:$0xff] }
 0x25e   : > { %1781 = vadd.xlane.f32.xlu1 %v4110_v37 }
 0x261   : > { %1777 = vadd.xlane.f32.xlu0 %v4102_v17  ;;  %v4671_v17 = vld [vmem:[#allocation19_spill] sm:$0xff] }
 0x262   : > { %1785 = vadd.xlane.f32.xlu1 %v2860_v49  ;;  %v4672_v37 = vsub.f32 %v4670_v6, %v4671_v17 }
 0x264   : > { %v1581_v49 = vmul.f32 1.442695, %v4672_v37 }
 0x265   : > { %1779 = vadd.xlane.f32.xlu0 %v4100_v42  ;;  %v4141_v42 = vpop.permute.xlu0 %1077 }
 0x266   : > { %1789 = vadd.xlane.f32.xlu1 %v2864_v20  ;;  %2885 = vpow2.f32 %v1581_v49  ;;  %v4673_v20 = vld [vmem:[#allocation21_spill] sm:$0xff]  ;;  %v4693_v49 = vld [vmem:[#allocation32_spill] sm:$0xff] }
 0x269   : > { %1783 = vadd.xlane.f32.xlu0 %v4108_v26  ;;  %v4143_v26 = vpop.permute.xlu1 %1072 }
 0x26a   : > { %1793 = vadd.xlane.f32.xlu1 %v2868_v18  ;;  %v4151_v18 = vpop.permute.xlu0 %1087 }
 0x26d   : > { %1787 = vadd.xlane.f32.xlu0 %v4116_v12  ;;  %v4675_v12 = vsub.f32 %v4673_v20, %v4674_v52  ;;  %v4153_v3 = vpop.permute.xlu1 %1082  ;;  %v4694_v20 = vld [vmem:[#allocation34_spill] sm:$0xff] }
 0x26e   : > { %1797 = vadd.xlane.f32.xlu1 %v2872_v28  ;;  %v4683_v28 = vld [vmem:[#allocation22_spill] sm:$0xff]  ;;  %v4163_v57 = vpop.permute.xlu0 %1097  ;;  %v4695_v52 = vsub.f32 %v4693_v49, %v4694_v20 }
 0x26f   : > { %v1585_v7 = vmul.f32 1.442695, %v4675_v12 }
 0x270   : > { %v4158_v60 = vpop.eup %2885  ;;  %v1595_v12 = vmul.f32 1.442695, %v4695_v52 }
 0x271   : > { %1791 = vadd.xlane.f32.xlu0 %v2862_v27  ;;  %2887 = vpow2.f32 %v1585_v7  ;;  %v4678_v27 = vsub.f32 %v4676_v48, %v4677_v38  ;;  %v4165_v62 = vpop.permute.xlu1 %1092  ;;  %v4696_v7 = vld [vmem:[#allocation40_spill] sm:$0xff] }
 0x272   : > { %1801 = vadd.xlane.f32.xlu1 %v2876_v63  ;;  %v4180_v6 = vpop.permute.xlu0 %1107  ;;  %v4697_v48 = vsub.f32 %v4696_v7, %v3934_v50  ;;  %v944_v7 = vld [vmem:[#allocation4 + $0x10] sm:$0xff] }
 0x273   : > { %v1587_v4 = vmul.f32 1.442695, %v4678_v27  ;;  %v4698_v27 = vld [vmem:[#allocation33_spill] sm:$0xff] }
 0x274   : > { %v1605_v38 = vmul.f32 1.442695, %v4697_v48 }
 0x275   : > { %1795 = vadd.xlane.f32.xlu0 %v2866_v9  ;;  %2889 = vpow2.f32 %v1587_v4  ;;  %v4679_v9 = vld [vmem:[#allocation25_spill] sm:$0xff]  ;;  %v4182_v17 = vpop.permute.xlu1 %1102  ;;  %v4699_v4 = vld [vmem:[#allocation35_spill] sm:$0xff] }
 0x276   : > { %v4681_v43 = vsub.f32 %v4679_v9, %v4680_v25  ;;  %v4700_v9 = vsub.f32 %v4698_v27, %v4699_v4  ;;  %v4708_v27 = vld [vmem:[#allocation42_spill] sm:$0xff] }
 0x277   : > { %v4709_v4 = vsub.f32 %v3946_v36, %v4708_v27  ;;  %v946_v36 = vld [vmem:[#allocation4 + $0x20] sm:$0xff] }
 0x278   : > { %v1589_v56 = vmul.f32 1.442695, %v4681_v43  ;;  %v1597_v25 = vmul.f32 1.442695, %v4700_v9  ;;  %v4198_v43 = vpop.permute.xlu0 %1117 }
 0x279   : > { %1799 = vadd.xlane.f32.xlu0 %v2870_v10  ;;  %v4684_v10 = vsub.f32 %v4682_v54, %v4683_v28  ;;  %v4701_v54 = vsub.f32 %v3948_v29, %v3956_v11  ;;  %v942_v29 = vld [vmem:[#allocation4] sm:$0xff]  ;;  %v1607_v9 = vmul.f32 1.442695, %v4709_v4 }
 0x27a   : > { %2891 = vpow2.f32 %v1589_v56  ;;  %v4200_v56 = vpop.permute.xlu1 %1112 }
 0x27b   : > { %v1583_v44 = vmul.f32 1.442695, %v4684_v10  ;;  %v4171_v61 = vpop.eup %2887  ;;  %v1609_v28 = vmul.f32 1.442695, %v4701_v54 }
 0x27c   : > { %v4217_v23 = vpop.permute.xlu0 %1127 }
 0x27d   : > { %1803 = vadd.xlane.f32.xlu0 %v2874_v30  ;;  %v4687_v30 = vsub.f32 %v4685_v13, %v4686_v41  ;;  %2893 = vpow2.f32 %v1583_v44  ;;  %v4702_v44 = vld [vmem:[#allocation36_spill] sm:$0xff]  ;;  %v4703_v13 = vld [vmem:[#allocation38_spill] sm:$0xff] }
 0x27e   : > { %v4704_v41 = vsub.f32 %v4702_v44, %v4703_v13  ;;  %v4219_v11 = vpop.permute.xlu1 %1122  ;;  %v945_v13 = vld [vmem:[#allocation4 + $0x18] sm:$0xff] }
 0x27f   : > { %v1591_v63 = vmul.f32 1.442695, %v4687_v30  ;;  %v4184_v37 = vpop.eup %2889 }
 0x280   : > { %v1599_v30 = vmul.f32 1.442695, %v4704_v41 }
 0x281   : > { %2895 = vpow2.f32 %v1591_v63 }
 0x282   : > { %2897 = vpow2.f32 %v1593_v22  ;;  %v4706_v22 = vld [vmem:[#allocation41_spill] sm:$0xff]  ;;  %v4233_v48 = vpop.permute.xlu1 %1132 }
 0x283   : > { %1856 = vperm.xlu1 %2779, %v4158_v60   ;;  %2899 = vpow2.f32 %v1601_v51  ;;  %v4707_v16 = vsub.f32 %v4705_v1, %v4706_v22  ;;  %v958_v51 = vmul.f32 %v4013_v19, %v942_v29  ;;  %v4710_v29 = vld [vmem:[#allocation43_spill] sm:$0xff] }
 0x284   : > { %v4193_v35 = vpop.eup %2891  ;;  %2901 = vpow2.f32 %v1595_v12  ;;  %v4711_v1 = vsub.f32 %v3968_v0, %v4710_v29  ;;  %v951_v29 = vld [vmem:[#allocation4 + $0x48] sm:$0xff] }
 0x285   : > { %2903 = vpow2.f32 %v1605_v38  ;;  %v1603_v2 = vmul.f32 1.442695, %v4707_v16  ;;  %v943_v38 = vld [vmem:[#allocation4 + $0x8] sm:$0xff] }
 0x286   : > { %2905 = vpow2.f32 %v1597_v25  ;;  %v960_v25 = vmul.f32 %v4022_v31, %v944_v7  ;;  %v959_v44 = vmul.f32 %v3995_v45, %v943_v38  ;;  %v1611_v22 = vmul.f32 1.442695, %v4711_v1  ;;  %v948_v38 = vld [vmem:[#allocation4 + $0x30] sm:$0xff] }
 0x287   : > { %1866 = vperm.xlu1 %2779, %v4171_v61   ;;  %v4206_v50 = vpop.eup %2893  ;;  %2907 = vpow2.f32 %v1609_v28  ;;  %v961_v31 = vmul.f32 %v4031_v8, %v945_v13 }
 0x288   : > { %2909 = vpow2.f32 %v1599_v30 }
 0x289   : > { %2911 = vpow2.f32 %v1603_v2 }
 0x28a   : > { %2913 = vpow2.f32 %v1607_v9  ;;  %v964_v9 = vmul.f32 %v4015_v32, %v948_v38 }
 0x28b   : > { %1871 = vperm.xlu1 %2779, %v4184_v37   ;;  %v4208_v10 = vpop.eup %2895  ;;  %2915 = vpow2.f32 %v1611_v22  ;;  %v952_v22 = vld [vmem:[#allocation4 + $0x50] sm:$0xff] }
 0x28c   : > { %v4215_v63 = vpop.eup %2897 }
 0x28d   : > { %v4221_v58 = vpop.eup %2899 }
 0x28e   : > { %v4229_v49 = vpop.eup %2901 }
 0x28f   : > { %1876 = vperm.xlu1 %2779, %v4193_v35   ;;  %v4231_v52 = vpop.eup %2903 }
 0x290   : > { %v4241_v19 = vpop.eup %2905 }
 0x291   : > { %v4244_v54 = vpop.eup %2907 }
 0x292   : > { %v4254_v2 = vpop.eup %2909 }
 0x293   : > { %1881 = vperm.xlu1 %2779, %v4208_v10   ;;  %1861 = vperm.xlu0 %2780, %v4206_v50   ;;  %v4261_v8 = vpop.eup %2911 }
 0x297   : > { %1886 = vperm.xlu1 %2779, %v4215_v63   ;;  %1906 = vperm.xlu0 %2780, %v4221_v58  }
 0x299   : > { %v975_v20 = vpop.xlane.xlu0 %974 }
 0x29a   : > { %v1006_v12 = vadd.f32 %v975_v20, %v958_v51  ;;  %v962_v51 = vmul.f32 %v4004_v34, %v946_v36  ;;  %v947_v20 = vld [vmem:[#allocation4 + $0x28] sm:$0xff]  ;;  %v949_v34 = vld [vmem:[#allocation4 + $0x38] sm:$0xff] }
 0x29b   : > { %1891 = vperm.xlu1 %2779, %v4229_v49   ;;  %1916 = vperm.xlu0 %2780, %v4231_v52   ;;  %v963_v27 = vmul.f32 %v4040_v5, %v947_v20  ;;  %v953_v20 = vld [vmem:[#allocation4 + $0x58] sm:$0xff] }
 0x29c   : > { %1023 = vst.msk [vmem:[#allocation4] sm:$0xff] %vm1022_vm14, %v1006_v12  ;;  %v969_v38 = vmul.f32 %v4062_v40, %v953_v20  ;;  %v1042_v20 = vld [vmem:[#allocation2 + $0x18] sm:$0xff] }
 0x29e   : > { %v979_v28 = vpop.xlane.xlu0 %978 }
 0x29f   : > { %v1008_v41 = vadd.f32 %v979_v28, %v960_v25  ;;  %1896 = vperm.xlu1 %2779, %v4241_v19   ;;  %1926 = vperm.xlu0 %2780, %v4244_v54   ;;  %v977_v30 = vpop.xlane.xlu1 %976 }
 0x2a0   : > { %v1007_v16 = vadd.f32 %v977_v30, %v959_v44  ;;  %v950_v44 = vld [vmem:[#allocation4 + $0x40] sm:$0xff]  ;;  %v4268_v30 = vpop.eup %2913 }
 0x2a1   : > { %1025 = vst.msk [vmem:[#allocation4 + $0x10] sm:$0xff] %vm1022_vm14, %v1008_v41  ;;  %v965_v41 = vmul.f32 %v4049_v15, %v949_v34  ;;  %v966_v36 = vmul.f32 %v4024_v24, %v950_v44  ;;  %v956_v44 = vld [vmem:[#allocation4 + $0x70] sm:$0xff] }
 0x2a2   : > { %1024 = vst.msk [vmem:[#allocation4 + $0x8] sm:$0xff] %vm1022_vm14, %v1007_v16  ;;  %v981_v45 = vpop.xlane.xlu0 %980  ;;  %v972_v40 = vmul.f32 %v4051_v33, %v956_v44  ;;  %v1040_v33 = vld [vmem:[#allocation2 + $0x8] sm:$0xff] }
 0x2a3   : > { %v1009_v12 = vadd.f32 %v981_v45, %v961_v31  ;;  %1901 = vperm.xlu1 %2779, %v4254_v2   ;;  %v983_v7 = vpop.xlane.xlu1 %982  ;;  %v967_v31 = vmul.f32 %v4058_v21, %v951_v29  ;;  %v4275_v45 = vpop.eup %2915 }
 0x2a4   : > { %v1010_v0 = vadd.f32 %v983_v7, %v962_v51  ;;  %v968_v51 = vmul.f32 %v4033_v53, %v952_v22  ;;  %v1741_v22 = vld [vmem:[#allocation4] sm:$0xff] }
 0x2a5   : > { %1026 = vst.msk [vmem:[#allocation4 + $0x18] sm:$0xff] %vm1022_vm14, %v1009_v12 }
 0x2a6   : > { %1027 = vst.msk [vmem:[#allocation4 + $0x20] sm:$0xff] %vm1022_vm14, %v1010_v0  ;;  %v985_v4 = vpop.xlane.xlu0 %984 }
 0x2a7   : > { %v1011_v25 = vadd.f32 %v985_v4, %v963_v27  ;;  %1911 = vperm.xlu1 %2779, %v4261_v8   ;;  %v987_v28 = vpop.xlane.xlu1 %986  ;;  %v955_v27 = vld [vmem:[#allocation4 + $0x68] sm:$0xff]  ;;  %v954_v4 = vld [vmem:[#allocation4 + $0x60] sm:$0xff] }
 0x2a8   : > { %v1012_v13 = vadd.f32 %v987_v28, %v964_v9  ;;  %v971_v53 = vmul.f32 %v4065_v55, %v955_v27  ;;  %v970_v34 = vmul.f32 %v4042_v39, %v954_v4  ;;  %v1041_v55 = vld [vmem:[#allocation2 + $0x10] sm:$0xff]  ;;  %v1138_v27 = vmul.f32 %v4143_v26, %v1042_v20 }
 0x2a9   : > { %1028 = vst.msk [vmem:[#allocation4 + $0x28] sm:$0xff] %vm1022_vm14, %v1011_v25 }
 0x2aa   : > { %1029 = vst.msk [vmem:[#allocation4 + $0x30] sm:$0xff] %vm1022_vm14, %v1012_v13  ;;  %v989_v5 = vpop.xlane.xlu0 %988 }
 0x2ab   : > { %v1013_v32 = vadd.f32 %v989_v5, %v965_v41  ;;  %1921 = vperm.xlu1 %2779, %v4268_v30   ;;  %v991_v1 = vpop.xlane.xlu1 %990  ;;  %v957_v41 = vld [vmem:[#allocation4 + $0x78] sm:$0xff] }
 0x2ac   : > { %v1014_v16 = vadd.f32 %v991_v1, %v966_v36  ;;  %v1742_v36 = vld [vmem:[#allocation4 + $0x8] sm:$0xff] }
 0x2ad   : > { %1030 = vst.msk [vmem:[#allocation4 + $0x38] sm:$0xff] %vm1022_vm14, %v1013_v32  ;;  %v973_v32 = vmul.f32 %v4068_v47, %v957_v41  ;;  %v1758_v1 = vmul.f32 %v4206_v50, %v1742_v36  ;;  %v1757_v47 = vmul.f32 %v4158_v60, %v1741_v22  ;;  %v1043_v36 = vld [vmem:[#allocation2 + $0x20] sm:$0xff]  ;;  %v1044_v22 = vld [vmem:[#allocation2 + $0x28] sm:$0xff] }
 0x2ae   : > { %1031 = vst.msk [vmem:[#allocation4 + $0x40] sm:$0xff] %vm1022_vm14, %v1014_v16  ;;  %v993_v15 = vpop.xlane.xlu0 %992  ;;  %v1039_v16 = vld [vmem:[#allocation2] sm:$0xff] }
 0x2af   : > { %v1015_v24 = vadd.f32 %v993_v15, %v967_v31  ;;  %1931 = vperm.xlu1 %2779, %v4275_v45   ;;  %v995_v12 = vpop.xlane.xlu1 %994 }
 0x2b0   : > { %v1016_v7 = vadd.f32 %v995_v12, %v968_v51  ;;  %v1745_v51 = vld [vmem:[#allocation4 + $0x20] sm:$0xff]  ;;  %v1137_v12 = vmul.f32 %v4136_v14, %v1041_v55  ;;  %v1746_v20 = vld [vmem:[#allocation4 + $0x28] sm:$0xff] }
 0x2b1   : > { %1032 = vst.msk [vmem:[#allocation4 + $0x48] sm:$0xff] %vm1022_vm14, %v1015_v24 }
 0x2b2   : > { %1033 = vst.msk [vmem:[#allocation4 + $0x50] sm:$0xff] %vm1022_vm14, %v1016_v7  ;;  %v997_v21 = vpop.xlane.xlu0 %996  ;;  %v1135_v7 = vmul.f32 %v4131_v46, %v1039_v16 }
 0x2b3   : > { %v1017_v0 = vadd.f32 %v997_v21, %v969_v38  ;;  %v1761_v21 = vmul.f32 %v4193_v35, %v1745_v51 }
 0x2b5   : > { %1034 = vst.msk [vmem:[#allocation4 + $0x58] sm:$0xff] %vm1022_vm14, %v1017_v0  ;;  %v1743_v0 = vld [vmem:[#allocation4 + $0x10] sm:$0xff]  ;;  %v1749_v55 = vld [vmem:[#allocation4 + $0x40] sm:$0xff] }
 0x2b6   : > { %v1759_v35 = vmul.f32 %v4171_v61, %v1743_v0  ;;  %v1765_v51 = vmul.f32 %v4241_v19, %v1749_v55  ;;  %v1762_v19 = vmul.f32 %v4208_v10, %v1746_v20 }
 0x2de   : > { %v1001_v9 = vpop.xlane.xlu0 %1000 }
 0x2df   : > { %v1019_v25 = vadd.f32 %v1001_v9, %v971_v53  ;;  %v999_v28 = vpop.xlane.xlu1 %998 }
 0x2e0   : > { %v1018_v13 = vadd.f32 %v999_v28, %v970_v34  ;;  %v1747_v34 = vld [vmem:[#allocation4 + $0x30] sm:$0xff] }
 0x2e1   : > { %1036 = vst.msk [vmem:[#allocation4 + $0x68] sm:$0xff] %vm1022_vm14, %v1019_v25  ;;  %v1136_v25 = vmul.f32 %v4134_v59, %v1040_v33  ;;  %v1763_v59 = vmul.f32 %v4215_v63, %v1747_v34  ;;  %v1139_v63 = vmul.f32 %v4141_v42, %v1043_v36 }
 0x2e2   : > { %1035 = vst.msk [vmem:[#allocation4 + $0x60] sm:$0xff] %vm1022_vm14, %v1018_v13 }
 0x2e3   : > { %v1003_v5 = vpop.xlane.xlu1 %1002 }
 0x2e4   : > { %v1020_v29 = vadd.f32 %v1003_v5, %v972_v40  ;;  %v1045_v40 = vld [vmem:[#allocation2 + $0x30] sm:$0xff]  ;;  %v1744_v5 = vld [vmem:[#allocation4 + $0x18] sm:$0xff] }
 0x2e5   : > { %v1760_v16 = vmul.f32 %v4184_v37, %v1744_v5 }
 0x2e6   : > { %1037 = vst.msk [vmem:[#allocation4 + $0x70] sm:$0xff] %vm1022_vm14, %v1020_v29  ;;  %v1005_v39 = vpop.xlane.xlu0 %1004 }
 0x2e7   : > { %v1021_v31 = vadd.f32 %v1005_v39, %v973_v32  ;;  %v1776_v15 = vpop.xlane.xlu1 %1775  ;;  %v1046_v39 = vld [vmem:[#allocation2 + $0x38] sm:$0xff] }
 0x2e8   : > { %v1806_v24 = vadd.f32 %v1776_v15, %v1758_v1  ;;  %v1141_v1 = vmul.f32 %v4151_v18, %v1045_v40 }
 0x2e9   : > { %1038 = vst.msk [vmem:[#allocation4 + $0x78] sm:$0xff] %vm1022_vm14, %v1021_v31  ;;  %v2660_v38 = vpop.f32.mrb[0].mxu0 }
 0x2ea   : > { %1823 = vst.msk [vmem:[#allocation4 + $0x8] sm:$0xff] %vm1821_vm12, %v1806_v24  ;;  %v1774_v50 = vpop.xlane.xlu0 %1773  ;;  %v1306_v4 = vadd.f32 %v2660_v38, %v1137_v12  ;;  %v1241_v53 = vpop.f32.mrb[1].mxu0  ;;  %v1142_v24 = vmul.f32 %v4165_v62, %v1046_v39  ;;  %v1140_v38 = vmul.f32 %v4153_v3, %v1044_v22 }
 0x2eb   : > { %v1805_v9 = vadd.f32 %v1774_v50, %v1757_v47  ;;  %v1782_v14 = vpop.xlane.xlu1 %1781  ;;  %v1304_v60 = vadd.f32 %v1241_v53, %v1135_v7  ;;  %v2661_v46 = vpop.f32.mrb[2].mxu0  ;;  %v1751_v7 = vld [vmem:[#allocation4 + $0x50] sm:$0xff]  ;;  %v1748_v53 = vld [vmem:[#allocation4 + $0x38] sm:$0xff] }
 0x2ec   : > { %v1809_v28 = vadd.f32 %v1782_v14, %v1761_v21  ;;  %1323 = vst.msk [vmem:[#allocation2 + $0x10] sm:$0xff] %vm1320_vm3, %v1306_v4  ;;  %v1307_v44 = vadd.f32 %v2661_v46, %v1138_v27  ;;  %v1244_v13 = vpop.f32.mrb[3].mxu0  ;;  %v1049_v27 = vld [vmem:[#allocation2 + $0x50] sm:$0xff]  ;;  %v1767_v3 = vmul.f32 %v4221_v58, %v1751_v7  ;;  %v1048_v46 = vld [vmem:[#allocation2 + $0x48] sm:$0xff] }
 0x2ed   : > { %1822 = vst.msk [vmem:[#allocation4] sm:$0xff] %vm1821_vm12, %v1805_v9  ;;  %v1305_v26 = vadd.f32 %v1244_v13, %v1136_v25  ;;  %v1047_v9 = vld [vmem:[#allocation2 + $0x40] sm:$0xff] }
 0x2ee   : > { %1321 = vst.msk [vmem:[#allocation2] sm:$0xff] %vm1320_vm3, %v1304_v60  ;;  %v1778_v41 = vpop.xlane.xlu0 %1777  ;;  %1324 = vst.msk [vmem:[#allocation2 + $0x18] sm:$0xff] %vm1320_vm3, %v1307_v44  ;;  %v1753_v25 = vld [vmem:[#allocation4 + $0x60] sm:$0xff]  ;;  %v1050_v60 = vld [vmem:[#allocation2 + $0x58] sm:$0xff]  ;;  %v1764_v44 = vmul.f32 %v4229_v49, %v1748_v53  ;;  %v1143_v58 = vmul.f32 %v4163_v57, %v1047_v9 }
 0x2ef   : > { %1826 = vst.msk [vmem:[#allocation4 + $0x20] sm:$0xff] %vm1821_vm12, %v1809_v28  ;;  %v1807_v29 = vadd.f32 %v1778_v41, %v1759_v35  ;;  %v1786_v32 = vpop.xlane.xlu1 %1785  ;;  %v1145_v28 = vmul.f32 %v4180_v6, %v1049_v27  ;;  %v1769_v40 = vmul.f32 %v4231_v52, %v1753_v25  ;;  %v1146_v41 = vmul.f32 %v4200_v56, %v1050_v60  ;;  %v1054_v25 = vld [vmem:[#allocation2 + $0x78] sm:$0xff] }
 0x2f0   : > { %1322 = vst.msk [vmem:[#allocation2 + $0x8] sm:$0xff] %vm1320_vm3, %v1305_v26  ;;  %v1811_v61 = vadd.f32 %v1786_v32, %v1763_v59  ;;  %v1750_v26 = vld [vmem:[#allocation4 + $0x48] sm:$0xff]  ;;  %v1144_v32 = vmul.f32 %v4182_v17, %v1048_v46  ;;  %v1752_v17 = vld [vmem:[#allocation4 + $0x58] sm:$0xff] }
 0x2f1   : > { %1824 = vst.msk [vmem:[#allocation4 + $0x10] sm:$0xff] %vm1821_vm12, %v1807_v29  ;;  %v2664_v31 = vpop.f32.mrb[4].mxu0  ;;  %v1755_v29 = vld [vmem:[#allocation4 + $0x70] sm:$0xff]  ;;  %v1766_v52 = vmul.f32 %v4254_v2, %v1750_v26  ;;  %v1768_v2 = vmul.f32 %v4261_v8, %v1752_v17 }
 0x2f2   : > { %1828 = vst.msk [vmem:[#allocation4 + $0x30] sm:$0xff] %vm1821_vm12, %v1811_v61  ;;  %v1780_v15 = vpop.xlane.xlu0 %1779  ;;  %v1310_v33 = vadd.f32 %v2664_v31, %v1141_v1  ;;  %v1257_v12 = vpop.f32.mrb[5].mxu0  ;;  %v1771_v22 = vmul.f32 %v4244_v54, %v1755_v29 }
 0x2f3   : > { %v1808_v47 = vadd.f32 %v1780_v15, %v1760_v16  ;;  %v1790_v18 = vpop.xlane.xlu1 %1789  ;;  %v1308_v50 = vadd.f32 %v1257_v12, %v1139_v63  ;;  %v2665_v21 = vpop.f32.mrb[6].mxu0 }
 0x2f4   : > { %v1813_v37 = vadd.f32 %v1790_v18, %v1765_v51  ;;  %1327 = vst.msk [vmem:[#allocation2 + $0x30] sm:$0xff] %vm1320_vm3, %v1310_v33  ;;  %v1311_v42 = vadd.f32 %v2665_v21, %v1142_v24  ;;  %v1260_v0 = vpop.f32.mrb[7].mxu0  ;;  %v1754_v51 = vld [vmem:[#allocation4 + $0x68] sm:$0xff]  ;;  %v1756_v33 = vld [vmem:[#allocation4 + $0x78] sm:$0xff] }
 0x2f5   : > { %1825 = vst.msk [vmem:[#allocation4 + $0x18] sm:$0xff] %vm1821_vm12, %v1808_v47  ;;  %v1309_v62 = vadd.f32 %v1260_v0, %v1140_v38  ;;  %v1770_v54 = vmul.f32 %v4268_v30, %v1754_v51  ;;  %v1772_v47 = vmul.f32 %v4275_v45, %v1756_v33 }
 0x2f6   : > { %1325 = vst.msk [vmem:[#allocation2 + $0x20] sm:$0xff] %vm1320_vm3, %v1308_v50  ;;  %v1784_v4 = vpop.xlane.xlu0 %1783  ;;  %1328 = vst.msk [vmem:[#allocation2 + $0x38] sm:$0xff] %vm1320_vm3, %v1311_v42 }
 0x2f7   : > { %1830 = vst.msk [vmem:[#allocation4 + $0x40] sm:$0xff] %vm1821_vm12, %v1813_v37  ;;  %v1810_v14 = vadd.f32 %v1784_v4, %v1762_v19  ;;  %v1794_v34 = vpop.xlane.xlu1 %1793 }
 0x2f8   : > { %1326 = vst.msk [vmem:[#allocation2 + $0x28] sm:$0xff] %vm1320_vm3, %v1309_v62  ;;  %v1815_v10 = vadd.f32 %v1794_v34, %v1767_v3  ;;  %v1051_v34 = vld [vmem:[#allocation2 + $0x60] sm:$0xff] }
 0x2f9   : > { %1827 = vst.msk [vmem:[#allocation4 + $0x28] sm:$0xff] %vm1821_vm12, %v1810_v14  ;;  %v1053_v14 = vld [vmem:[#allocation2 + $0x70] sm:$0xff] }
 0x2fa   : > { %1832 = vst.msk [vmem:[#allocation4 + $0x50] sm:$0xff] %vm1821_vm12, %v1815_v10  ;;  %v2668_v13 = vpop.f32.mrb[8].mxu0  ;;  %v1788_v35 = vpop.xlane.xlu0 %1787  ;;  %v1149_v60 = vmul.f32 %v4217_v23, %v1053_v14  ;;  %v1052_v10 = vld [vmem:[#allocation2 + $0x68] sm:$0xff] }
 0x2fb   : > { %v1314_v59 = vadd.f32 %v2668_v13, %v1145_v28  ;;  %v1273_v5 = vpop.f32.mrb[9].mxu0  ;;  %v1812_v36 = vadd.f32 %v1788_v35, %v1764_v44  ;;  %v1798_v6 = vpop.xlane.xlu1 %1797  ;;  %v1147_v28 = vmul.f32 %v4198_v43, %v1051_v34  ;;  %v1150_v44 = vmul.f32 %v4233_v48, %v1054_v25 }
 0x2fc   : > { %v1312_v55 = vadd.f32 %v1273_v5, %v1143_v58  ;;  %v1817_v49 = vadd.f32 %v1798_v6, %v1769_v40  ;;  %v2669_v39 = vpop.f32.mrb[10].mxu0  ;;  %v1148_v35 = vmul.f32 %v4219_v11, %v1052_v10 }
 0x2fd   : > { %1331 = vst.msk [vmem:[#allocation2 + $0x50] sm:$0xff] %vm1320_vm3, %v1314_v59  ;;  %v1315_v57 = vadd.f32 %v2669_v39, %v1146_v41  ;;  %v1276_v61 = vpop.f32.mrb[11].mxu0 }
 0x2fe   : > { %1829 = vst.msk [vmem:[#allocation4 + $0x38] sm:$0xff] %vm1821_vm12, %v1812_v36  ;;  %1834 = vst.msk [vmem:[#allocation4 + $0x60] sm:$0xff] %vm1821_vm12, %v1817_v49  ;;  %v1313_v56 = vadd.f32 %v1276_v61, %v1144_v32  ;;  %v1792_v1 = vpop.xlane.xlu0 %1791 }
 0x2ff   : > { %1329 = vst.msk [vmem:[#allocation2 + $0x40] sm:$0xff] %vm1320_vm3, %v1312_v55  ;;  %1332 = vst.msk [vmem:[#allocation2 + $0x58] sm:$0xff] %vm1320_vm3, %v1315_v57  ;;  %v1814_v16 = vadd.f32 %v1792_v1, %v1766_v52  ;;  %v1802_v63 = vpop.xlane.xlu1 %1801  ;;  %v1840_v1 = vld [vmem:[#allocation2 + $0x10] sm:$0xff] }
 0x300   : > { %1330 = vst.msk [vmem:[#allocation2 + $0x48] sm:$0xff] %vm1320_vm3, %v1313_v56  ;;  %v1819_v31 = vadd.f32 %v1802_v63, %v1771_v22 }
 0x301   : > { %1831 = vst.msk [vmem:[#allocation4 + $0x48] sm:$0xff] %vm1821_vm12, %v1814_v16  ;;  %v1841_v16 = vld [vmem:[#allocation2 + $0x18] sm:$0xff] }
 0x302   : > { %1836 = vst.msk [vmem:[#allocation4 + $0x70] sm:$0xff] %vm1821_vm12, %v1819_v31  ;;  %v1796_v15 = vpop.xlane.xlu0 %1795 }
 0x303   : > { %v1816_v20 = vadd.f32 %v1796_v15, %v1768_v2  ;;  %v1857_v43 = vpop.permute.xlu1 %1856  ;;  %v1838_v15 = vld [vmem:[#allocation2] sm:$0xff] }
 0x305   : > { %1833 = vst.msk [vmem:[#allocation4 + $0x58] sm:$0xff] %vm1821_vm12, %v1816_v20  ;;  %v1934_v20 = vmul.f32 %v1857_v43, %v1838_v15  ;;  %v2200_v15 = vld [vmem:[#allocation4 + $0x20] sm:$0xff] (!%p2606_p0) }
 0x306   : > { %v1800_v24 = vpop.xlane.xlu0 %1799  ;;  %v1849_v25 = vld [vmem:[#allocation2 + $0x58] sm:$0xff] }
 0x307   : > { %v1818_v12 = vadd.f32 %v1800_v24, %v1770_v54  ;;  %v1867_v23 = vpop.permute.xlu1 %1866  ;;  %v1839_v24 = vld [vmem:[#allocation2 + $0x8] sm:$0xff] }
 0x308   : > { %v1936_v17 = vmul.f32 %v1867_v23, %v1840_v1 }
 0x309   : > { %1835 = vst.msk [vmem:[#allocation4 + $0x68] sm:$0xff] %vm1821_vm12, %v1818_v12 }
 0x30a   : > { %v2692_v18 = vpop.f32.mrb[0].mxu1  ;;  %v1804_v7 = vpop.xlane.xlu0 %1803 }
 0x30b   : > { %v2016_v38 = vpop.f32.mrb[1].mxu1  ;;  %2099 = vrot.lane.b32.xlu0 %v2692_v18, %s3014_s24  ;;  %v1820_v8 = vadd.f32 %v1804_v7, %v1772_v47  ;;  %v1872_v48 = vpop.permute.xlu1 %1871  ;;  %v1844_v18 = vld [vmem:[#allocation2 + $0x30] sm:$0xff] }
 0x30c   : > { %v2693_v50 = vpop.f32.mrb[2].mxu1  ;;  %v1937_v31 = vmul.f32 %v1872_v48, %v1841_v16 }
 0x30d   : > { %1837 = vst.msk [vmem:[#allocation4 + $0x78] sm:$0xff] %vm1821_vm12, %v1820_v8  ;;  %v2019_v37 = vpop.f32.mrb[3].mxu1  ;;  %2101 = vrot.lane.b32.xlu1 %v2693_v50, %s3014_s24  ;;  %v1845_v50 = vld [vmem:[#allocation2 + $0x38] sm:$0xff] }
 0x30f   : > { %2095 = vrot.lane.b32.xlu0 %v2016_v38, %s3014_s24  ;;  %v1877_v36 = vpop.permute.xlu1 %1876 }
 0x311   : > { %2097 = vrot.lane.b32.xlu1 %v2019_v37, %s3014_s24 }
 0x312   : > { %v2696_v30 = vpop.f32.mrb[4].mxu1  ;;  %v1862_v55 = vpop.permute.xlu0 %1861 }
 0x313   : > { %v2032_v21 = vpop.f32.mrb[5].mxu1  ;;  %2107 = vrot.lane.b32.xlu0 %v2696_v30, %s3014_s24  ;;  %v1882_v6 = vpop.permute.xlu1 %1881  ;;  %v1935_v12 = vmul.f32 %v1862_v55, %v1839_v24 }
 0x314   : > { %v2697_v45 = vpop.f32.mrb[6].mxu1 }
 0x315   : > { %v2035_v42 = vpop.f32.mrb[7].mxu1  ;;  %2109 = vrot.lane.b32.xlu1 %v2697_v45, %s3014_s24  ;;  %v1842_v45 = vld [vmem:[#allocation2 + $0x20] sm:$0xff] }
 0x316   : > { %v1907_v39 = vpop.permute.xlu0 %1906 }
 0x317   : > { %2103 = vrot.lane.b32.xlu0 %v2032_v21, %s3014_s24  ;;  %v1887_v29 = vpop.permute.xlu1 %1886 }
 0x318   : > { %v1940_v38 = vmul.f32 %v1887_v29, %v1844_v18 }
 0x319   : > { %2105 = vrot.lane.b32.xlu1 %v2035_v42, %s3014_s24 }
 0x31a   : > { %v2700_v0 = vpop.f32.mrb[8].mxu1  ;;  %v4372_v61 = vpop.permute.xlu0 %1916 }
 0x31b   : > { %v2048_v19 = vpop.f32.mrb[9].mxu1  ;;  %2115 = vrot.lane.b32.xlu0 %v2700_v0, %s3014_s24  ;;  %v1892_v11 = vpop.permute.xlu1 %1891  ;;  %v1938_v0 = vmul.f32 %v1877_v36, %v1842_v45 }
 0x31c   : > { %v2701_v27 = vpop.f32.mrb[10].mxu1  ;;  %v1941_v30 = vmul.f32 %v1892_v11, %v1845_v50 }
 0x31d   : > { %v2051_v62 = vpop.f32.mrb[11].mxu1  ;;  %2117 = vrot.lane.b32.xlu1 %v2701_v27, %s3014_s24  ;;  %v1843_v27 = vld [vmem:[#allocation2 + $0x28] sm:$0xff] }
 0x31e   : > { %v4376_v56 = vpop.permute.xlu0 %1926 }
 0x31f   : > { %2111 = vrot.lane.b32.xlu0 %v2048_v19, %s3014_s24  ;;  %v1897_v32 = vpop.permute.xlu1 %1896 }
 0x321   : > { %2113 = vrot.lane.b32.xlu1 %v2051_v62, %s3014_s24 }
 0x322   : > { %v2704_v4 = vpop.f32.mrb[12].mxu1 }
 0x323   : > { %v2064_v3 = vpop.f32.mrb[13].mxu1  ;;  %v1902_v49 = vpop.permute.xlu1 %1901 }
 0x324   : > { %v2705_v53 = vpop.f32.mrb[14].mxu1  ;;  %2119 = vrot.lane.b32.xlu0 %v2064_v3, %s3014_s24 }
 0x325   : > { %v2067_v9 = vpop.f32.mrb[15].mxu1 }
 0x326   : > { %2121 = vrot.lane.b32.xlu1 %v2067_v9, %s3014_s24 }
 0x327   : > { %v1912_v57 = vpop.permute.xlu1 %1911 }
 0x328   : > { %2123 = vrot.lane.b32.xlu0 %v2704_v4, %s3014_s24  ;;  %v1939_v4 = vmul.f32 %v1882_v6, %v1843_v27  ;;  %v1945_v10 = vmul.f32 %v1912_v57, %v1849_v25 }
 0x32a   : > { %2125 = vrot.lane.b32.xlu1 %v2705_v53, %s3014_s24  ;;  %v1848_v53 = vld [vmem:[#allocation2 + $0x50] sm:$0xff] }
 0x32b   : > { %v4374_v52 = vpop.permute.xlu1 %1921  ;;  %v1944_v14 = vmul.f32 %v1907_v39, %v1848_v53 }
 0x32e   : > { %v2672_v46 = vpop.f32.mrb[12].mxu0 }
 0x32f   : > { %v1318_v58 = vadd.f32 %v2672_v46, %v1149_v60  ;;  %v1289_v13 = vpop.f32.mrb[13].mxu0  ;;  %v4378_v22 = vpop.permute.xlu1 %1931  ;;  %v1846_v46 = vld [vmem:[#allocation2 + $0x40] sm:$0xff] }
 0x330   : > { %v1316_v40 = vadd.f32 %v1289_v13, %v1147_v28  ;;  %v2673_v26 = vpop.f32.mrb[14].mxu0 }
 0x331   : > { %1335 = vst.msk [vmem:[#allocation2 + $0x70] sm:$0xff] %vm1320_vm3, %v1318_v58  ;;  %v1319_v41 = vadd.f32 %v2673_v26, %v1150_v44  ;;  %v1292_v59 = vpop.f32.mrb[15].mxu0  ;;  %v1942_v58 = vmul.f32 %v1897_v32, %v1846_v46 }
 0x332   : > { %1333 = vst.msk [vmem:[#allocation2 + $0x60] sm:$0xff] %vm1320_vm3, %v1316_v40  ;;  %v1317_v5 = vadd.f32 %v1292_v59, %v1148_v35  ;;  %v1847_v35 = vld [vmem:[#allocation2 + $0x48] sm:$0xff] }
 0x333   : > { %1336 = vst.msk [vmem:[#allocation2 + $0x78] sm:$0xff] %vm1320_vm3, %v1319_v41  ;;  %v1943_v26 = vmul.f32 %v1902_v49, %v1847_v35 }
 0x334   : > { %1334 = vst.msk [vmem:[#allocation2 + $0x68] sm:$0xff] %vm1320_vm3, %v1317_v5 }
 0x338   : > { %v1852_v6 = vld [vmem:[#allocation2 + $0x70] sm:$0xff] }
 0x339   : > { %v1850_v59 = vld [vmem:[#allocation2 + $0x60] sm:$0xff]  ;;  %v1948_v39 = vmul.f32 %v4376_v56, %v1852_v6  ;;  %v2197_v56 = vld [vmem:[#allocation4 + $0x8] sm:$0xff] (!%p2606_p0) }
 0x33a   : > { %v1946_v48 = vmul.f32 %v4372_v61, %v1850_v59  ;;  %v1853_v55 = vld [vmem:[#allocation2 + $0x78] sm:$0xff] }
 0x33b   : > { %v1851_v23 = vld [vmem:[#allocation2 + $0x68] sm:$0xff]  ;;  %v1949_v61 = vmul.f32 %v4378_v22, %v1853_v55 }
 0x33c   : > { %v1947_v11 = vmul.f32 %v4374_v52, %v1851_v23  ;;  %v2198_v52 = vld [vmem:[#allocation4 + $0x10] sm:$0xff] (!%p2606_p0)  ;;  %v2201_v22 = vld [vmem:[#allocation4 + $0x28] sm:$0xff] (!%p2606_p0) }
 0x33d   : > { %2921 = vrcp.f32 (!%p2606_p0), %v2198_v52 }
 0x37d   : > { %v2100_v63 = vpop.permute.xlu0 %2099 }
 0x37e   : > { %v2145_v2 = vadd.f32 %v2100_v63, %v1936_v17  ;;  %v2196_v63 = vld [vmem:[#allocation4] sm:$0xff] (!%p2606_p0) }
 0x37f   : > { %v2102_v51 = vpop.permute.xlu1 %2101  ;;  %2923 = vrcp.f32 (!%p2606_p0), %v2196_v63 }
 0x380   : > { %2162 = vst.msk [vmem:[#allocation2 + $0x10] sm:$0xff] %vm2159_vm4, %v2145_v2  ;;  %v2146_v54 = vadd.f32 %v2102_v51, %v1937_v31  ;;  %v2199_v31 = vld [vmem:[#allocation4 + $0x18] sm:$0xff] (!%p2606_p0)  ;;  %v3015_v2 = vmov (!%p2606_p0), 0  }
 0x381   : > { %v2096_v33 = vpop.permute.xlu0 %2095  ;;  %2918 = vset.pattern.permute.xlu1 (!%p2606_p0), %v3015_v2  ;;  %2917 = vset.pattern.permute.xlu0 (!%p2606_p0), %v3015_v2  ;;  %2925 = vrcp.f32 (!%p2606_p0), %v2199_v31  ;;  %v2203_v51 = vld [vmem:[#allocation4 + $0x38] sm:$0xff] (!%p2606_p0) }
 0x382   : > { %2163 = vst.msk [vmem:[#allocation2 + $0x18] sm:$0xff] %vm2159_vm4, %v2146_v54  ;;  %v2143_v47 = vadd.f32 %v2096_v33, %v1934_v20  ;;  %2927 = vrcp.f32 (!%p2606_p0), %v2197_v56  ;;  %v2202_v20 = vld [vmem:[#allocation4 + $0x30] sm:$0xff] (!%p2606_p0)  ;;  %v2922_v54 = vpop.eup (!%p2606_p0), %2921  ;;  %v2205_v33 = vld [vmem:[#allocation4 + $0x48] sm:$0xff] (!%p2606_p0) }
 0x383   : > { %v2098_v7 = vpop.permute.xlu1 %2097  ;;  %2929 = vrcp.f32 (!%p2606_p0), %v2201_v22  ;;  %2256 = vperm.xlu1 (!%p2606_p0), %2918, %v2922_v54  }
 0x384   : > { %2160 = vst.msk [vmem:[#allocation2] sm:$0xff] %vm2159_vm4, %v2143_v47  ;;  %v2144_v8 = vadd.f32 %v2098_v7, %v1935_v12  ;;  %2931 = vrcp.f32 (!%p2606_p0), %v2200_v15  ;;  %v2204_v47 = vld [vmem:[#allocation4 + $0x40] sm:$0xff] (!%p2606_p0)  ;;  %v2207_v7 = vld [vmem:[#allocation4 + $0x58] sm:$0xff] (!%p2606_p0) }
 0x385   : > { %v2108_v37 = vpop.permute.xlu0 %2107  ;;  %2933 = vrcp.f32 (!%p2606_p0), %v2203_v51 }
 0x386   : > { %2161 = vst.msk [vmem:[#allocation2 + $0x8] sm:$0xff] %vm2159_vm4, %v2144_v8  ;;  %v2149_v21 = vadd.f32 %v2108_v37, %v1940_v38  ;;  %2935 = vrcp.f32 (!%p2606_p0), %v2202_v20  ;;  %v2206_v8 = vld [vmem:[#allocation4 + $0x50] sm:$0xff] (!%p2606_p0)  ;;  %v2209_v37 = vld [vmem:[#allocation4 + $0x68] sm:$0xff] (!%p2606_p0) }
 0x387   : > { %v2110_v42 = vpop.permute.xlu1 %2109  ;;  %2937 = vrcp.f32 (!%p2606_p0), %v2205_v33  ;;  %v4401_v25 = vld [vmem:[#allocation2 + $0x10] sm:$0xff] (!%p2606_p0) }
 0x388   : > { %2166 = vst.msk [vmem:[#allocation2 + $0x30] sm:$0xff] %vm2159_vm4, %v2149_v21  ;;  %v2150_v19 = vadd.f32 %v2110_v42, %v1941_v30  ;;  %2939 = vrcp.f32 (!%p2606_p0), %v2204_v47  ;;  %v2208_v21 = vld [vmem:[#allocation4 + $0x60] sm:$0xff] (!%p2606_p0)  ;;  %v2211_v42 = vld [vmem:[#allocation4 + $0x78] sm:$0xff] (!%p2606_p0) }
 0x389   : > { %v2104_v62 = vpop.permute.xlu0 %2103  ;;  %v2924_v24 = vpop.eup (!%p2606_p0), %2923  ;;  %2941 = vrcp.f32 (!%p2606_p0), %v2207_v7 }
 0x38a   : > { %2167 = vst.msk [vmem:[#allocation2 + $0x38] sm:$0xff] %vm2159_vm4, %v2150_v19  ;;  %v2147_v3 = vadd.f32 %v2104_v62, %v1938_v0  ;;  %2246 = vperm.xlu0 (!%p2606_p0), %2917, %v2924_v24   ;;  %2943 = vrcp.f32 (!%p2606_p0), %v2206_v8  ;;  %v2210_v19 = vld [vmem:[#allocation4 + $0x70] sm:$0xff] (!%p2606_p0) }
 0x38b   : > { %v2106_v9 = vpop.permute.xlu1 %2105  ;;  %v2926_v12 = vpop.eup (!%p2606_p0), %2925  ;;  %2945 = vrcp.f32 (!%p2606_p0), %v2209_v37 }
 0x38c   : > { %2164 = vst.msk [vmem:[#allocation2 + $0x20] sm:$0xff] %vm2159_vm4, %v2147_v3  ;;  %v2148_v34 = vadd.f32 %v2106_v9, %v1939_v4  ;;  %v2928_v18 = vpop.eup (!%p2606_p0), %2927  ;;  %2261 = vperm.xlu1 (!%p2606_p0), %2918, %v2926_v12   ;;  %2947 = vrcp.f32 (!%p2606_p0), %v2208_v21 }
 0x38d   : > { %v2116_v60 = vpop.permute.xlu0 %2115  ;;  %v2930_v38 = vpop.eup (!%p2606_p0), %2929  ;;  %2949 = vrcp.f32 (!%p2606_p0), %v2211_v42 }
 0x38e   : > { %2165 = vst.msk [vmem:[#allocation2 + $0x28] sm:$0xff] %vm2159_vm4, %v2148_v34  ;;  %v2153_v28 = vadd.f32 %v2116_v60, %v1944_v14  ;;  %2251 = vperm.xlu0 (!%p2606_p0), %2917, %v2928_v18   ;;  %v2932_v50 = vpop.eup (!%p2606_p0), %2931  ;;  %2951 = vrcp.f32 (!%p2606_p0), %v2210_v19  ;;  %v3016_v34 = vmov (!%p2606_p0), 1   ;;  %v4403_v60 = vld [vmem:[#allocation2] sm:$0xff] (!%p2606_p0) }
 0x38f   : > { %v2118_v44 = vpop.permute.xlu1 %2117  ;;  %v2934_v30 = vpop.eup (!%p2606_p0), %2933 }
 0x390   : > { %2170 = vst.msk [vmem:[#allocation2 + $0x50] sm:$0xff] %vm2159_vm4, %v2153_v28  ;;  %v2154_v13 = vadd.f32 %v2118_v44, %v1945_v10  ;;  %2271 = vperm.xlu1 (!%p2606_p0), %2918, %v2930_v38   ;;  %v2936_v45 = vpop.eup (!%p2606_p0), %2935 }
 0x391   : > { %v2112_v40 = vpop.permute.xlu0 %2111  ;;  %v2938_v0 = vpop.eup (!%p2606_p0), %2937  ;;  %v4421_v6 = vld [vmem:[#allocation2 + $0x38] sm:$0xff] (!%p2606_p0) }
 0x392   : > { %2171 = vst.msk [vmem:[#allocation2 + $0x58] sm:$0xff] %vm2159_vm4, %v2154_v13  ;;  %v2151_v41 = vadd.f32 %v2112_v40, %v1942_v58  ;;  %2266 = vperm.xlu0 (!%p2606_p0), %2917, %v2932_v50   ;;  %v2940_v27 = vpop.eup (!%p2606_p0), %2939  ;;  %v4407_v58 = vld [vmem:[#allocation2 + $0x18] sm:$0xff] (!%p2606_p0)  ;;  %v2229_v13 = vld [vmem:[#allocation2 + $0x8] sm:$0xff] (!%p2606_p0) }
 0x393   : > { %v2114_v5 = vpop.permute.xlu1 %2113  ;;  %v2942_v62 = vpop.eup (!%p2606_p0), %2941 }
 0x394   : > { %2168 = vst.msk [vmem:[#allocation2 + $0x40] sm:$0xff] %vm2159_vm4, %v2151_v41  ;;  %v2152_v43 = vadd.f32 %v2114_v5, %v1943_v26  ;;  %2281 = vperm.xlu1 (!%p2606_p0), %2918, %v2934_v30   ;;  %v2944_v4 = vpop.eup (!%p2606_p0), %2943  ;;  %v2232_v5 = vld [vmem:[#allocation2 + $0x20] sm:$0xff] (!%p2606_p0) }
 0x395   : > { %v2946_v3 = vpop.eup (!%p2606_p0), %2945  ;;  %v4414_v59 = vld [vmem:[#allocation2 + $0x28] sm:$0xff] (!%p2606_p0) }
 0x396   : > { %2169 = vst.msk [vmem:[#allocation2 + $0x48] sm:$0xff] %vm2159_vm4, %v2152_v43  ;;  %v2120_v36 = vpop.permute.xlu0 %2119  ;;  %2276 = vperm.xlu0 (!%p2606_p0), %2917, %v2936_v45   ;;  %v2948_v53 = vpop.eup (!%p2606_p0), %2947 }
 0x397   : > { %v2155_v29 = vadd.f32 %v2120_v36, %v1946_v48  ;;  %v2950_v9 = vpop.eup (!%p2606_p0), %2949  ;;  %v2238_v63 = vld [vmem:[#allocation2 + $0x50] sm:$0xff] (!%p2606_p0) }
 0x398   : > { %v2122_v32 = vpop.permute.xlu1 %2121  ;;  %2291 = vperm.xlu1 (!%p2606_p0), %2918, %v2938_v0   ;;  %v2952_v14 = vpop.eup (!%p2606_p0), %2951 }
 0x399   : > { %2172 = vst.msk [vmem:[#allocation2 + $0x60] sm:$0xff] %vm2159_vm4, %v2155_v29  ;;  %v2156_v49 = vadd.f32 %v2122_v32, %v1947_v11  ;;  %2195 = sbr.rel (%p2606_p0) target bundleno = 1098 (0x44a), region = 82  ;;  %v2234_v29 = vld [vmem:[#allocation2 + $0x30] sm:$0xff] (!%p2606_p0)  ;;  %v2239_v52 = vld [vmem:[#allocation2 + $0x58] sm:$0xff] (!%p2606_p0) }
 0x39a   : > { %v2124_v57 = vpop.permute.xlu0 %2123  ;;  %2286 = vperm.xlu0 (!%p2606_p0), %2917, %v2940_v27  }
 0x39b   : > { %2173 = vst.msk [vmem:[#allocation2 + $0x68] sm:$0xff] %vm2159_vm4, %v2156_v49  ;;  %v2157_v1 = vadd.f32 %v2124_v57, %v1948_v39  ;;  %v2236_v57 = vld [vmem:[#allocation2 + $0x40] sm:$0xff] (!%p2606_p0) }
 0x39c   : > { %v2126_v17 = vpop.permute.xlu1 %2125  ;;  %2301 = vperm.xlu1 (!%p2606_p0), %2918, %v2942_v62  }
 0x39d   : > { %2174 = vst.msk [vmem:[#allocation2 + $0x70] sm:$0xff] %vm2159_vm4, %v2157_v1  ;;  %v2158_v16 = vadd.f32 %v2126_v17, %v1949_v61  ;;  %v2237_v39 = vld [vmem:[#allocation2 + $0x48] sm:$0xff] (!%p2606_p0) }
 0x39e   : > { %2296 = vperm.xlu0 (!%p2606_p0), %2917, %v2944_v4  }
 0x39f   : > { %2175 = vst.msk [vmem:[#allocation2 + $0x78] sm:$0xff] %vm2159_vm4, %v2158_v16 }
 0x3a0   : > { %2311 = vperm.xlu1 %2918, %v2946_v3   ;;  %v2240_v51 = vld [vmem:[#allocation2 + $0x60] sm:$0xff] }
 0x3a2   : > { %2306 = vperm.xlu0 %2917, %v2948_v53   ;;  %v2241_v15 = vld [vmem:[#allocation2 + $0x68] sm:$0xff] }
 0x3a4   : > { %2321 = vperm.xlu1 %2918, %v2950_v9   ;;  %v2242_v47 = vld [vmem:[#allocation2 + $0x70] sm:$0xff] }
 0x3a6   : > { %2316 = vperm.xlu0 %2917, %v2952_v14  }
 0x3a8   : > { %2920 = vset.pattern.permute.xlu1 %v3016_v34 }
 0x3a9   : > { %2377 = vperm.xlu1 %2920, %v2928_v18  }
 0x3aa   : > { %2919 = vset.pattern.permute.xlu0 %v3016_v34 }
 0x3ab   : > { %2373 = vperm.xlu0 %2919, %v2924_v24  }
 0x3ad   : > { %2381 = vperm.xlu1 %2920, %v2922_v54  }
 0x3af   : > { %2385 = vperm.xlu0 %2919, %v2926_v12   ;;  %v2243_v12 = vld [vmem:[#allocation2 + $0x78] sm:$0xff] }
 0x3b1   : > { %2389 = vperm.xlu1 %2920, %v2932_v50  }
 0x3b3   : > { %2393 = vperm.xlu0 %2919, %v2930_v38  }
 0x3b5   : > { %2397 = vperm.xlu1 %2920, %v2936_v45  }
 0x3b7   : > { %2401 = vperm.xlu0 %2919, %v2934_v30  }
 0x3b9   : > { %2405 = vperm.xlu1 %2920, %v2940_v27  }
 0x3bb   : > { %2409 = vperm.xlu0 %2919, %v2938_v0  }
 0x3bd   : > { %2413 = vperm.xlu1 %2920, %v2944_v4  }
 0x3bf   : > { %2417 = vperm.xlu0 %2919, %v2942_v62  }
 0x3c1   : > { %2421 = vperm.xlu1 %2920, %v2948_v53  }
 0x3c3   : > { %2425 = vperm.xlu0 %2919, %v2946_v3  }
 0x3c5   : > { %2429 = vperm.xlu1 %2920, %v2952_v14  }
 0x3c7   : > { %2433 = vperm.xlu0 %2919, %v2950_v9  }
 0x402   : > { %v2257_v10 = vpop.permute.xlu1 %2256 }
 0x403   : > { %v2326_v28 = vmul.f32 %v2257_v10, %v4401_v25 }
 0x405   : > { %2342 = vst.msk [vmem:[%s3122_s9 + $0x10] sm:$0xff] %vm1320_vm3, %v2326_v28 }
 0x409   : > { %v2247_v46 = vpop.permute.xlu0 %2246 }
 0x40a   : > { %v2324_v44 = vmul.f32 %v2247_v46, %v4403_v60 }
 0x40b   : > { %v2262_v35 = vpop.permute.xlu1 %2261 }
 0x40c   : > { %2340 = vst.msk [vmem:[%s3122_s9] sm:$0xff] %vm1320_vm3, %v2324_v44  ;;  %v2327_v40 = vmul.f32 %v2262_v35, %v4407_v58 }
 0x40d   : > { %v2252_v26 = vpop.permute.xlu0 %2251 }
 0x40e   : > { %v2325_v41 = vmul.f32 %v2252_v26, %v2229_v13  ;;  %2343 = vst.msk [vmem:[%s3122_s9 + $0x18] sm:$0xff] %vm1320_vm3, %v2327_v40 }
 0x40f   : > { %v2272_v43 = vpop.permute.xlu1 %2271 }
 0x410   : > { %2341 = vst.msk [vmem:[%s3122_s9 + $0x8] sm:$0xff] %vm1320_vm3, %v2325_v41  ;;  %v2329_v23 = vmul.f32 %v2272_v43, %v4414_v59 }
 0x411   : > { %v2267_v48 = vpop.permute.xlu0 %2266 }
 0x412   : > { %v2328_v36 = vmul.f32 %v2267_v48, %v2232_v5  ;;  %2345 = vst.msk [vmem:[%s3122_s9 + $0x28] sm:$0xff] %vm1320_vm3, %v2329_v23 }
 0x413   : > { %v2282_v11 = vpop.permute.xlu1 %2281 }
 0x414   : > { %2344 = vst.msk [vmem:[%s3122_s9 + $0x20] sm:$0xff] %vm1320_vm3, %v2328_v36  ;;  %v2331_v32 = vmul.f32 %v2282_v11, %v4421_v6 }
 0x415   : > { %v2277_v55 = vpop.permute.xlu0 %2276 }
 0x416   : > { %v2330_v49 = vmul.f32 %v2277_v55, %v2234_v29  ;;  %2347 = vst.msk [vmem:[%s3122_s9 + $0x38] sm:$0xff] %vm1320_vm3, %v2331_v32 }
 0x417   : > { %v2292_v1 = vpop.permute.xlu1 %2291 }
 0x418   : > { %2346 = vst.msk [vmem:[%s3122_s9 + $0x30] sm:$0xff] %vm1320_vm3, %v2330_v49  ;;  %v2333_v61 = vmul.f32 %v2292_v1, %v2237_v39 }
 0x419   : > { %v2287_v17 = vpop.permute.xlu0 %2286 }
 0x41a   : > { %v2332_v16 = vmul.f32 %v2287_v17, %v2236_v57  ;;  %2349 = vst.msk [vmem:[%s3122_s9 + $0x48] sm:$0xff] %vm1320_vm3, %v2333_v61 }
 0x41b   : > { %v2302_v31 = vpop.permute.xlu1 %2301 }
 0x41c   : > { %2348 = vst.msk [vmem:[%s3122_s9 + $0x40] sm:$0xff] %vm1320_vm3, %v2332_v16  ;;  %v2335_v2 = vmul.f32 %v2302_v31, %v2239_v52 }
 0x41d   : > { %v2297_v56 = vpop.permute.xlu0 %2296 }
 0x41e   : > { %v2334_v22 = vmul.f32 %v2297_v56, %v2238_v63  ;;  %2351 = vst.msk [vmem:[%s3122_s9 + $0x58] sm:$0xff] %vm1320_vm3, %v2335_v2 }
 0x41f   : > { %v2312_v20 = vpop.permute.xlu1 %2311 }
 0x420   : > { %2350 = vst.msk [vmem:[%s3122_s9 + $0x50] sm:$0xff] %vm1320_vm3, %v2334_v22  ;;  %v2337_v54 = vmul.f32 %v2312_v20, %v2241_v15 }
 0x421   : > { %v2307_v24 = vpop.permute.xlu0 %2306 }
 0x422   : > { %v2336_v33 = vmul.f32 %v2307_v24, %v2240_v51  ;;  %2353 = vst.msk [vmem:[%s3122_s9 + $0x68] sm:$0xff] %vm1320_vm3, %v2337_v54 }
 0x423   : > { %v2322_v18 = vpop.permute.xlu1 %2321 }
 0x424   : > { %2352 = vst.msk [vmem:[%s3122_s9 + $0x60] sm:$0xff] %vm1320_vm3, %v2336_v33  ;;  %v2339_v7 = vmul.f32 %v2322_v18, %v2243_v12 }
 0x425   : > { %v2317_v38 = vpop.permute.xlu0 %2316 }
 0x426   : > { %v2338_v8 = vmul.f32 %v2317_v38, %v2242_v47  ;;  %2355 = vst.msk [vmem:[%s3122_s9 + $0x78] sm:$0xff] %vm1320_vm3, %v2339_v7 }
 0x428   : > { %2354 = vst.msk [vmem:[%s3122_s9 + $0x70] sm:$0xff] %vm1320_vm3, %v2338_v8  ;;  %v2378_v50 = vpop.permute.xlu1 %2377 }
 0x429   : > { %v2437_v37 = vmul.f32 %v2378_v50, %v2229_v13 }
 0x42a   : > { %v2374_v30 = vpop.permute.xlu0 %2373 }
 0x42b   : > { %v2436_v21 = vmul.f32 %v2374_v30, %v4403_v60  ;;  %2453 = vst.msk [vmem:[%s3122_s9 + $0x8] sm:$0xff] %vm2159_vm4, %v2437_v37 }
 0x42c   : > { %v2382_v45 = vpop.permute.xlu1 %2381 }
 0x42d   : > { %2452 = vst.msk [vmem:[%s3122_s9] sm:$0xff] %vm2159_vm4, %v2436_v21  ;;  %v2438_v42 = vmul.f32 %v2382_v45, %v4401_v25 }
 0x42e   : > { %v2386_v0 = vpop.permute.xlu0 %2385 }
 0x42f   : > { %v2439_v19 = vmul.f32 %v2386_v0, %v4407_v58  ;;  %2454 = vst.msk [vmem:[%s3122_s9 + $0x10] sm:$0xff] %vm2159_vm4, %v2438_v42 }
 0x430   : > { %v2390_v27 = vpop.permute.xlu1 %2389 }
 0x431   : > { %2455 = vst.msk [vmem:[%s3122_s9 + $0x18] sm:$0xff] %vm2159_vm4, %v2439_v19  ;;  %v2440_v62 = vmul.f32 %v2390_v27, %v2232_v5 }
 0x432   : > { %v2394_v4 = vpop.permute.xlu0 %2393 }
 0x433   : > { %v2441_v3 = vmul.f32 %v2394_v4, %v4414_v59  ;;  %2456 = vst.msk [vmem:[%s3122_s9 + $0x20] sm:$0xff] %vm2159_vm4, %v2440_v62 }
 0x434   : > { %v2398_v53 = vpop.permute.xlu1 %2397 }
 0x435   : > { %2457 = vst.msk [vmem:[%s3122_s9 + $0x28] sm:$0xff] %vm2159_vm4, %v2441_v3  ;;  %v2442_v9 = vmul.f32 %v2398_v53, %v2234_v29 }
 0x436   : > { %v2402_v14 = vpop.permute.xlu0 %2401 }
 0x437   : > { %v2443_v34 = vmul.f32 %v2402_v14, %v4421_v6  ;;  %2458 = vst.msk [vmem:[%s3122_s9 + $0x30] sm:$0xff] %vm2159_vm4, %v2442_v9 }
 0x438   : > { %v2406_v25 = vpop.permute.xlu1 %2405 }
 0x439   : > { %2459 = vst.msk [vmem:[%s3122_s9 + $0x38] sm:$0xff] %vm2159_vm4, %v2443_v34  ;;  %v2444_v60 = vmul.f32 %v2406_v25, %v2236_v57 }
 0x43a   : > { %v2410_v10 = vpop.permute.xlu0 %2409 }
 0x43b   : > { %v2445_v28 = vmul.f32 %v2410_v10, %v2237_v39  ;;  %2460 = vst.msk [vmem:[%s3122_s9 + $0x40] sm:$0xff] %vm2159_vm4, %v2444_v60 }
 0x43c   : > { %v2414_v46 = vpop.permute.xlu1 %2413 }
 0x43d   : > { %2461 = vst.msk [vmem:[%s3122_s9 + $0x48] sm:$0xff] %vm2159_vm4, %v2445_v28  ;;  %v2446_v44 = vmul.f32 %v2414_v46, %v2238_v63 }
 0x43e   : > { %v2418_v58 = vpop.permute.xlu0 %2417 }
 0x43f   : > { %v2447_v13 = vmul.f32 %v2418_v58, %v2239_v52  ;;  %2462 = vst.msk [vmem:[%s3122_s9 + $0x50] sm:$0xff] %vm2159_vm4, %v2446_v44 }
 0x440   : > { %v2422_v35 = vpop.permute.xlu1 %2421 }
 0x441   : > { %2463 = vst.msk [vmem:[%s3122_s9 + $0x58] sm:$0xff] %vm2159_vm4, %v2447_v13  ;;  %v2448_v40 = vmul.f32 %v2422_v35, %v2240_v51 }
 0x442   : > { %v2426_v26 = vpop.permute.xlu0 %2425 }
 0x443   : > { %v2449_v41 = vmul.f32 %v2426_v26, %v2241_v15  ;;  %2464 = vst.msk [vmem:[%s3122_s9 + $0x60] sm:$0xff] %vm2159_vm4, %v2448_v40 }
 0x444   : > { %v2430_v59 = vpop.permute.xlu1 %2429 }
 0x445   : > { %2465 = vst.msk [vmem:[%s3122_s9 + $0x68] sm:$0xff] %vm2159_vm4, %v2449_v41  ;;  %v2450_v5 = vmul.f32 %v2430_v59, %v2242_v47 }
 0x446   : > { %v2434_v43 = vpop.permute.xlu0 %2433 }
 0x447   : > { %v2451_v23 = vmul.f32 %v2434_v43, %v2243_v12  ;;  %2466 = vst.msk [vmem:[%s3122_s9 + $0x70] sm:$0xff] %vm2159_vm4, %v2450_v5 }
 0x449   : > { %2467 = vst.msk [vmem:[%s3122_s9 + $0x78] sm:$0xff] %vm2159_vm4, %v2451_v23 }
 0x44a PF: > { %s14_s21 = sadd.s32 1, %s3007_s21   ;;  %s4712_s15 = smov %s2987_s16 }
 0x44b   : > { %p11_p1 = scmp.ge.s32.totalorder %s14_s21, 6   ;;  %s4713_s16 = smov %s3093_s28 }
 0x44c   : > { %s4714_s17 = smov %s2999_s19  ;;  %s4715_s18 = smov %s3003_s20 }
 0x44d   : > { %s4716_s19 = smov %s4719_s22  ;;  %s4717_s20 = smov %s4723_s23 }
 0x44e   :  { %13 = sbr.rel (!%p11_p1) target bundleno = 4 (0x4), region = 126 }

</bundles_post_ra>
